<compile_context>
chip_gen: v6e
topology: v6e:2x2x1
jax: 0.10.0
libtpu: 0.0.40
codegen_flags: <defaults>
</compile_context>

<pallas_src>
import math
from typing import NamedTuple

import numpy as np
import jax
import jax.numpy as jnp
from jax.experimental import pallas as pl
from jax.experimental.pallas import tpu as pltpu

# ---------------- configuration (DownsampleGRFSQ semantics, small synthetic sizes) -------------
INPUT_DIM = 32                 # input_dim (and downsample_dims, since downsample_dims=None)
N_CODEBOOKS = 2                # residual quantizers
N_GROUPS = 2                   # groups of the GroupedResidualFSQ
LEVELS = (8, 5, 5, 5)          # FSQ levels
DOWNSAMPLE_FACTOR = (2, 2)     # kernel_size == stride for each (transpose)conv
MLP_RATIO = 4
DW_KERNEL = 7                  # ConvNeXtBlock depthwise kernel
DW_PAD = (DW_KERNEL - 1) // 2


# ----------------------------------- in-kernel helpers -----------------------------------------
def _erf(x):
    # TODO(synk): lax.erf has no Mosaic lowering; exact-GELU erf approximated with
    # Abramowitz & Stegun 7.1.26 (max abs err ~1.5e-7, i.e. within f32 rounding).
    p = 0.3275911
    a1, a2, a3, a4, a5 = 0.254829592, -0.284496736, 1.421413741, -1.453152027, 1.061405429
    ax = jnp.abs(x)
    t = 1.0 / (1.0 + p * ax)
    poly = ((((a5 * t + a4) * t + a3) * t + a2) * t + a1) * t
    y = 1.0 - poly * jnp.exp(-ax * ax)
    return jnp.where(x >= 0, y, -y)


def _gelu_exact(x):
    return 0.5 * x * (1.0 + _erf(x * (1.0 / math.sqrt(2.0))))


# ----------------------------------- fused kernel -----------------------------------------------
def _build_kernel(T0, C):
    """Builds the fused per-batch kernel; all sizes are Python ints (static)."""
    F = DOWNSAMPLE_FACTOR
    G, L, R = N_GROUPS, len(LEVELS), N_CODEBOOKS
    n_stages = len(F)

    t_down = [T0]
    for f in F:
        t_down.append(t_down[-1] // f)
    Td = t_down[-1]
    up_factors = list(reversed(F))
    t_up = [Td]
    for f in up_factors:
        t_up.append(t_up[-1] * f)
    Tup = t_up[-1]

    def kernel(*refs):
        (x_ref, conv_w_ref, conv_b_ref, tconv_w_ref, tconv_b_ref,
         dww_ref, vec_ref, w1_ref, b1_ref, w2_ref,
         win_ref, bin_ref, wout_ref, bout_ref, tab_ref, code_mat_ref) = refs[:16]
        dsel_refs = refs[16:16 + n_stages]                       # 0/1 row-gather mats (down path)
        uexp_refs = refs[16 + n_stages:16 + 2 * n_stages]        # 0/1 row-scatter mats (up path)
        y_ref, codes_ref, lat_ref = refs[16 + 2 * n_stages:]
        f32 = jnp.float32

        def convnext(h, T, j):
            """ConvNeXtBlock on a (T, C) channel-last tile; j indexes the stacked parameters."""
            dww = dww_ref[j]                                     # (DW_KERNEL, C)
            vec = vec_ref[j]                                     # (5, C): dwb, lnw, lnb, b2, gamma
            dwb, lnw, lnb, b2, gamma = (vec[i:i + 1, :] for i in range(5))
            w1, b1, w2 = w1_ref[j], b1_ref[j], w2_ref[j]
            # depthwise conv (kernel 7, pad 3).  The batch grid isolates batches, so a single
            # padded tile per block suffices (no per-batch loop, no cross-batch masking).
            zpad = jnp.zeros((DW_PAD, C), f32)
            xp = jnp.concatenate([zpad, h, zpad], axis=0)        # (T + 2*pad, C)
            acc = xp[0:T, :] * dww[0:1, :]
            for k in range(1, DW_KERNEL):
                acc = acc + xp[k:k + T, :] * dww[k:k + 1, :]
            hd = acc + dwb
            # LayerNorm over channels (eps=1e-6, biased variance) as nn.LayerNorm
            mean = jnp.mean(hd, axis=-1, keepdims=True)
            var = jnp.mean(jnp.square(hd - mean), axis=-1, keepdims=True)
            hn = (hd - mean) * jax.lax.rsqrt(var + 1e-6) * lnw + lnb
            hm = jnp.dot(hn, w1, preferred_element_type=f32) + b1     # (T, 4C)
            hm = _gelu_exact(hm)
            hm = jnp.dot(hm, w2, preferred_element_type=f32) + b2     # (T, C)
            return h + hm * gamma                                      # layer scale + residual

        # ---------- downsample: fused-tap Conv1d(kernel=stride=f) + ConvNeXt ----------
        h = x_ref[...].astype(f32)                               # (T0, C), register resident
        for stage, f in enumerate(F):
            Tout = t_down[stage + 1]
            taps = jnp.dot(h, conv_w_ref[stage], preferred_element_type=f32)   # (Tin, f*C)
            out = None
            for k in range(f):
                sel = dsel_refs[stage][k]                        # (Tout, Tin) row-gather of times t*f+k
                term = jnp.dot(sel, taps[:, k * C:(k + 1) * C], preferred_element_type=f32)
                out = term if out is None else out + term
            h = out + conv_b_ref[stage]                          # (Tout, C)
            h = convnext(h, Tout, stage)

        lat_ref[...] = h.astype(lat_ref.dtype)                   # latents (Td, C)

        # ---------- grouped residual FSQ (block-diagonal project_in / project_out) ----------
        half_l, offset, shift, half_w = (tab_ref[i:i + 1, :] for i in range(4))
        z = jnp.dot(h, win_ref[...], preferred_element_type=f32) + bin_ref[...]   # (Td, G*L)
        residual = z
        qsum = jnp.zeros_like(z)
        code_acc = jnp.zeros((Td, G * R), f32)
        for r in range(R):
            sc = tab_ref[4 + r:5 + r, :]                         # (levels - 1)^-r per level
            zr = residual / sc
            rounded = jnp.round(jnp.tanh(zr + shift) * half_l - offset)
            codes = rounded / half_w                             # FSQ codes in [-1, 1]
            # per-(group, quantizer) codebook index via basis-selection matmul -> column g*R + r
            code_acc = code_acc + jnp.dot(rounded + half_w, code_mat_ref[r],
                                          preferred_element_type=f32)
            quant = codes * sc
            residual = residual - quant
            qsum = qsum + quant
        codes_ref[...] = jnp.round(code_acc).astype(jnp.int32)   # single dense store of all indices
        h = jnp.dot(qsum, wout_ref[...], preferred_element_type=f32) + bout_ref[...]   # (Td, C)

        # ---------- upsample: fused-tap ConvTranspose1d(kernel=stride=f) + ConvNeXt ----------
        for stage, f in enumerate(up_factors):
            Tout = t_up[stage + 1]
            taps = jnp.dot(h, tconv_w_ref[stage], preferred_element_type=f32)   # (Tin, f*C)
            out = None
            for k in range(f):
                exp = uexp_refs[stage][k]                        # (Tout, Tin) row-scatter to times t*f+k
                term = jnp.dot(exp, taps[:, k * C:(k + 1) * C], preferred_element_type=f32)
                out = term if out is None else out + term
            h = out + tconv_b_ref[stage]                         # (Tout, C), taps already interleaved
            h = convnext(h, Tout, n_stages + stage)

        y_ref[...] = h.astype(y_ref.dtype)                       # (Tup, C)

    return kernel, Td, Tup, t_down, t_up


# ----------------------------------- wrapper -----------------------------------------------------
class FSQResult(NamedTuple):
    quantized: jax.Array
    codes: jax.Array
    latents: jax.Array


def _const_spec(shape):
    n = len(shape)
    return pl.BlockSpec(tuple(shape), lambda b, _n=n: (0,) * _n)    # full block, constant index map


def downsample_grfsq_forward(z, params):
    """z: (B, C, T) -- PyTorch NCL layout."""
    B, C, T0 = z.shape
    G, L, R = N_GROUPS, len(LEVELS), N_CODEBOOKS
    kernel, Td, Tup, t_down, t_up = _build_kernel(T0, C)
    F = DOWNSAMPLE_FACTOR
    up_factors = list(reversed(F))

    x = jnp.transpose(z, (0, 2, 1))                              # (B, T0, C) channel-last

    # 0/1 time-axis gather / scatter matrices (run on the otherwise idle MXU; avoids in-register
    # reshapes, per-row slicing and sublane-strided loads entirely).
    dsel, uexp = [], []
    for s, f in enumerate(F):
        tin, tout = t_down[s], t_down[s + 1]
        m = np.zeros((f, tout, tin), np.float32)
        for k in range(f):
            m[k, np.arange(tout), np.arange(tout) * f + k] = 1.0
        dsel.append(jnp.asarray(m))
    for s, f in enumerate(up_factors):
        tin, tout = t_up[s], t_up[s + 1]
        m = np.zeros((f, tout, tin), np.float32)
        for k in range(f):
            m[k, np.arange(tin) * f + k, np.arange(tin)] = 1.0
        uexp.append(jnp.asarray(m))

    weight_names = ("conv_w", "conv_b", "tconv_w", "tconv_b", "dww", "cnvec",
                    "w1", "b1", "w2", "win", "bin", "wout", "bout", "fsq_tab", "code_mat")
    weights = tuple(params[n] for n in weight_names) + tuple(dsel) + tuple(uexp)

    in_specs = [pl.BlockSpec((None, T0, C), lambda b: (b, 0, 0))]   # activation streams per batch
    in_specs += [_const_spec(w.shape) for w in weights]             # weights: fetch once, never re-DMA

    out_specs = (pl.BlockSpec((None, Tup, C), lambda b: (b, 0, 0)),
                 pl.BlockSpec((None, Td, G * R), lambda b: (b, 0, 0)),
                 pl.BlockSpec((None, Td, C), lambda b: (b, 0, 0)))

    y, codes3d, lat = pl.pallas_call(
        kernel,
        grid=(B,),
        out_shape=(jax.ShapeDtypeStruct((B, Tup, C), z.dtype),
                   jax.ShapeDtypeStruct((B, Td, G * R), jnp.int32),
                   jax.ShapeDtypeStruct((B, Td, C), z.dtype)),
        in_specs=in_specs,
        out_specs=out_specs,
        compiler_params=pltpu.CompilerParams(
            dimension_semantics=("parallel",),                   # megacore batch sharding on v7x
            vmem_limit_bytes=32 * 1024 * 1024),
    )(x, *weights)

    quantized = jnp.transpose(y, (0, 2, 1))                      # (B, C, Tup)
    diff = T0 - Tup
    left = diff // 2
    right = diff - left
    if diff > 0:
        quantized = jnp.pad(quantized, ((0, 0), (0, 0), (left, right)))
    elif diff < 0:
        quantized = quantized[..., left:quantized.shape[-1] - right]
    codes = jnp.transpose(codes3d.reshape(B, Td, G, R), (2, 0, 3, 1))   # indices.mT -> (G, B, R, Td)
    latents = jnp.transpose(lat, (0, 2, 1))                             # (B, C, Td)
    return FSQResult(quantized=quantized, codes=codes, latents=latents)


# ----------------------------------- parameters --------------------------------------------------
def _trunc_normal(key, shape, std=0.02):
    return std * jax.random.truncated_normal(key, -2.0, 2.0, shape, jnp.float32)


def init_params(key):
    # All stage dims equal INPUT_DIM (downsample_dims=None), so per-stage weights can be stacked.
    C = INPUT_DIM
    G, L, R = N_GROUPS, len(LEVELS), N_CODEBOOKS
    H = MLP_RATIO * C
    Dg = C // G
    n_blocks = 2 * len(DOWNSAMPLE_FACTOR)       # ConvNeXt blocks: [down..., up...]
    keys = iter(jax.random.split(key, 128))

    # Conv1d(kernel=stride=f): torch weight (Cout, Cin, f) -> fused (Cin, f*Cout);
    # columns k*C:(k+1)*C hold tap k, paired with the in-kernel time-gather matmul.
    conv_w, conv_b = [], []
    for f in DOWNSAMPLE_FACTOR:
        w = _trunc_normal(next(keys), (C, C, f))
        conv_w.append(jnp.transpose(w, (1, 2, 0)).reshape(C, f * C))
        conv_b.append(jnp.zeros((1, C), jnp.float32))
    # ConvTranspose1d(kernel=stride=f): torch weight (Cin, Cout, f) -> fused (Cin, f*Cout);
    # columns k*C:(k+1)*C hold tap k, interleaved in time by the 0/1 scatter matmul.
    tconv_w, tconv_b = [], []
    for f in reversed(DOWNSAMPLE_FACTOR):
        w = _trunc_normal(next(keys), (C, C, f))
        tconv_w.append(jnp.transpose(w, (0, 2, 1)).reshape(C, f * C))
        tconv_b.append(jnp.zeros((1, C), jnp.float32))

    dww, cnvec, w1, b1, w2 = [], [], [], [], []
    for _ in range(n_blocks):
        dww.append(jnp.transpose(_trunc_normal(next(keys), (C, 1, DW_KERNEL)),
                                 (2, 1, 0)).reshape(DW_KERNEL, C))
        cnvec.append(jnp.stack([jnp.zeros((C,), jnp.float32),           # depthwise bias
                                jnp.ones((C,), jnp.float32),            # LayerNorm weight
                                jnp.zeros((C,), jnp.float32),           # LayerNorm bias
                                jnp.zeros((C,), jnp.float32),           # pwconv2 bias
                                jnp.full((C,), 1e-6, jnp.float32)]))    # layer-scale gamma
        w1.append(jnp.transpose(_trunc_normal(next(keys), (H, C))))     # (C, 4C)
        b1.append(jnp.zeros((1, H), jnp.float32))
        w2.append(jnp.transpose(_trunc_normal(next(keys), (C, H))))     # (4C, C)

    # GroupedResidualFSQ: per-group project_in/out packed block-diagonally -> one matmul per side.
    win = jnp.zeros((C, G * L), jnp.float32)
    wout = jnp.zeros((G * L, C), jnp.float32)
    for g in range(G):
        wi = jnp.transpose(_trunc_normal(next(keys), (L, Dg)))          # (Dg, L)
        wo = jnp.transpose(_trunc_normal(next(keys), (Dg, L)))          # (L, Dg)
        win = win.at[g * Dg:(g + 1) * Dg, g * L:(g + 1) * L].set(wi)
        wout = wout.at[g * L:(g + 1) * L, g * Dg:(g + 1) * Dg].set(wo)

    levels = np.array(LEVELS, np.float32)
    eps = 1e-3
    half_l = (levels - 1.0) * (1.0 + eps) / 2.0
    offset = np.where(np.array(LEVELS, np.int64) % 2 == 0, 0.5, 0.0).astype(np.float32)
    shift = np.arctanh(offset / half_l).astype(np.float32)
    half_width = (np.array(LEVELS, np.int64) // 2).astype(np.float32)
    scales = np.stack([(levels - 1.0) ** (-float(r)) for r in range(R)])       # (R, L)
    tab = np.concatenate([np.stack([half_l, offset, shift, half_width]), scales], axis=0)
    fsq_tab = jnp.asarray(np.tile(tab, (1, G)).astype(np.float32))             # (4 + R, G*L)

    # basis-selection matrices: (digits) @ code_mat[r] puts group g's codebook index into
    # output column g*R + r (code reduction runs on the MXU; codes get one dense store).
    basis = np.concatenate([[1.0], np.cumprod(levels[:-1])]).astype(np.float32)
    code_mat = np.zeros((R, G * L, G * R), np.float32)
    for r in range(R):
        for g in range(G):
            for l in range(L):
                code_mat[r, g * L + l, g * R + r] = basis[l]

    return dict(
        conv_w=jnp.stack(conv_w), conv_b=jnp.stack(conv_b),
        tconv_w=jnp.stack(tconv_w), tconv_b=jnp.stack(tconv_b),
        dww=jnp.stack(dww), cnvec=jnp.stack(cnvec),
        w1=jnp.stack(w1), b1=jnp.stack(b1), w2=jnp.stack(w2),
        win=win, bin=jnp.zeros((1, G * L), jnp.float32),
        wout=wout, bout=jnp.zeros((1, C), jnp.float32),
        fsq_tab=fsq_tab, code_mat=jnp.asarray(code_mat),
    )


# ----------------------------------- main ---------------------------------------------------------
if __name__ == "__main__":
    key = jax.random.PRNGKey(0)
    pkey, xkey = jax.random.split(key)
    params = init_params(pkey)

    B, T = 2, 16
    z = jax.random.normal(xkey, (B, INPUT_DIM, T), jnp.float32)

    fwd = jax.jit(downsample_grfsq_forward)
    result = fwd(z, params)
    jax.tree_util.tree_map(jax.block_until_ready, result)

    Td = T // (DOWNSAMPLE_FACTOR[0] * DOWNSAMPLE_FACTOR[1])
    assert result.quantized.shape == (B, INPUT_DIM, T)
    assert result.latents.shape == (B, INPUT_DIM, Td)
    assert result.codes.shape == (N_GROUPS, B, N_CODEBOOKS, Td)
    assert result.codes.dtype == jnp.int32
    assert bool(jnp.all(result.codes >= 0)) and bool(jnp.all(result.codes < int(np.prod(LEVELS))))
    assert bool(jnp.all(jnp.isfinite(result.quantized)))
    print("KERNEL_OK")
</pallas_src>

<mosaic_0001>
module attributes {stable_mosaic.version = 11 : i64} {
  func.func @kernel(%arg0: i32, %arg1: memref<1x16x32xf32, #tpu.memory_space<vmem>>, %arg2: memref<2x32x64xf32, #tpu.memory_space<vmem>>, %arg3: memref<2x1x32xf32, #tpu.memory_space<vmem>>, %arg4: memref<2x32x64xf32, #tpu.memory_space<vmem>>, %arg5: memref<2x1x32xf32, #tpu.memory_space<vmem>>, %arg6: memref<4x7x32xf32, #tpu.memory_space<vmem>>, %arg7: memref<4x5x32xf32, #tpu.memory_space<vmem>>, %arg8: memref<4x32x128xf32, #tpu.memory_space<vmem>>, %arg9: memref<4x1x128xf32, #tpu.memory_space<vmem>>, %arg10: memref<4x128x32xf32, #tpu.memory_space<vmem>>, %arg11: memref<32x8xf32, #tpu.memory_space<vmem>>, %arg12: memref<1x8xf32, #tpu.memory_space<vmem>>, %arg13: memref<8x32xf32, #tpu.memory_space<vmem>>, %arg14: memref<1x32xf32, #tpu.memory_space<vmem>>, %arg15: memref<6x8xf32, #tpu.memory_space<vmem>>, %arg16: memref<2x8x4xf32, #tpu.memory_space<vmem>>, %arg17: memref<2x8x16xf32, #tpu.memory_space<vmem>>, %arg18: memref<2x4x8xf32, #tpu.memory_space<vmem>>, %arg19: memref<2x8x4xf32, #tpu.memory_space<vmem>>, %arg20: memref<2x16x8xf32, #tpu.memory_space<vmem>>, %arg21: memref<1x16x32xf32, #tpu.memory_space<vmem>>, %arg22: memref<1x4x4xi32, #tpu.memory_space<vmem>>, %arg23: memref<1x4x32xf32, #tpu.memory_space<vmem>>) attributes {dimension_semantics = [#tpu.dimension_semantics<parallel>], iteration_bounds = array<i64: 2>, scalar_prefetch = 0 : i64, scratch_operands = 0 : i64, tpu.core_type = #tpu.core_type<tc>, window_params = [{transform_indices = @transform_0, window_bounds = array<i64: 1, 16, 32>}, {pipeline_mode = #tpu.pipeline_mode<synchronous>, transform_indices = @transform_1, window_bounds = array<i64: 2, 32, 64>}, {pipeline_mode = #tpu.pipeline_mode<synchronous>, transform_indices = @transform_2, window_bounds = array<i64: 2, 1, 32>}, {pipeline_mode = #tpu.pipeline_mode<synchronous>, transform_indices = @transform_3, window_bounds = array<i64: 2, 32, 64>}, {pipeline_mode = #tpu.pipeline_mode<synchronous>, transform_indices = @transform_4, window_bounds = array<i64: 2, 1, 32>}, {pipeline_mode = #tpu.pipeline_mode<synchronous>, transform_indices = @transform_5, window_bounds = array<i64: 4, 7, 32>}, {pipeline_mode = #tpu.pipeline_mode<synchronous>, transform_indices = @transform_6, window_bounds = array<i64: 4, 5, 32>}, {pipeline_mode = #tpu.pipeline_mode<synchronous>, transform_indices = @transform_7, window_bounds = array<i64: 4, 32, 128>}, {pipeline_mode = #tpu.pipeline_mode<synchronous>, transform_indices = @transform_8, window_bounds = array<i64: 4, 1, 128>}, {pipeline_mode = #tpu.pipeline_mode<synchronous>, transform_indices = @transform_9, window_bounds = array<i64: 4, 128, 32>}, {pipeline_mode = #tpu.pipeline_mode<synchronous>, transform_indices = @transform_10, window_bounds = array<i64: 32, 8>}, {pipeline_mode = #tpu.pipeline_mode<synchronous>, transform_indices = @transform_11, window_bounds = array<i64: 1, 8>}, {pipeline_mode = #tpu.pipeline_mode<synchronous>, transform_indices = @transform_12, window_bounds = array<i64: 8, 32>}, {pipeline_mode = #tpu.pipeline_mode<synchronous>, transform_indices = @transform_13, window_bounds = array<i64: 1, 32>}, {pipeline_mode = #tpu.pipeline_mode<synchronous>, transform_indices = @transform_14, window_bounds = array<i64: 6, 8>}, {pipeline_mode = #tpu.pipeline_mode<synchronous>, transform_indices = @transform_15, window_bounds = array<i64: 2, 8, 4>}, {pipeline_mode = #tpu.pipeline_mode<synchronous>, transform_indices = @transform_16, window_bounds = array<i64: 2, 8, 16>}, {pipeline_mode = #tpu.pipeline_mode<synchronous>, transform_indices = @transform_17, window_bounds = array<i64: 2, 4, 8>}, {pipeline_mode = #tpu.pipeline_mode<synchronous>, transform_indices = @transform_18, window_bounds = array<i64: 2, 8, 4>}, {pipeline_mode = #tpu.pipeline_mode<synchronous>, transform_indices = @transform_19, window_bounds = array<i64: 2, 16, 8>}, {transform_indices = @transform_20, window_bounds = array<i64: 1, 16, 32>}, {transform_indices = @transform_21, window_bounds = array<i64: 1, 4, 4>}, {transform_indices = @transform_22, window_bounds = array<i64: 1, 4, 32>}]} {
    %c0 = arith.constant 0 : index
    %c0_0 = arith.constant 0 : index
    %c0_1 = arith.constant 0 : index
    %0 = vector.load %arg1[%c0, %c0_0, %c0_1] : memref<1x16x32xf32, #tpu.memory_space<vmem>>, vector<1x16x32xf32>
    %1 = vector.shape_cast %0 : vector<1x16x32xf32> to vector<16x32xf32>
    %c0_2 = arith.constant 0 : index
    %c0_3 = arith.constant 0 : index
    %c0_4 = arith.constant 0 : index
    %2 = vector.load %arg2[%c0_2, %c0_3, %c0_4] : memref<2x32x64xf32, #tpu.memory_space<vmem>>, vector<1x32x64xf32>
    %3 = vector.shape_cast %2 : vector<1x32x64xf32> to vector<32x64xf32>
    %cst = arith.constant dense<0.000000e+00> : vector<16x64xf32>
    %4 = tpu.matmul %1, %3, %cst {dimension_numbers = #tpu.dot_dimension_numbers<[1], [0], [0], [1], [0, 0, 1, 1], [], []>} : vector<16x32xf32>, vector<32x64xf32>, vector<16x64xf32> -> vector<16x64xf32>
    %c0_5 = arith.constant 0 : index
    %c0_6 = arith.constant 0 : index
    %c0_7 = arith.constant 0 : index
    %5 = vector.load %arg17[%c0_5, %c0_6, %c0_7] : memref<2x8x16xf32, #tpu.memory_space<vmem>>, vector<1x8x16xf32>
    %6 = vector.shape_cast %5 : vector<1x8x16xf32> to vector<8x16xf32>
    %7 = vector.extract_strided_slice %4 {offsets = [0, 0], sizes = [16, 32], strides = [1, 1]} : vector<16x64xf32> to vector<16x32xf32>
    %cst_8 = arith.constant dense<0.000000e+00> : vector<8x32xf32>
    %8 = tpu.matmul %6, %7, %cst_8 {dimension_numbers = #tpu.dot_dimension_numbers<[1], [0], [0], [1], [0, 0, 1, 1], [], []>} : vector<8x16xf32>, vector<16x32xf32>, vector<8x32xf32> -> vector<8x32xf32>
    %c1 = arith.constant 1 : index
    %c0_9 = arith.constant 0 : index
    %c0_10 = arith.constant 0 : index
    %9 = vector.load %arg17[%c1, %c0_9, %c0_10] : memref<2x8x16xf32, #tpu.memory_space<vmem>>, vector<1x8x16xf32>
    %10 = vector.shape_cast %9 : vector<1x8x16xf32> to vector<8x16xf32>
    %11 = vector.extract_strided_slice %4 {offsets = [0, 32], sizes = [16, 32], strides = [1, 1]} : vector<16x64xf32> to vector<16x32xf32>
    %cst_11 = arith.constant dense<0.000000e+00> : vector<8x32xf32>
    %12 = tpu.matmul %10, %11, %cst_11 {dimension_numbers = #tpu.dot_dimension_numbers<[1], [0], [0], [1], [0, 0, 1, 1], [], []>} : vector<8x16xf32>, vector<16x32xf32>, vector<8x32xf32> -> vector<8x32xf32>
    %13 = arith.addf %8, %12 : vector<8x32xf32>
    %c0_12 = arith.constant 0 : index
    %c0_13 = arith.constant 0 : index
    %c0_14 = arith.constant 0 : index
    %14 = vector.load %arg3[%c0_12, %c0_13, %c0_14] : memref<2x1x32xf32, #tpu.memory_space<vmem>>, vector<1x1x32xf32>
    %15 = vector.shape_cast %14 : vector<1x1x32xf32> to vector<1x32xf32>
    %16 = vector.broadcast %15 : vector<1x32xf32> to vector<8x32xf32>
    %17 = arith.addf %13, %16 : vector<8x32xf32>
    %c0_15 = arith.constant 0 : index
    %c0_16 = arith.constant 0 : index
    %c0_17 = arith.constant 0 : index
    %18 = vector.load %arg6[%c0_15, %c0_16, %c0_17] : memref<4x7x32xf32, #tpu.memory_space<vmem>>, vector<1x7x32xf32>
    %19 = vector.shape_cast %18 : vector<1x7x32xf32> to vector<7x32xf32>
    %c0_18 = arith.constant 0 : index
    %c0_19 = arith.constant 0 : index
    %c0_20 = arith.constant 0 : index
    %20 = vector.load %arg7[%c0_18, %c0_19, %c0_20] : memref<4x5x32xf32, #tpu.memory_space<vmem>>, vector<1x5x32xf32>
    %21 = vector.shape_cast %20 : vector<1x5x32xf32> to vector<5x32xf32>
    %22 = vector.extract_strided_slice %21 {offsets = [0, 0], sizes = [1, 32], strides = [1, 1]} : vector<5x32xf32> to vector<1x32xf32>
    %23 = vector.extract_strided_slice %21 {offsets = [1, 0], sizes = [1, 32], strides = [1, 1]} : vector<5x32xf32> to vector<1x32xf32>
    %24 = vector.extract_strided_slice %21 {offsets = [2, 0], sizes = [1, 32], strides = [1, 1]} : vector<5x32xf32> to vector<1x32xf32>
    %25 = vector.extract_strided_slice %21 {offsets = [3, 0], sizes = [1, 32], strides = [1, 1]} : vector<5x32xf32> to vector<1x32xf32>
    %26 = vector.extract_strided_slice %21 {offsets = [4, 0], sizes = [1, 32], strides = [1, 1]} : vector<5x32xf32> to vector<1x32xf32>
    %c0_21 = arith.constant 0 : index
    %c0_22 = arith.constant 0 : index
    %c0_23 = arith.constant 0 : index
    %27 = vector.load %arg8[%c0_21, %c0_22, %c0_23] : memref<4x32x128xf32, #tpu.memory_space<vmem>>, vector<1x32x128xf32>
    %28 = vector.shape_cast %27 : vector<1x32x128xf32> to vector<32x128xf32>
    %c0_24 = arith.constant 0 : index
    %c0_25 = arith.constant 0 : index
    %c0_26 = arith.constant 0 : index
    %29 = vector.load %arg9[%c0_24, %c0_25, %c0_26] : memref<4x1x128xf32, #tpu.memory_space<vmem>>, vector<1x1x128xf32>
    %30 = vector.shape_cast %29 : vector<1x1x128xf32> to vector<1x128xf32>
    %c0_27 = arith.constant 0 : index
    %c0_28 = arith.constant 0 : index
    %c0_29 = arith.constant 0 : index
    %31 = vector.load %arg10[%c0_27, %c0_28, %c0_29] : memref<4x128x32xf32, #tpu.memory_space<vmem>>, vector<1x128x32xf32>
    %32 = vector.shape_cast %31 : vector<1x128x32xf32> to vector<128x32xf32>
    %cst_30 = arith.constant 0.000000e+00 : f32
    %33 = vector.broadcast %cst_30 : f32 to vector<3x32xf32>
    %34 = tpu.concatenate %33, %17, %33 in 0 : vector<3x32xf32>, vector<8x32xf32>, vector<3x32xf32> -> vector<14x32xf32>
    %35 = vector.extract_strided_slice %34 {offsets = [0, 0], sizes = [8, 32], strides = [1, 1]} : vector<14x32xf32> to vector<8x32xf32>
    %36 = vector.extract_strided_slice %19 {offsets = [0, 0], sizes = [1, 32], strides = [1, 1]} : vector<7x32xf32> to vector<1x32xf32>
    %37 = vector.broadcast %36 : vector<1x32xf32> to vector<8x32xf32>
    %38 = arith.mulf %35, %37 : vector<8x32xf32>
    %39 = vector.extract_strided_slice %34 {offsets = [1, 0], sizes = [8, 32], strides = [1, 1]} : vector<14x32xf32> to vector<8x32xf32>
    %40 = vector.extract_strided_slice %19 {offsets = [1, 0], sizes = [1, 32], strides = [1, 1]} : vector<7x32xf32> to vector<1x32xf32>
    %41 = vector.broadcast %40 : vector<1x32xf32> to vector<8x32xf32>
    %42 = arith.mulf %39, %41 : vector<8x32xf32>
    %43 = arith.addf %38, %42 : vector<8x32xf32>
    %44 = vector.extract_strided_slice %34 {offsets = [2, 0], sizes = [8, 32], strides = [1, 1]} : vector<14x32xf32> to vector<8x32xf32>
    %45 = vector.extract_strided_slice %19 {offsets = [2, 0], sizes = [1, 32], strides = [1, 1]} : vector<7x32xf32> to vector<1x32xf32>
    %46 = vector.broadcast %45 : vector<1x32xf32> to vector<8x32xf32>
    %47 = arith.mulf %44, %46 : vector<8x32xf32>
    %48 = arith.addf %43, %47 : vector<8x32xf32>
    %49 = vector.extract_strided_slice %34 {offsets = [3, 0], sizes = [8, 32], strides = [1, 1]} : vector<14x32xf32> to vector<8x32xf32>
    %50 = vector.extract_strided_slice %19 {offsets = [3, 0], sizes = [1, 32], strides = [1, 1]} : vector<7x32xf32> to vector<1x32xf32>
    %51 = vector.broadcast %50 : vector<1x32xf32> to vector<8x32xf32>
    %52 = arith.mulf %49, %51 : vector<8x32xf32>
    %53 = arith.addf %48, %52 : vector<8x32xf32>
    %54 = vector.extract_strided_slice %34 {offsets = [4, 0], sizes = [8, 32], strides = [1, 1]} : vector<14x32xf32> to vector<8x32xf32>
    %55 = vector.extract_strided_slice %19 {offsets = [4, 0], sizes = [1, 32], strides = [1, 1]} : vector<7x32xf32> to vector<1x32xf32>
    %56 = vector.broadcast %55 : vector<1x32xf32> to vector<8x32xf32>
    %57 = arith.mulf %54, %56 : vector<8x32xf32>
    %58 = arith.addf %53, %57 : vector<8x32xf32>
    %59 = vector.extract_strided_slice %34 {offsets = [5, 0], sizes = [8, 32], strides = [1, 1]} : vector<14x32xf32> to vector<8x32xf32>
    %60 = vector.extract_strided_slice %19 {offsets = [5, 0], sizes = [1, 32], strides = [1, 1]} : vector<7x32xf32> to vector<1x32xf32>
    %61 = vector.broadcast %60 : vector<1x32xf32> to vector<8x32xf32>
    %62 = arith.mulf %59, %61 : vector<8x32xf32>
    %63 = arith.addf %58, %62 : vector<8x32xf32>
    %64 = vector.extract_strided_slice %34 {offsets = [6, 0], sizes = [8, 32], strides = [1, 1]} : vector<14x32xf32> to vector<8x32xf32>
    %65 = vector.extract_strided_slice %19 {offsets = [6, 0], sizes = [1, 32], strides = [1, 1]} : vector<7x32xf32> to vector<1x32xf32>
    %66 = vector.broadcast %65 : vector<1x32xf32> to vector<8x32xf32>
    %67 = arith.mulf %64, %66 : vector<8x32xf32>
    %68 = arith.addf %63, %67 : vector<8x32xf32>
    %69 = vector.broadcast %22 : vector<1x32xf32> to vector<8x32xf32>
    %70 = arith.addf %68, %69 : vector<8x32xf32>
    %cst_31 = arith.constant dense<0.000000e+00> : vector<8xf32>
    %71 = vector.multi_reduction <add>, %70, %cst_31 [1] : vector<8x32xf32> to vector<8xf32>
    %72 = vector.shape_cast %71 : vector<8xf32> to vector<8x1xf32>
    %cst_32 = arith.constant 3.200000e+01 : f32
    %73 = vector.broadcast %cst_32 : f32 to vector<8x1xf32>
    %74 = arith.divf %72, %73 : vector<8x1xf32>
    %75 = vector.broadcast %74 : vector<8x1xf32> to vector<8x32xf32>
    %76 = arith.subf %70, %75 : vector<8x32xf32>
    %77 = arith.mulf %76, %76 : vector<8x32xf32>
    %cst_33 = arith.constant dense<0.000000e+00> : vector<8xf32>
    %78 = vector.multi_reduction <add>, %77, %cst_33 [1] : vector<8x32xf32> to vector<8xf32>
    %79 = vector.shape_cast %78 : vector<8xf32> to vector<8x1xf32>
    %cst_34 = arith.constant 3.200000e+01 : f32
    %80 = vector.broadcast %cst_34 : f32 to vector<8x1xf32>
    %81 = arith.divf %79, %80 : vector<8x1xf32>
    %82 = vector.broadcast %74 : vector<8x1xf32> to vector<8x32xf32>
    %83 = arith.subf %70, %82 : vector<8x32xf32>
    %cst_35 = arith.constant 9.99999997E-7 : f32
    %84 = vector.broadcast %cst_35 : f32 to vector<8x1xf32>
    %85 = arith.addf %81, %84 : vector<8x1xf32>
    %86 = math.rsqrt %85 : vector<8x1xf32>
    %87 = vector.broadcast %86 : vector<8x1xf32> to vector<8x32xf32>
    %88 = arith.mulf %83, %87 : vector<8x32xf32>
    %89 = vector.broadcast %23 : vector<1x32xf32> to vector<8x32xf32>
    %90 = arith.mulf %88, %89 : vector<8x32xf32>
    %91 = vector.broadcast %24 : vector<1x32xf32> to vector<8x32xf32>
    %92 = arith.addf %90, %91 : vector<8x32xf32>
    %cst_36 = arith.constant dense<0.000000e+00> : vector<8x128xf32>
    %93 = tpu.matmul %92, %28, %cst_36 {dimension_numbers = #tpu.dot_dimension_numbers<[1], [0], [0], [1], [0, 0, 1, 1], [], []>} : vector<8x32xf32>, vector<32x128xf32>, vector<8x128xf32> -> vector<8x128xf32>
    %94 = vector.broadcast %30 : vector<1x128xf32> to vector<8x128xf32>
    %95 = arith.addf %93, %94 : vector<8x128xf32>
    %cst_37 = arith.constant 5.000000e-01 : f32
    %96 = vector.broadcast %cst_37 : f32 to vector<8x128xf32>
    %97 = arith.mulf %96, %95 : vector<8x128xf32>
    %cst_38 = arith.constant 0.707106769 : f32
    %98 = vector.broadcast %cst_38 : f32 to vector<8x128xf32>
    %99 = arith.mulf %95, %98 : vector<8x128xf32>
    %100 = math.absf %99 : vector<8x128xf32>
    %cst_39 = arith.constant 0.327591091 : f32
    %101 = vector.broadcast %cst_39 : f32 to vector<8x128xf32>
    %102 = arith.mulf %101, %100 : vector<8x128xf32>
    %cst_40 = arith.constant 1.000000e+00 : f32
    %103 = vector.broadcast %cst_40 : f32 to vector<8x128xf32>
    %104 = arith.addf %103, %102 : vector<8x128xf32>
    %cst_41 = arith.constant 1.000000e+00 : f32
    %105 = vector.broadcast %cst_41 : f32 to vector<8x128xf32>
    %106 = arith.divf %105, %104 : vector<8x128xf32>
    %cst_42 = arith.constant 1.06140542 : f32
    %107 = vector.broadcast %cst_42 : f32 to vector<8x128xf32>
    %108 = arith.mulf %107, %106 : vector<8x128xf32>
    %cst_43 = arith.constant -1.45315206 : f32
    %109 = vector.broadcast %cst_43 : f32 to vector<8x128xf32>
    %110 = arith.addf %108, %109 : vector<8x128xf32>
    %111 = arith.mulf %110, %106 : vector<8x128xf32>
    %cst_44 = arith.constant 1.42141378 : f32
    %112 = vector.broadcast %cst_44 : f32 to vector<8x128xf32>
    %113 = arith.addf %111, %112 : vector<8x128xf32>
    %114 = arith.mulf %113, %106 : vector<8x128xf32>
    %cst_45 = arith.constant -0.284496725 : f32
    %115 = vector.broadcast %cst_45 : f32 to vector<8x128xf32>
    %116 = arith.addf %114, %115 : vector<8x128xf32>
    %117 = arith.mulf %116, %106 : vector<8x128xf32>
    %cst_46 = arith.constant 0.254829586 : f32
    %118 = vector.broadcast %cst_46 : f32 to vector<8x128xf32>
    %119 = arith.addf %117, %118 : vector<8x128xf32>
    %120 = arith.mulf %119, %106 : vector<8x128xf32>
    %cst_47 = arith.constant 0.000000e+00 : f32
    %121 = vector.broadcast %cst_47 : f32 to vector<8x128xf32>
    %122 = arith.subf %121, %100 : vector<8x128xf32>
    %123 = arith.mulf %122, %100 : vector<8x128xf32>
    %124 = math.exp %123 : vector<8x128xf32>
    %125 = arith.mulf %120, %124 : vector<8x128xf32>
    %cst_48 = arith.constant 1.000000e+00 : f32
    %126 = vector.broadcast %cst_48 : f32 to vector<8x128xf32>
    %127 = arith.subf %126, %125 : vector<8x128xf32>
    %cst_49 = arith.constant 0.000000e+00 : f32
    %128 = vector.broadcast %cst_49 : f32 to vector<8x128xf32>
    %129 = arith.cmpf oge, %99, %128 : vector<8x128xf32>
    %cst_50 = arith.constant 0.000000e+00 : f32
    %130 = vector.broadcast %cst_50 : f32 to vector<8x128xf32>
    %131 = arith.subf %130, %127 : vector<8x128xf32>
    %132 = arith.select %129, %127, %131 : vector<8x128xi1>, vector<8x128xf32>
    %cst_51 = arith.constant 1.000000e+00 : f32
    %133 = vector.broadcast %cst_51 : f32 to vector<8x128xf32>
    %134 = arith.addf %133, %132 : vector<8x128xf32>
    %135 = arith.mulf %97, %134 : vector<8x128xf32>
    %cst_52 = arith.constant dense<0.000000e+00> : vector<8x32xf32>
    %136 = tpu.matmul %135, %32, %cst_52 {dimension_numbers = #tpu.dot_dimension_numbers<[1], [0], [0], [1], [0, 0, 1, 1], [], []>} : vector<8x128xf32>, vector<128x32xf32>, vector<8x32xf32> -> vector<8x32xf32>
    %137 = vector.broadcast %25 : vector<1x32xf32> to vector<8x32xf32>
    %138 = arith.addf %136, %137 : vector<8x32xf32>
    %139 = vector.broadcast %26 : vector<1x32xf32> to vector<8x32xf32>
    %140 = arith.mulf %138, %139 : vector<8x32xf32>
    %141 = arith.addf %17, %140 : vector<8x32xf32>
    %c1_53 = arith.constant 1 : index
    %c0_54 = arith.constant 0 : index
    %c0_55 = arith.constant 0 : index
    %142 = vector.load %arg2[%c1_53, %c0_54, %c0_55] : memref<2x32x64xf32, #tpu.memory_space<vmem>>, vector<1x32x64xf32>
    %143 = vector.shape_cast %142 : vector<1x32x64xf32> to vector<32x64xf32>
    %cst_56 = arith.constant dense<0.000000e+00> : vector<8x64xf32>
    %144 = tpu.matmul %141, %143, %cst_56 {dimension_numbers = #tpu.dot_dimension_numbers<[1], [0], [0], [1], [0, 0, 1, 1], [], []>} : vector<8x32xf32>, vector<32x64xf32>, vector<8x64xf32> -> vector<8x64xf32>
    %c0_57 = arith.constant 0 : index
    %c0_58 = arith.constant 0 : index
    %c0_59 = arith.constant 0 : index
    %145 = vector.load %arg18[%c0_57, %c0_58, %c0_59] : memref<2x4x8xf32, #tpu.memory_space<vmem>>, vector<1x4x8xf32>
    %146 = vector.shape_cast %145 : vector<1x4x8xf32> to vector<4x8xf32>
    %147 = vector.extract_strided_slice %144 {offsets = [0, 0], sizes = [8, 32], strides = [1, 1]} : vector<8x64xf32> to vector<8x32xf32>
    %cst_60 = arith.constant dense<0.000000e+00> : vector<4x32xf32>
    %148 = tpu.matmul %146, %147, %cst_60 {dimension_numbers = #tpu.dot_dimension_numbers<[1], [0], [0], [1], [0, 0, 1, 1], [], []>} : vector<4x8xf32>, vector<8x32xf32>, vector<4x32xf32> -> vector<4x32xf32>
    %c1_61 = arith.constant 1 : index
    %c0_62 = arith.constant 0 : index
    %c0_63 = arith.constant 0 : index
    %149 = vector.load %arg18[%c1_61, %c0_62, %c0_63] : memref<2x4x8xf32, #tpu.memory_space<vmem>>, vector<1x4x8xf32>
    %150 = vector.shape_cast %149 : vector<1x4x8xf32> to vector<4x8xf32>
    %151 = vector.extract_strided_slice %144 {offsets = [0, 32], sizes = [8, 32], strides = [1, 1]} : vector<8x64xf32> to vector<8x32xf32>
    %cst_64 = arith.constant dense<0.000000e+00> : vector<4x32xf32>
    %152 = tpu.matmul %150, %151, %cst_64 {dimension_numbers = #tpu.dot_dimension_numbers<[1], [0], [0], [1], [0, 0, 1, 1], [], []>} : vector<4x8xf32>, vector<8x32xf32>, vector<4x32xf32> -> vector<4x32xf32>
    %153 = arith.addf %148, %152 : vector<4x32xf32>
    %c1_65 = arith.constant 1 : index
    %c0_66 = arith.constant 0 : index
    %c0_67 = arith.constant 0 : index
    %154 = vector.load %arg3[%c1_65, %c0_66, %c0_67] : memref<2x1x32xf32, #tpu.memory_space<vmem>>, vector<1x1x32xf32>
    %155 = vector.shape_cast %154 : vector<1x1x32xf32> to vector<1x32xf32>
    %156 = vector.broadcast %155 : vector<1x32xf32> to vector<4x32xf32>
    %157 = arith.addf %153, %156 : vector<4x32xf32>
    %c1_68 = arith.constant 1 : index
    %c0_69 = arith.constant 0 : index
    %c0_70 = arith.constant 0 : index
    %158 = vector.load %arg6[%c1_68, %c0_69, %c0_70] : memref<4x7x32xf32, #tpu.memory_space<vmem>>, vector<1x7x32xf32>
    %159 = vector.shape_cast %158 : vector<1x7x32xf32> to vector<7x32xf32>
    %c1_71 = arith.constant 1 : index
    %c0_72 = arith.constant 0 : index
    %c0_73 = arith.constant 0 : index
    %160 = vector.load %arg7[%c1_71, %c0_72, %c0_73] : memref<4x5x32xf32, #tpu.memory_space<vmem>>, vector<1x5x32xf32>
    %161 = vector.shape_cast %160 : vector<1x5x32xf32> to vector<5x32xf32>
    %162 = vector.extract_strided_slice %161 {offsets = [0, 0], sizes = [1, 32], strides = [1, 1]} : vector<5x32xf32> to vector<1x32xf32>
    %163 = vector.extract_strided_slice %161 {offsets = [1, 0], sizes = [1, 32], strides = [1, 1]} : vector<5x32xf32> to vector<1x32xf32>
    %164 = vector.extract_strided_slice %161 {offsets = [2, 0], sizes = [1, 32], strides = [1, 1]} : vector<5x32xf32> to vector<1x32xf32>
    %165 = vector.extract_strided_slice %161 {offsets = [3, 0], sizes = [1, 32], strides = [1, 1]} : vector<5x32xf32> to vector<1x32xf32>
    %166 = vector.extract_strided_slice %161 {offsets = [4, 0], sizes = [1, 32], strides = [1, 1]} : vector<5x32xf32> to vector<1x32xf32>
    %c1_74 = arith.constant 1 : index
    %c0_75 = arith.constant 0 : index
    %c0_76 = arith.constant 0 : index
    %167 = vector.load %arg8[%c1_74, %c0_75, %c0_76] : memref<4x32x128xf32, #tpu.memory_space<vmem>>, vector<1x32x128xf32>
    %168 = vector.shape_cast %167 : vector<1x32x128xf32> to vector<32x128xf32>
    %c1_77 = arith.constant 1 : index
    %c0_78 = arith.constant 0 : index
    %c0_79 = arith.constant 0 : index
    %169 = vector.load %arg9[%c1_77, %c0_78, %c0_79] : memref<4x1x128xf32, #tpu.memory_space<vmem>>, vector<1x1x128xf32>
    %170 = vector.shape_cast %169 : vector<1x1x128xf32> to vector<1x128xf32>
    %c1_80 = arith.constant 1 : index
    %c0_81 = arith.constant 0 : index
    %c0_82 = arith.constant 0 : index
    %171 = vector.load %arg10[%c1_80, %c0_81, %c0_82] : memref<4x128x32xf32, #tpu.memory_space<vmem>>, vector<1x128x32xf32>
    %172 = vector.shape_cast %171 : vector<1x128x32xf32> to vector<128x32xf32>
    %cst_83 = arith.constant 0.000000e+00 : f32
    %173 = vector.broadcast %cst_83 : f32 to vector<3x32xf32>
    %174 = tpu.concatenate %173, %157, %173 in 0 : vector<3x32xf32>, vector<4x32xf32>, vector<3x32xf32> -> vector<10x32xf32>
    %175 = vector.extract_strided_slice %174 {offsets = [0, 0], sizes = [4, 32], strides = [1, 1]} : vector<10x32xf32> to vector<4x32xf32>
    %176 = vector.extract_strided_slice %159 {offsets = [0, 0], sizes = [1, 32], strides = [1, 1]} : vector<7x32xf32> to vector<1x32xf32>
    %177 = vector.broadcast %176 : vector<1x32xf32> to vector<4x32xf32>
    %178 = arith.mulf %175, %177 : vector<4x32xf32>
    %179 = vector.extract_strided_slice %174 {offsets = [1, 0], sizes = [4, 32], strides = [1, 1]} : vector<10x32xf32> to vector<4x32xf32>
    %180 = vector.extract_strided_slice %159 {offsets = [1, 0], sizes = [1, 32], strides = [1, 1]} : vector<7x32xf32> to vector<1x32xf32>
    %181 = vector.broadcast %180 : vector<1x32xf32> to vector<4x32xf32>
    %182 = arith.mulf %179, %181 : vector<4x32xf32>
    %183 = arith.addf %178, %182 : vector<4x32xf32>
    %184 = vector.extract_strided_slice %174 {offsets = [2, 0], sizes = [4, 32], strides = [1, 1]} : vector<10x32xf32> to vector<4x32xf32>
    %185 = vector.extract_strided_slice %159 {offsets = [2, 0], sizes = [1, 32], strides = [1, 1]} : vector<7x32xf32> to vector<1x32xf32>
    %186 = vector.broadcast %185 : vector<1x32xf32> to vector<4x32xf32>
    %187 = arith.mulf %184, %186 : vector<4x32xf32>
    %188 = arith.addf %183, %187 : vector<4x32xf32>
    %189 = vector.extract_strided_slice %174 {offsets = [3, 0], sizes = [4, 32], strides = [1, 1]} : vector<10x32xf32> to vector<4x32xf32>
    %190 = vector.extract_strided_slice %159 {offsets = [3, 0], sizes = [1, 32], strides = [1, 1]} : vector<7x32xf32> to vector<1x32xf32>
    %191 = vector.broadcast %190 : vector<1x32xf32> to vector<4x32xf32>
    %192 = arith.mulf %189, %191 : vector<4x32xf32>
    %193 = arith.addf %188, %192 : vector<4x32xf32>
    %194 = vector.extract_strided_slice %174 {offsets = [4, 0], sizes = [4, 32], strides = [1, 1]} : vector<10x32xf32> to vector<4x32xf32>
    %195 = vector.extract_strided_slice %159 {offsets = [4, 0], sizes = [1, 32], strides = [1, 1]} : vector<7x32xf32> to vector<1x32xf32>
    %196 = vector.broadcast %195 : vector<1x32xf32> to vector<4x32xf32>
    %197 = arith.mulf %194, %196 : vector<4x32xf32>
    %198 = arith.addf %193, %197 : vector<4x32xf32>
    %199 = vector.extract_strided_slice %174 {offsets = [5, 0], sizes = [4, 32], strides = [1, 1]} : vector<10x32xf32> to vector<4x32xf32>
    %200 = vector.extract_strided_slice %159 {offsets = [5, 0], sizes = [1, 32], strides = [1, 1]} : vector<7x32xf32> to vector<1x32xf32>
    %201 = vector.broadcast %200 : vector<1x32xf32> to vector<4x32xf32>
    %202 = arith.mulf %199, %201 : vector<4x32xf32>
    %203 = arith.addf %198, %202 : vector<4x32xf32>
    %204 = vector.extract_strided_slice %174 {offsets = [6, 0], sizes = [4, 32], strides = [1, 1]} : vector<10x32xf32> to vector<4x32xf32>
    %205 = vector.extract_strided_slice %159 {offsets = [6, 0], sizes = [1, 32], strides = [1, 1]} : vector<7x32xf32> to vector<1x32xf32>
    %206 = vector.broadcast %205 : vector<1x32xf32> to vector<4x32xf32>
    %207 = arith.mulf %204, %206 : vector<4x32xf32>
    %208 = arith.addf %203, %207 : vector<4x32xf32>
    %209 = vector.broadcast %162 : vector<1x32xf32> to vector<4x32xf32>
    %210 = arith.addf %208, %209 : vector<4x32xf32>
    %cst_84 = arith.constant dense<0.000000e+00> : vector<4xf32>
    %211 = vector.multi_reduction <add>, %210, %cst_84 [1] : vector<4x32xf32> to vector<4xf32>
    %212 = vector.shape_cast %211 : vector<4xf32> to vector<4x1xf32>
    %cst_85 = arith.constant 3.200000e+01 : f32
    %213 = vector.broadcast %cst_85 : f32 to vector<4x1xf32>
    %214 = arith.divf %212, %213 : vector<4x1xf32>
    %215 = vector.broadcast %214 : vector<4x1xf32> to vector<4x32xf32>
    %216 = arith.subf %210, %215 : vector<4x32xf32>
    %217 = arith.mulf %216, %216 : vector<4x32xf32>
    %cst_86 = arith.constant dense<0.000000e+00> : vector<4xf32>
    %218 = vector.multi_reduction <add>, %217, %cst_86 [1] : vector<4x32xf32> to vector<4xf32>
    %219 = vector.shape_cast %218 : vector<4xf32> to vector<4x1xf32>
    %cst_87 = arith.constant 3.200000e+01 : f32
    %220 = vector.broadcast %cst_87 : f32 to vector<4x1xf32>
    %221 = arith.divf %219, %220 : vector<4x1xf32>
    %222 = vector.broadcast %214 : vector<4x1xf32> to vector<4x32xf32>
    %223 = arith.subf %210, %222 : vector<4x32xf32>
    %cst_88 = arith.constant 9.99999997E-7 : f32
    %224 = vector.broadcast %cst_88 : f32 to vector<4x1xf32>
    %225 = arith.addf %221, %224 : vector<4x1xf32>
    %226 = math.rsqrt %225 : vector<4x1xf32>
    %227 = vector.broadcast %226 : vector<4x1xf32> to vector<4x32xf32>
    %228 = arith.mulf %223, %227 : vector<4x32xf32>
    %229 = vector.broadcast %163 : vector<1x32xf32> to vector<4x32xf32>
    %230 = arith.mulf %228, %229 : vector<4x32xf32>
    %231 = vector.broadcast %164 : vector<1x32xf32> to vector<4x32xf32>
    %232 = arith.addf %230, %231 : vector<4x32xf32>
    %cst_89 = arith.constant dense<0.000000e+00> : vector<4x128xf32>
    %233 = tpu.matmul %232, %168, %cst_89 {dimension_numbers = #tpu.dot_dimension_numbers<[1], [0], [0], [1], [0, 0, 1, 1], [], []>} : vector<4x32xf32>, vector<32x128xf32>, vector<4x128xf32> -> vector<4x128xf32>
    %234 = vector.broadcast %170 : vector<1x128xf32> to vector<4x128xf32>
    %235 = arith.addf %233, %234 : vector<4x128xf32>
    %cst_90 = arith.constant 5.000000e-01 : f32
    %236 = vector.broadcast %cst_90 : f32 to vector<4x128xf32>
    %237 = arith.mulf %236, %235 : vector<4x128xf32>
    %cst_91 = arith.constant 0.707106769 : f32
    %238 = vector.broadcast %cst_91 : f32 to vector<4x128xf32>
    %239 = arith.mulf %235, %238 : vector<4x128xf32>
    %240 = math.absf %239 : vector<4x128xf32>
    %cst_92 = arith.constant 0.327591091 : f32
    %241 = vector.broadcast %cst_92 : f32 to vector<4x128xf32>
    %242 = arith.mulf %241, %240 : vector<4x128xf32>
    %cst_93 = arith.constant 1.000000e+00 : f32
    %243 = vector.broadcast %cst_93 : f32 to vector<4x128xf32>
    %244 = arith.addf %243, %242 : vector<4x128xf32>
    %cst_94 = arith.constant 1.000000e+00 : f32
    %245 = vector.broadcast %cst_94 : f32 to vector<4x128xf32>
    %246 = arith.divf %245, %244 : vector<4x128xf32>
    %cst_95 = arith.constant 1.06140542 : f32
    %247 = vector.broadcast %cst_95 : f32 to vector<4x128xf32>
    %248 = arith.mulf %247, %246 : vector<4x128xf32>
    %cst_96 = arith.constant -1.45315206 : f32
    %249 = vector.broadcast %cst_96 : f32 to vector<4x128xf32>
    %250 = arith.addf %248, %249 : vector<4x128xf32>
    %251 = arith.mulf %250, %246 : vector<4x128xf32>
    %cst_97 = arith.constant 1.42141378 : f32
    %252 = vector.broadcast %cst_97 : f32 to vector<4x128xf32>
    %253 = arith.addf %251, %252 : vector<4x128xf32>
    %254 = arith.mulf %253, %246 : vector<4x128xf32>
    %cst_98 = arith.constant -0.284496725 : f32
    %255 = vector.broadcast %cst_98 : f32 to vector<4x128xf32>
    %256 = arith.addf %254, %255 : vector<4x128xf32>
    %257 = arith.mulf %256, %246 : vector<4x128xf32>
    %cst_99 = arith.constant 0.254829586 : f32
    %258 = vector.broadcast %cst_99 : f32 to vector<4x128xf32>
    %259 = arith.addf %257, %258 : vector<4x128xf32>
    %260 = arith.mulf %259, %246 : vector<4x128xf32>
    %cst_100 = arith.constant 0.000000e+00 : f32
    %261 = vector.broadcast %cst_100 : f32 to vector<4x128xf32>
    %262 = arith.subf %261, %240 : vector<4x128xf32>
    %263 = arith.mulf %262, %240 : vector<4x128xf32>
    %264 = math.exp %263 : vector<4x128xf32>
    %265 = arith.mulf %260, %264 : vector<4x128xf32>
    %cst_101 = arith.constant 1.000000e+00 : f32
    %266 = vector.broadcast %cst_101 : f32 to vector<4x128xf32>
    %267 = arith.subf %266, %265 : vector<4x128xf32>
    %cst_102 = arith.constant 0.000000e+00 : f32
    %268 = vector.broadcast %cst_102 : f32 to vector<4x128xf32>
    %269 = arith.cmpf oge, %239, %268 : vector<4x128xf32>
    %cst_103 = arith.constant 0.000000e+00 : f32
    %270 = vector.broadcast %cst_103 : f32 to vector<4x128xf32>
    %271 = arith.subf %270, %267 : vector<4x128xf32>
    %272 = arith.select %269, %267, %271 : vector<4x128xi1>, vector<4x128xf32>
    %cst_104 = arith.constant 1.000000e+00 : f32
    %273 = vector.broadcast %cst_104 : f32 to vector<4x128xf32>
    %274 = arith.addf %273, %272 : vector<4x128xf32>
    %275 = arith.mulf %237, %274 : vector<4x128xf32>
    %cst_105 = arith.constant dense<0.000000e+00> : vector<4x32xf32>
    %276 = tpu.matmul %275, %172, %cst_105 {dimension_numbers = #tpu.dot_dimension_numbers<[1], [0], [0], [1], [0, 0, 1, 1], [], []>} : vector<4x128xf32>, vector<128x32xf32>, vector<4x32xf32> -> vector<4x32xf32>
    %277 = vector.broadcast %165 : vector<1x32xf32> to vector<4x32xf32>
    %278 = arith.addf %276, %277 : vector<4x32xf32>
    %279 = vector.broadcast %166 : vector<1x32xf32> to vector<4x32xf32>
    %280 = arith.mulf %278, %279 : vector<4x32xf32>
    %281 = arith.addf %157, %280 : vector<4x32xf32>
    %c0_106 = arith.constant 0 : index
    %c0_107 = arith.constant 0 : index
    %c0_108 = arith.constant 0 : index
    %282 = vector.load %arg23[%c0_106, %c0_107, %c0_108] : memref<1x4x32xf32, #tpu.memory_space<vmem>>, vector<1x4x32xf32>
    %283 = vector.shape_cast %282 : vector<1x4x32xf32> to vector<4x32xf32>
    %284 = vector.shape_cast %281 : vector<4x32xf32> to vector<1x4x32xf32>
    tpu.vector_store %arg23[%c0_106, %c0_107, %c0_108], %284 {strides = array<i32>} : memref<1x4x32xf32, #tpu.memory_space<vmem>>, vector<1x4x32xf32>,
    %c0_109 = arith.constant 0 : index
    %c0_110 = arith.constant 0 : index
    %285 = vector.load %arg15[%c0_109, %c0_110] : memref<6x8xf32, #tpu.memory_space<vmem>>, vector<1x8xf32>
    %c1_111 = arith.constant 1 : index
    %c0_112 = arith.constant 0 : index
    %286 = vector.load %arg15[%c1_111, %c0_112] : memref<6x8xf32, #tpu.memory_space<vmem>>, vector<1x8xf32>
    %c2 = arith.constant 2 : index
    %c0_113 = arith.constant 0 : index
    %287 = vector.load %arg15[%c2, %c0_113] : memref<6x8xf32, #tpu.memory_space<vmem>>, vector<1x8xf32>
    %c3 = arith.constant 3 : index
    %c0_114 = arith.constant 0 : index
    %288 = vector.load %arg15[%c3, %c0_114] : memref<6x8xf32, #tpu.memory_space<vmem>>, vector<1x8xf32>
    %c0_115 = arith.constant 0 : index
    %c0_116 = arith.constant 0 : index
    %289 = vector.load %arg11[%c0_115, %c0_116] : memref<32x8xf32, #tpu.memory_space<vmem>>, vector<32x8xf32>
    %cst_117 = arith.constant dense<0.000000e+00> : vector<4x8xf32>
    %290 = tpu.matmul %281, %289, %cst_117 {dimension_numbers = #tpu.dot_dimension_numbers<[1], [0], [0], [1], [0, 0, 1, 1], [], []>} : vector<4x32xf32>, vector<32x8xf32>, vector<4x8xf32> -> vector<4x8xf32>
    %c0_118 = arith.constant 0 : index
    %c0_119 = arith.constant 0 : index
    %291 = vector.load %arg12[%c0_118, %c0_119] : memref<1x8xf32, #tpu.memory_space<vmem>>, vector<1x8xf32>
    %292 = vector.broadcast %291 : vector<1x8xf32> to vector<4x8xf32>
    %293 = arith.addf %290, %292 : vector<4x8xf32>
    %cst_120 = arith.constant 0.000000e+00 : f32
    %294 = vector.broadcast %cst_120 : f32 to vector<4x8xf32>
    %cst_121 = arith.constant 0.000000e+00 : f32
    %295 = vector.broadcast %cst_121 : f32 to vector<4x4xf32>
    %c4 = arith.constant 4 : index
    %c0_122 = arith.constant 0 : index
    %296 = vector.load %arg15[%c4, %c0_122] : memref<6x8xf32, #tpu.memory_space<vmem>>, vector<1x8xf32>
    %297 = vector.broadcast %296 : vector<1x8xf32> to vector<4x8xf32>
    %298 = arith.divf %293, %297 : vector<4x8xf32>
    %299 = vector.broadcast %287 : vector<1x8xf32> to vector<4x8xf32>
    %300 = arith.addf %298, %299 : vector<4x8xf32>
    %301 = math.tanh %300 : vector<4x8xf32>
    %302 = vector.broadcast %285 : vector<1x8xf32> to vector<4x8xf32>
    %303 = arith.mulf %301, %302 : vector<4x8xf32>
    %304 = vector.broadcast %286 : vector<1x8xf32> to vector<4x8xf32>
    %305 = arith.subf %303, %304 : vector<4x8xf32>
    %306 = math.roundeven %305 : vector<4x8xf32>
    %307 = vector.broadcast %288 : vector<1x8xf32> to vector<4x8xf32>
    %308 = arith.divf %306, %307 : vector<4x8xf32>
    %309 = vector.broadcast %288 : vector<1x8xf32> to vector<4x8xf32>
    %310 = arith.addf %306, %309 : vector<4x8xf32>
    %c0_123 = arith.constant 0 : index
    %c0_124 = arith.constant 0 : index
    %c0_125 = arith.constant 0 : index
    %311 = vector.load %arg16[%c0_123, %c0_124, %c0_125] : memref<2x8x4xf32, #tpu.memory_space<vmem>>, vector<1x8x4xf32>
    %312 = vector.shape_cast %311 : vector<1x8x4xf32> to vector<8x4xf32>
    %cst_126 = arith.constant dense<0.000000e+00> : vector<4x4xf32>
    %313 = tpu.matmul %310, %312, %cst_126 {dimension_numbers = #tpu.dot_dimension_numbers<[1], [0], [0], [1], [0, 0, 1, 1], [], []>} : vector<4x8xf32>, vector<8x4xf32>, vector<4x4xf32> -> vector<4x4xf32>
    %314 = arith.addf %295, %313 : vector<4x4xf32>
    %315 = vector.broadcast %296 : vector<1x8xf32> to vector<4x8xf32>
    %316 = arith.mulf %308, %315 : vector<4x8xf32>
    %317 = arith.subf %293, %316 : vector<4x8xf32>
    %318 = arith.addf %294, %316 : vector<4x8xf32>
    %c5 = arith.constant 5 : index
    %c0_127 = arith.constant 0 : index
    %319 = vector.load %arg15[%c5, %c0_127] : memref<6x8xf32, #tpu.memory_space<vmem>>, vector<1x8xf32>
    %320 = vector.broadcast %319 : vector<1x8xf32> to vector<4x8xf32>
    %321 = arith.divf %317, %320 : vector<4x8xf32>
    %322 = vector.broadcast %287 : vector<1x8xf32> to vector<4x8xf32>
    %323 = arith.addf %321, %322 : vector<4x8xf32>
    %324 = math.tanh %323 : vector<4x8xf32>
    %325 = vector.broadcast %285 : vector<1x8xf32> to vector<4x8xf32>
    %326 = arith.mulf %324, %325 : vector<4x8xf32>
    %327 = vector.broadcast %286 : vector<1x8xf32> to vector<4x8xf32>
    %328 = arith.subf %326, %327 : vector<4x8xf32>
    %329 = math.roundeven %328 : vector<4x8xf32>
    %330 = vector.broadcast %288 : vector<1x8xf32> to vector<4x8xf32>
    %331 = arith.divf %329, %330 : vector<4x8xf32>
    %332 = vector.broadcast %288 : vector<1x8xf32> to vector<4x8xf32>
    %333 = arith.addf %329, %332 : vector<4x8xf32>
    %c1_128 = arith.constant 1 : index
    %c0_129 = arith.constant 0 : index
    %c0_130 = arith.constant 0 : index
    %334 = vector.load %arg16[%c1_128, %c0_129, %c0_130] : memref<2x8x4xf32, #tpu.memory_space<vmem>>, vector<1x8x4xf32>
    %335 = vector.shape_cast %334 : vector<1x8x4xf32> to vector<8x4xf32>
    %cst_131 = arith.constant dense<0.000000e+00> : vector<4x4xf32>
    %336 = tpu.matmul %333, %335, %cst_131 {dimension_numbers = #tpu.dot_dimension_numbers<[1], [0], [0], [1], [0, 0, 1, 1], [], []>} : vector<4x8xf32>, vector<8x4xf32>, vector<4x4xf32> -> vector<4x4xf32>
    %337 = arith.addf %314, %336 : vector<4x4xf32>
    %338 = vector.broadcast %319 : vector<1x8xf32> to vector<4x8xf32>
    %339 = arith.mulf %331, %338 : vector<4x8xf32>
    %340 = arith.addf %318, %339 : vector<4x8xf32>
    %341 = math.roundeven %337 : vector<4x4xf32>
    %342 = arith.fptosi %341 : vector<4x4xf32> to vector<4x4xi32>
    %c0_132 = arith.constant 0 : index
    %c0_133 = arith.constant 0 : index
    %c0_134 = arith.constant 0 : index
    %343 = vector.load %arg22[%c0_132, %c0_133, %c0_134] : memref<1x4x4xi32, #tpu.memory_space<vmem>>, vector<1x4x4xi32>
    %344 = vector.shape_cast %343 : vector<1x4x4xi32> to vector<4x4xi32>
    %345 = vector.shape_cast %342 : vector<4x4xi32> to vector<1x4x4xi32>
    tpu.vector_store %arg22[%c0_132, %c0_133, %c0_134], %345 {strides = array<i32>} : memref<1x4x4xi32, #tpu.memory_space<vmem>>, vector<1x4x4xi32>,
    %c0_135 = arith.constant 0 : index
    %c0_136 = arith.constant 0 : index
    %346 = vector.load %arg13[%c0_135, %c0_136] : memref<8x32xf32, #tpu.memory_space<vmem>>, vector<8x32xf32>
    %cst_137 = arith.constant dense<0.000000e+00> : vector<4x32xf32>
    %347 = tpu.matmul %340, %346, %cst_137 {dimension_numbers = #tpu.dot_dimension_numbers<[1], [0], [0], [1], [0, 0, 1, 1], [], []>} : vector<4x8xf32>, vector<8x32xf32>, vector<4x32xf32> -> vector<4x32xf32>
    %c0_138 = arith.constant 0 : index
    %c0_139 = arith.constant 0 : index
    %348 = vector.load %arg14[%c0_138, %c0_139] : memref<1x32xf32, #tpu.memory_space<vmem>>, vector<1x32xf32>
    %349 = vector.broadcast %348 : vector<1x32xf32> to vector<4x32xf32>
    %350 = arith.addf %347, %349 : vector<4x32xf32>
    %c0_140 = arith.constant 0 : index
    %c0_141 = arith.constant 0 : index
    %c0_142 = arith.constant 0 : index
    %351 = vector.load %arg4[%c0_140, %c0_141, %c0_142] : memref<2x32x64xf32, #tpu.memory_space<vmem>>, vector<1x32x64xf32>
    %352 = vector.shape_cast %351 : vector<1x32x64xf32> to vector<32x64xf32>
    %cst_143 = arith.constant dense<0.000000e+00> : vector<4x64xf32>
    %353 = tpu.matmul %350, %352, %cst_143 {dimension_numbers = #tpu.dot_dimension_numbers<[1], [0], [0], [1], [0, 0, 1, 1], [], []>} : vector<4x32xf32>, vector<32x64xf32>, vector<4x64xf32> -> vector<4x64xf32>
    %c0_144 = arith.constant 0 : index
    %c0_145 = arith.constant 0 : index
    %c0_146 = arith.constant 0 : index
    %354 = vector.load %arg19[%c0_144, %c0_145, %c0_146] : memref<2x8x4xf32, #tpu.memory_space<vmem>>, vector<1x8x4xf32>
    %355 = vector.shape_cast %354 : vector<1x8x4xf32> to vector<8x4xf32>
    %356 = vector.extract_strided_slice %353 {offsets = [0, 0], sizes = [4, 32], strides = [1, 1]} : vector<4x64xf32> to vector<4x32xf32>
    %cst_147 = arith.constant dense<0.000000e+00> : vector<8x32xf32>
    %357 = tpu.matmul %355, %356, %cst_147 {dimension_numbers = #tpu.dot_dimension_numbers<[1], [0], [0], [1], [0, 0, 1, 1], [], []>} : vector<8x4xf32>, vector<4x32xf32>, vector<8x32xf32> -> vector<8x32xf32>
    %c1_148 = arith.constant 1 : index
    %c0_149 = arith.constant 0 : index
    %c0_150 = arith.constant 0 : index
    %358 = vector.load %arg19[%c1_148, %c0_149, %c0_150] : memref<2x8x4xf32, #tpu.memory_space<vmem>>, vector<1x8x4xf32>
    %359 = vector.shape_cast %358 : vector<1x8x4xf32> to vector<8x4xf32>
    %360 = vector.extract_strided_slice %353 {offsets = [0, 32], sizes = [4, 32], strides = [1, 1]} : vector<4x64xf32> to vector<4x32xf32>
    %cst_151 = arith.constant dense<0.000000e+00> : vector<8x32xf32>
    %361 = tpu.matmul %359, %360, %cst_151 {dimension_numbers = #tpu.dot_dimension_numbers<[1], [0], [0], [1], [0, 0, 1, 1], [], []>} : vector<8x4xf32>, vector<4x32xf32>, vector<8x32xf32> -> vector<8x32xf32>
    %362 = arith.addf %357, %361 : vector<8x32xf32>
    %c0_152 = arith.constant 0 : index
    %c0_153 = arith.constant 0 : index
    %c0_154 = arith.constant 0 : index
    %363 = vector.load %arg5[%c0_152, %c0_153, %c0_154] : memref<2x1x32xf32, #tpu.memory_space<vmem>>, vector<1x1x32xf32>
    %364 = vector.shape_cast %363 : vector<1x1x32xf32> to vector<1x32xf32>
    %365 = vector.broadcast %364 : vector<1x32xf32> to vector<8x32xf32>
    %366 = arith.addf %362, %365 : vector<8x32xf32>
    %c2_155 = arith.constant 2 : index
    %c0_156 = arith.constant 0 : index
    %c0_157 = arith.constant 0 : index
    %367 = vector.load %arg6[%c2_155, %c0_156, %c0_157] : memref<4x7x32xf32, #tpu.memory_space<vmem>>, vector<1x7x32xf32>
    %368 = vector.shape_cast %367 : vector<1x7x32xf32> to vector<7x32xf32>
    %c2_158 = arith.constant 2 : index
    %c0_159 = arith.constant 0 : index
    %c0_160 = arith.constant 0 : index
    %369 = vector.load %arg7[%c2_158, %c0_159, %c0_160] : memref<4x5x32xf32, #tpu.memory_space<vmem>>, vector<1x5x32xf32>
    %370 = vector.shape_cast %369 : vector<1x5x32xf32> to vector<5x32xf32>
    %371 = vector.extract_strided_slice %370 {offsets = [0, 0], sizes = [1, 32], strides = [1, 1]} : vector<5x32xf32> to vector<1x32xf32>
    %372 = vector.extract_strided_slice %370 {offsets = [1, 0], sizes = [1, 32], strides = [1, 1]} : vector<5x32xf32> to vector<1x32xf32>
    %373 = vector.extract_strided_slice %370 {offsets = [2, 0], sizes = [1, 32], strides = [1, 1]} : vector<5x32xf32> to vector<1x32xf32>
    %374 = vector.extract_strided_slice %370 {offsets = [3, 0], sizes = [1, 32], strides = [1, 1]} : vector<5x32xf32> to vector<1x32xf32>
    %375 = vector.extract_strided_slice %370 {offsets = [4, 0], sizes = [1, 32], strides = [1, 1]} : vector<5x32xf32> to vector<1x32xf32>
    %c2_161 = arith.constant 2 : index
    %c0_162 = arith.constant 0 : index
    %c0_163 = arith.constant 0 : index
    %376 = vector.load %arg8[%c2_161, %c0_162, %c0_163] : memref<4x32x128xf32, #tpu.memory_space<vmem>>, vector<1x32x128xf32>
    %377 = vector.shape_cast %376 : vector<1x32x128xf32> to vector<32x128xf32>
    %c2_164 = arith.constant 2 : index
    %c0_165 = arith.constant 0 : index
    %c0_166 = arith.constant 0 : index
    %378 = vector.load %arg9[%c2_164, %c0_165, %c0_166] : memref<4x1x128xf32, #tpu.memory_space<vmem>>, vector<1x1x128xf32>
    %379 = vector.shape_cast %378 : vector<1x1x128xf32> to vector<1x128xf32>
    %c2_167 = arith.constant 2 : index
    %c0_168 = arith.constant 0 : index
    %c0_169 = arith.constant 0 : index
    %380 = vector.load %arg10[%c2_167, %c0_168, %c0_169] : memref<4x128x32xf32, #tpu.memory_space<vmem>>, vector<1x128x32xf32>
    %381 = vector.shape_cast %380 : vector<1x128x32xf32> to vector<128x32xf32>
    %cst_170 = arith.constant 0.000000e+00 : f32
    %382 = vector.broadcast %cst_170 : f32 to vector<3x32xf32>
    %383 = tpu.concatenate %382, %366, %382 in 0 : vector<3x32xf32>, vector<8x32xf32>, vector<3x32xf32> -> vector<14x32xf32>
    %384 = vector.extract_strided_slice %383 {offsets = [0, 0], sizes = [8, 32], strides = [1, 1]} : vector<14x32xf32> to vector<8x32xf32>
    %385 = vector.extract_strided_slice %368 {offsets = [0, 0], sizes = [1, 32], strides = [1, 1]} : vector<7x32xf32> to vector<1x32xf32>
    %386 = vector.broadcast %385 : vector<1x32xf32> to vector<8x32xf32>
    %387 = arith.mulf %384, %386 : vector<8x32xf32>
    %388 = vector.extract_strided_slice %383 {offsets = [1, 0], sizes = [8, 32], strides = [1, 1]} : vector<14x32xf32> to vector<8x32xf32>
    %389 = vector.extract_strided_slice %368 {offsets = [1, 0], sizes = [1, 32], strides = [1, 1]} : vector<7x32xf32> to vector<1x32xf32>
    %390 = vector.broadcast %389 : vector<1x32xf32> to vector<8x32xf32>
    %391 = arith.mulf %388, %390 : vector<8x32xf32>
    %392 = arith.addf %387, %391 : vector<8x32xf32>
    %393 = vector.extract_strided_slice %383 {offsets = [2, 0], sizes = [8, 32], strides = [1, 1]} : vector<14x32xf32> to vector<8x32xf32>
    %394 = vector.extract_strided_slice %368 {offsets = [2, 0], sizes = [1, 32], strides = [1, 1]} : vector<7x32xf32> to vector<1x32xf32>
    %395 = vector.broadcast %394 : vector<1x32xf32> to vector<8x32xf32>
    %396 = arith.mulf %393, %395 : vector<8x32xf32>
    %397 = arith.addf %392, %396 : vector<8x32xf32>
    %398 = vector.extract_strided_slice %383 {offsets = [3, 0], sizes = [8, 32], strides = [1, 1]} : vector<14x32xf32> to vector<8x32xf32>
    %399 = vector.extract_strided_slice %368 {offsets = [3, 0], sizes = [1, 32], strides = [1, 1]} : vector<7x32xf32> to vector<1x32xf32>
    %400 = vector.broadcast %399 : vector<1x32xf32> to vector<8x32xf32>
    %401 = arith.mulf %398, %400 : vector<8x32xf32>
    %402 = arith.addf %397, %401 : vector<8x32xf32>
    %403 = vector.extract_strided_slice %383 {offsets = [4, 0], sizes = [8, 32], strides = [1, 1]} : vector<14x32xf32> to vector<8x32xf32>
    %404 = vector.extract_strided_slice %368 {offsets = [4, 0], sizes = [1, 32], strides = [1, 1]} : vector<7x32xf32> to vector<1x32xf32>
    %405 = vector.broadcast %404 : vector<1x32xf32> to vector<8x32xf32>
    %406 = arith.mulf %403, %405 : vector<8x32xf32>
    %407 = arith.addf %402, %406 : vector<8x32xf32>
    %408 = vector.extract_strided_slice %383 {offsets = [5, 0], sizes = [8, 32], strides = [1, 1]} : vector<14x32xf32> to vector<8x32xf32>
    %409 = vector.extract_strided_slice %368 {offsets = [5, 0], sizes = [1, 32], strides = [1, 1]} : vector<7x32xf32> to vector<1x32xf32>
    %410 = vector.broadcast %409 : vector<1x32xf32> to vector<8x32xf32>
    %411 = arith.mulf %408, %410 : vector<8x32xf32>
    %412 = arith.addf %407, %411 : vector<8x32xf32>
    %413 = vector.extract_strided_slice %383 {offsets = [6, 0], sizes = [8, 32], strides = [1, 1]} : vector<14x32xf32> to vector<8x32xf32>
    %414 = vector.extract_strided_slice %368 {offsets = [6, 0], sizes = [1, 32], strides = [1, 1]} : vector<7x32xf32> to vector<1x32xf32>
    %415 = vector.broadcast %414 : vector<1x32xf32> to vector<8x32xf32>
    %416 = arith.mulf %413, %415 : vector<8x32xf32>
    %417 = arith.addf %412, %416 : vector<8x32xf32>
    %418 = vector.broadcast %371 : vector<1x32xf32> to vector<8x32xf32>
    %419 = arith.addf %417, %418 : vector<8x32xf32>
    %cst_171 = arith.constant dense<0.000000e+00> : vector<8xf32>
    %420 = vector.multi_reduction <add>, %419, %cst_171 [1] : vector<8x32xf32> to vector<8xf32>
    %421 = vector.shape_cast %420 : vector<8xf32> to vector<8x1xf32>
    %cst_172 = arith.constant 3.200000e+01 : f32
    %422 = vector.broadcast %cst_172 : f32 to vector<8x1xf32>
    %423 = arith.divf %421, %422 : vector<8x1xf32>
    %424 = vector.broadcast %423 : vector<8x1xf32> to vector<8x32xf32>
    %425 = arith.subf %419, %424 : vector<8x32xf32>
    %426 = arith.mulf %425, %425 : vector<8x32xf32>
    %cst_173 = arith.constant dense<0.000000e+00> : vector<8xf32>
    %427 = vector.multi_reduction <add>, %426, %cst_173 [1] : vector<8x32xf32> to vector<8xf32>
    %428 = vector.shape_cast %427 : vector<8xf32> to vector<8x1xf32>
    %cst_174 = arith.constant 3.200000e+01 : f32
    %429 = vector.broadcast %cst_174 : f32 to vector<8x1xf32>
    %430 = arith.divf %428, %429 : vector<8x1xf32>
    %431 = vector.broadcast %423 : vector<8x1xf32> to vector<8x32xf32>
    %432 = arith.subf %419, %431 : vector<8x32xf32>
    %cst_175 = arith.constant 9.99999997E-7 : f32
    %433 = vector.broadcast %cst_175 : f32 to vector<8x1xf32>
    %434 = arith.addf %430, %433 : vector<8x1xf32>
    %435 = math.rsqrt %434 : vector<8x1xf32>
    %436 = vector.broadcast %435 : vector<8x1xf32> to vector<8x32xf32>
    %437 = arith.mulf %432, %436 : vector<8x32xf32>
    %438 = vector.broadcast %372 : vector<1x32xf32> to vector<8x32xf32>
    %439 = arith.mulf %437, %438 : vector<8x32xf32>
    %440 = vector.broadcast %373 : vector<1x32xf32> to vector<8x32xf32>
    %441 = arith.addf %439, %440 : vector<8x32xf32>
    %cst_176 = arith.constant dense<0.000000e+00> : vector<8x128xf32>
    %442 = tpu.matmul %441, %377, %cst_176 {dimension_numbers = #tpu.dot_dimension_numbers<[1], [0], [0], [1], [0, 0, 1, 1], [], []>} : vector<8x32xf32>, vector<32x128xf32>, vector<8x128xf32> -> vector<8x128xf32>
    %443 = vector.broadcast %379 : vector<1x128xf32> to vector<8x128xf32>
    %444 = arith.addf %442, %443 : vector<8x128xf32>
    %cst_177 = arith.constant 5.000000e-01 : f32
    %445 = vector.broadcast %cst_177 : f32 to vector<8x128xf32>
    %446 = arith.mulf %445, %444 : vector<8x128xf32>
    %cst_178 = arith.constant 0.707106769 : f32
    %447 = vector.broadcast %cst_178 : f32 to vector<8x128xf32>
    %448 = arith.mulf %444, %447 : vector<8x128xf32>
    %449 = math.absf %448 : vector<8x128xf32>
    %cst_179 = arith.constant 0.327591091 : f32
    %450 = vector.broadcast %cst_179 : f32 to vector<8x128xf32>
    %451 = arith.mulf %450, %449 : vector<8x128xf32>
    %cst_180 = arith.constant 1.000000e+00 : f32
    %452 = vector.broadcast %cst_180 : f32 to vector<8x128xf32>
    %453 = arith.addf %452, %451 : vector<8x128xf32>
    %cst_181 = arith.constant 1.000000e+00 : f32
    %454 = vector.broadcast %cst_181 : f32 to vector<8x128xf32>
    %455 = arith.divf %454, %453 : vector<8x128xf32>
    %cst_182 = arith.constant 1.06140542 : f32
    %456 = vector.broadcast %cst_182 : f32 to vector<8x128xf32>
    %457 = arith.mulf %456, %455 : vector<8x128xf32>
    %cst_183 = arith.constant -1.45315206 : f32
    %458 = vector.broadcast %cst_183 : f32 to vector<8x128xf32>
    %459 = arith.addf %457, %458 : vector<8x128xf32>
    %460 = arith.mulf %459, %455 : vector<8x128xf32>
    %cst_184 = arith.constant 1.42141378 : f32
    %461 = vector.broadcast %cst_184 : f32 to vector<8x128xf32>
    %462 = arith.addf %460, %461 : vector<8x128xf32>
    %463 = arith.mulf %462, %455 : vector<8x128xf32>
    %cst_185 = arith.constant -0.284496725 : f32
    %464 = vector.broadcast %cst_185 : f32 to vector<8x128xf32>
    %465 = arith.addf %463, %464 : vector<8x128xf32>
    %466 = arith.mulf %465, %455 : vector<8x128xf32>
    %cst_186 = arith.constant 0.254829586 : f32
    %467 = vector.broadcast %cst_186 : f32 to vector<8x128xf32>
    %468 = arith.addf %466, %467 : vector<8x128xf32>
    %469 = arith.mulf %468, %455 : vector<8x128xf32>
    %cst_187 = arith.constant 0.000000e+00 : f32
    %470 = vector.broadcast %cst_187 : f32 to vector<8x128xf32>
    %471 = arith.subf %470, %449 : vector<8x128xf32>
    %472 = arith.mulf %471, %449 : vector<8x128xf32>
    %473 = math.exp %472 : vector<8x128xf32>
    %474 = arith.mulf %469, %473 : vector<8x128xf32>
    %cst_188 = arith.constant 1.000000e+00 : f32
    %475 = vector.broadcast %cst_188 : f32 to vector<8x128xf32>
    %476 = arith.subf %475, %474 : vector<8x128xf32>
    %cst_189 = arith.constant 0.000000e+00 : f32
    %477 = vector.broadcast %cst_189 : f32 to vector<8x128xf32>
    %478 = arith.cmpf oge, %448, %477 : vector<8x128xf32>
    %cst_190 = arith.constant 0.000000e+00 : f32
    %479 = vector.broadcast %cst_190 : f32 to vector<8x128xf32>
    %480 = arith.subf %479, %476 : vector<8x128xf32>
    %481 = arith.select %478, %476, %480 : vector<8x128xi1>, vector<8x128xf32>
    %cst_191 = arith.constant 1.000000e+00 : f32
    %482 = vector.broadcast %cst_191 : f32 to vector<8x128xf32>
    %483 = arith.addf %482, %481 : vector<8x128xf32>
    %484 = arith.mulf %446, %483 : vector<8x128xf32>
    %cst_192 = arith.constant dense<0.000000e+00> : vector<8x32xf32>
    %485 = tpu.matmul %484, %381, %cst_192 {dimension_numbers = #tpu.dot_dimension_numbers<[1], [0], [0], [1], [0, 0, 1, 1], [], []>} : vector<8x128xf32>, vector<128x32xf32>, vector<8x32xf32> -> vector<8x32xf32>
    %486 = vector.broadcast %374 : vector<1x32xf32> to vector<8x32xf32>
    %487 = arith.addf %485, %486 : vector<8x32xf32>
    %488 = vector.broadcast %375 : vector<1x32xf32> to vector<8x32xf32>
    %489 = arith.mulf %487, %488 : vector<8x32xf32>
    %490 = arith.addf %366, %489 : vector<8x32xf32>
    %c1_193 = arith.constant 1 : index
    %c0_194 = arith.constant 0 : index
    %c0_195 = arith.constant 0 : index
    %491 = vector.load %arg4[%c1_193, %c0_194, %c0_195] : memref<2x32x64xf32, #tpu.memory_space<vmem>>, vector<1x32x64xf32>
    %492 = vector.shape_cast %491 : vector<1x32x64xf32> to vector<32x64xf32>
    %cst_196 = arith.constant dense<0.000000e+00> : vector<8x64xf32>
    %493 = tpu.matmul %490, %492, %cst_196 {dimension_numbers = #tpu.dot_dimension_numbers<[1], [0], [0], [1], [0, 0, 1, 1], [], []>} : vector<8x32xf32>, vector<32x64xf32>, vector<8x64xf32> -> vector<8x64xf32>
    %c0_197 = arith.constant 0 : index
    %c0_198 = arith.constant 0 : index
    %c0_199 = arith.constant 0 : index
    %494 = vector.load %arg20[%c0_197, %c0_198, %c0_199] : memref<2x16x8xf32, #tpu.memory_space<vmem>>, vector<1x16x8xf32>
    %495 = vector.shape_cast %494 : vector<1x16x8xf32> to vector<16x8xf32>
    %496 = vector.extract_strided_slice %493 {offsets = [0, 0], sizes = [8, 32], strides = [1, 1]} : vector<8x64xf32> to vector<8x32xf32>
    %cst_200 = arith.constant dense<0.000000e+00> : vector<16x32xf32>
    %497 = tpu.matmul %495, %496, %cst_200 {dimension_numbers = #tpu.dot_dimension_numbers<[1], [0], [0], [1], [0, 0, 1, 1], [], []>} : vector<16x8xf32>, vector<8x32xf32>, vector<16x32xf32> -> vector<16x32xf32>
    %c1_201 = arith.constant 1 : index
    %c0_202 = arith.constant 0 : index
    %c0_203 = arith.constant 0 : index
    %498 = vector.load %arg20[%c1_201, %c0_202, %c0_203] : memref<2x16x8xf32, #tpu.memory_space<vmem>>, vector<1x16x8xf32>
    %499 = vector.shape_cast %498 : vector<1x16x8xf32> to vector<16x8xf32>
    %500 = vector.extract_strided_slice %493 {offsets = [0, 32], sizes = [8, 32], strides = [1, 1]} : vector<8x64xf32> to vector<8x32xf32>
    %cst_204 = arith.constant dense<0.000000e+00> : vector<16x32xf32>
    %501 = tpu.matmul %499, %500, %cst_204 {dimension_numbers = #tpu.dot_dimension_numbers<[1], [0], [0], [1], [0, 0, 1, 1], [], []>} : vector<16x8xf32>, vector<8x32xf32>, vector<16x32xf32> -> vector<16x32xf32>
    %502 = arith.addf %497, %501 : vector<16x32xf32>
    %c1_205 = arith.constant 1 : index
    %c0_206 = arith.constant 0 : index
    %c0_207 = arith.constant 0 : index
    %503 = vector.load %arg5[%c1_205, %c0_206, %c0_207] : memref<2x1x32xf32, #tpu.memory_space<vmem>>, vector<1x1x32xf32>
    %504 = vector.shape_cast %503 : vector<1x1x32xf32> to vector<1x32xf32>
    %505 = vector.broadcast %504 : vector<1x32xf32> to vector<16x32xf32>
    %506 = arith.addf %502, %505 : vector<16x32xf32>
    %c3_208 = arith.constant 3 : index
    %c0_209 = arith.constant 0 : index
    %c0_210 = arith.constant 0 : index
    %507 = vector.load %arg6[%c3_208, %c0_209, %c0_210] : memref<4x7x32xf32, #tpu.memory_space<vmem>>, vector<1x7x32xf32>
    %508 = vector.shape_cast %507 : vector<1x7x32xf32> to vector<7x32xf32>
    %c3_211 = arith.constant 3 : index
    %c0_212 = arith.constant 0 : index
    %c0_213 = arith.constant 0 : index
    %509 = vector.load %arg7[%c3_211, %c0_212, %c0_213] : memref<4x5x32xf32, #tpu.memory_space<vmem>>, vector<1x5x32xf32>
    %510 = vector.shape_cast %509 : vector<1x5x32xf32> to vector<5x32xf32>
    %511 = vector.extract_strided_slice %510 {offsets = [0, 0], sizes = [1, 32], strides = [1, 1]} : vector<5x32xf32> to vector<1x32xf32>
    %512 = vector.extract_strided_slice %510 {offsets = [1, 0], sizes = [1, 32], strides = [1, 1]} : vector<5x32xf32> to vector<1x32xf32>
    %513 = vector.extract_strided_slice %510 {offsets = [2, 0], sizes = [1, 32], strides = [1, 1]} : vector<5x32xf32> to vector<1x32xf32>
    %514 = vector.extract_strided_slice %510 {offsets = [3, 0], sizes = [1, 32], strides = [1, 1]} : vector<5x32xf32> to vector<1x32xf32>
    %515 = vector.extract_strided_slice %510 {offsets = [4, 0], sizes = [1, 32], strides = [1, 1]} : vector<5x32xf32> to vector<1x32xf32>
    %c3_214 = arith.constant 3 : index
    %c0_215 = arith.constant 0 : index
    %c0_216 = arith.constant 0 : index
    %516 = vector.load %arg8[%c3_214, %c0_215, %c0_216] : memref<4x32x128xf32, #tpu.memory_space<vmem>>, vector<1x32x128xf32>
    %517 = vector.shape_cast %516 : vector<1x32x128xf32> to vector<32x128xf32>
    %c3_217 = arith.constant 3 : index
    %c0_218 = arith.constant 0 : index
    %c0_219 = arith.constant 0 : index
    %518 = vector.load %arg9[%c3_217, %c0_218, %c0_219] : memref<4x1x128xf32, #tpu.memory_space<vmem>>, vector<1x1x128xf32>
    %519 = vector.shape_cast %518 : vector<1x1x128xf32> to vector<1x128xf32>
    %c3_220 = arith.constant 3 : index
    %c0_221 = arith.constant 0 : index
    %c0_222 = arith.constant 0 : index
    %520 = vector.load %arg10[%c3_220, %c0_221, %c0_222] : memref<4x128x32xf32, #tpu.memory_space<vmem>>, vector<1x128x32xf32>
    %521 = vector.shape_cast %520 : vector<1x128x32xf32> to vector<128x32xf32>
    %cst_223 = arith.constant 0.000000e+00 : f32
    %522 = vector.broadcast %cst_223 : f32 to vector<3x32xf32>
    %523 = tpu.concatenate %522, %506, %522 in 0 : vector<3x32xf32>, vector<16x32xf32>, vector<3x32xf32> -> vector<22x32xf32>
    %524 = vector.extract_strided_slice %523 {offsets = [0, 0], sizes = [16, 32], strides = [1, 1]} : vector<22x32xf32> to vector<16x32xf32>
    %525 = vector.extract_strided_slice %508 {offsets = [0, 0], sizes = [1, 32], strides = [1, 1]} : vector<7x32xf32> to vector<1x32xf32>
    %526 = vector.broadcast %525 : vector<1x32xf32> to vector<16x32xf32>
    %527 = arith.mulf %524, %526 : vector<16x32xf32>
    %528 = vector.extract_strided_slice %523 {offsets = [1, 0], sizes = [16, 32], strides = [1, 1]} : vector<22x32xf32> to vector<16x32xf32>
    %529 = vector.extract_strided_slice %508 {offsets = [1, 0], sizes = [1, 32], strides = [1, 1]} : vector<7x32xf32> to vector<1x32xf32>
    %530 = vector.broadcast %529 : vector<1x32xf32> to vector<16x32xf32>
    %531 = arith.mulf %528, %530 : vector<16x32xf32>
    %532 = arith.addf %527, %531 : vector<16x32xf32>
    %533 = vector.extract_strided_slice %523 {offsets = [2, 0], sizes = [16, 32], strides = [1, 1]} : vector<22x32xf32> to vector<16x32xf32>
    %534 = vector.extract_strided_slice %508 {offsets = [2, 0], sizes = [1, 32], strides = [1, 1]} : vector<7x32xf32> to vector<1x32xf32>
    %535 = vector.broadcast %534 : vector<1x32xf32> to vector<16x32xf32>
    %536 = arith.mulf %533, %535 : vector<16x32xf32>
    %537 = arith.addf %532, %536 : vector<16x32xf32>
    %538 = vector.extract_strided_slice %523 {offsets = [3, 0], sizes = [16, 32], strides = [1, 1]} : vector<22x32xf32> to vector<16x32xf32>
    %539 = vector.extract_strided_slice %508 {offsets = [3, 0], sizes = [1, 32], strides = [1, 1]} : vector<7x32xf32> to vector<1x32xf32>
    %540 = vector.broadcast %539 : vector<1x32xf32> to vector<16x32xf32>
    %541 = arith.mulf %538, %540 : vector<16x32xf32>
    %542 = arith.addf %537, %541 : vector<16x32xf32>
    %543 = vector.extract_strided_slice %523 {offsets = [4, 0], sizes = [16, 32], strides = [1, 1]} : vector<22x32xf32> to vector<16x32xf32>
    %544 = vector.extract_strided_slice %508 {offsets = [4, 0], sizes = [1, 32], strides = [1, 1]} : vector<7x32xf32> to vector<1x32xf32>
    %545 = vector.broadcast %544 : vector<1x32xf32> to vector<16x32xf32>
    %546 = arith.mulf %543, %545 : vector<16x32xf32>
    %547 = arith.addf %542, %546 : vector<16x32xf32>
    %548 = vector.extract_strided_slice %523 {offsets = [5, 0], sizes = [16, 32], strides = [1, 1]} : vector<22x32xf32> to vector<16x32xf32>
    %549 = vector.extract_strided_slice %508 {offsets = [5, 0], sizes = [1, 32], strides = [1, 1]} : vector<7x32xf32> to vector<1x32xf32>
    %550 = vector.broadcast %549 : vector<1x32xf32> to vector<16x32xf32>
    %551 = arith.mulf %548, %550 : vector<16x32xf32>
    %552 = arith.addf %547, %551 : vector<16x32xf32>
    %553 = vector.extract_strided_slice %523 {offsets = [6, 0], sizes = [16, 32], strides = [1, 1]} : vector<22x32xf32> to vector<16x32xf32>
    %554 = vector.extract_strided_slice %508 {offsets = [6, 0], sizes = [1, 32], strides = [1, 1]} : vector<7x32xf32> to vector<1x32xf32>
    %555 = vector.broadcast %554 : vector<1x32xf32> to vector<16x32xf32>
    %556 = arith.mulf %553, %555 : vector<16x32xf32>
    %557 = arith.addf %552, %556 : vector<16x32xf32>
    %558 = vector.broadcast %511 : vector<1x32xf32> to vector<16x32xf32>
    %559 = arith.addf %557, %558 : vector<16x32xf32>
    %cst_224 = arith.constant dense<0.000000e+00> : vector<16xf32>
    %560 = vector.multi_reduction <add>, %559, %cst_224 [1] : vector<16x32xf32> to vector<16xf32>
    %561 = vector.shape_cast %560 : vector<16xf32> to vector<16x1xf32>
    %cst_225 = arith.constant 3.200000e+01 : f32
    %562 = vector.broadcast %cst_225 : f32 to vector<16x1xf32>
    %563 = arith.divf %561, %562 : vector<16x1xf32>
    %564 = vector.broadcast %563 : vector<16x1xf32> to vector<16x32xf32>
    %565 = arith.subf %559, %564 : vector<16x32xf32>
    %566 = arith.mulf %565, %565 : vector<16x32xf32>
    %cst_226 = arith.constant dense<0.000000e+00> : vector<16xf32>
    %567 = vector.multi_reduction <add>, %566, %cst_226 [1] : vector<16x32xf32> to vector<16xf32>
    %568 = vector.shape_cast %567 : vector<16xf32> to vector<16x1xf32>
    %cst_227 = arith.constant 3.200000e+01 : f32
    %569 = vector.broadcast %cst_227 : f32 to vector<16x1xf32>
    %570 = arith.divf %568, %569 : vector<16x1xf32>
    %571 = vector.broadcast %563 : vector<16x1xf32> to vector<16x32xf32>
    %572 = arith.subf %559, %571 : vector<16x32xf32>
    %cst_228 = arith.constant 9.99999997E-7 : f32
    %573 = vector.broadcast %cst_228 : f32 to vector<16x1xf32>
    %574 = arith.addf %570, %573 : vector<16x1xf32>
    %575 = math.rsqrt %574 : vector<16x1xf32>
    %576 = vector.broadcast %575 : vector<16x1xf32> to vector<16x32xf32>
    %577 = arith.mulf %572, %576 : vector<16x32xf32>
    %578 = vector.broadcast %512 : vector<1x32xf32> to vector<16x32xf32>
    %579 = arith.mulf %577, %578 : vector<16x32xf32>
    %580 = vector.broadcast %513 : vector<1x32xf32> to vector<16x32xf32>
    %581 = arith.addf %579, %580 : vector<16x32xf32>
    %cst_229 = arith.constant dense<0.000000e+00> : vector<16x128xf32>
    %582 = tpu.matmul %581, %517, %cst_229 {dimension_numbers = #tpu.dot_dimension_numbers<[1], [0], [0], [1], [0, 0, 1, 1], [], []>} : vector<16x32xf32>, vector<32x128xf32>, vector<16x128xf32> -> vector<16x128xf32>
    %583 = vector.broadcast %519 : vector<1x128xf32> to vector<16x128xf32>
    %584 = arith.addf %582, %583 : vector<16x128xf32>
    %cst_230 = arith.constant 5.000000e-01 : f32
    %585 = vector.broadcast %cst_230 : f32 to vector<16x128xf32>
    %586 = arith.mulf %585, %584 : vector<16x128xf32>
    %cst_231 = arith.constant 0.707106769 : f32
    %587 = vector.broadcast %cst_231 : f32 to vector<16x128xf32>
    %588 = arith.mulf %584, %587 : vector<16x128xf32>
    %589 = math.absf %588 : vector<16x128xf32>
    %cst_232 = arith.constant 0.327591091 : f32
    %590 = vector.broadcast %cst_232 : f32 to vector<16x128xf32>
    %591 = arith.mulf %590, %589 : vector<16x128xf32>
    %cst_233 = arith.constant 1.000000e+00 : f32
    %592 = vector.broadcast %cst_233 : f32 to vector<16x128xf32>
    %593 = arith.addf %592, %591 : vector<16x128xf32>
    %cst_234 = arith.constant 1.000000e+00 : f32
    %594 = vector.broadcast %cst_234 : f32 to vector<16x128xf32>
    %595 = arith.divf %594, %593 : vector<16x128xf32>
    %cst_235 = arith.constant 1.06140542 : f32
    %596 = vector.broadcast %cst_235 : f32 to vector<16x128xf32>
    %597 = arith.mulf %596, %595 : vector<16x128xf32>
    %cst_236 = arith.constant -1.45315206 : f32
    %598 = vector.broadcast %cst_236 : f32 to vector<16x128xf32>
    %599 = arith.addf %597, %598 : vector<16x128xf32>
    %600 = arith.mulf %599, %595 : vector<16x128xf32>
    %cst_237 = arith.constant 1.42141378 : f32
    %601 = vector.broadcast %cst_237 : f32 to vector<16x128xf32>
    %602 = arith.addf %600, %601 : vector<16x128xf32>
    %603 = arith.mulf %602, %595 : vector<16x128xf32>
    %cst_238 = arith.constant -0.284496725 : f32
    %604 = vector.broadcast %cst_238 : f32 to vector<16x128xf32>
    %605 = arith.addf %603, %604 : vector<16x128xf32>
    %606 = arith.mulf %605, %595 : vector<16x128xf32>
    %cst_239 = arith.constant 0.254829586 : f32
    %607 = vector.broadcast %cst_239 : f32 to vector<16x128xf32>
    %608 = arith.addf %606, %607 : vector<16x128xf32>
    %609 = arith.mulf %608, %595 : vector<16x128xf32>
    %cst_240 = arith.constant 0.000000e+00 : f32
    %610 = vector.broadcast %cst_240 : f32 to vector<16x128xf32>
    %611 = arith.subf %610, %589 : vector<16x128xf32>
    %612 = arith.mulf %611, %589 : vector<16x128xf32>
    %613 = math.exp %612 : vector<16x128xf32>
    %614 = arith.mulf %609, %613 : vector<16x128xf32>
    %cst_241 = arith.constant 1.000000e+00 : f32
    %615 = vector.broadcast %cst_241 : f32 to vector<16x128xf32>
    %616 = arith.subf %615, %614 : vector<16x128xf32>
    %cst_242 = arith.constant 0.000000e+00 : f32
    %617 = vector.broadcast %cst_242 : f32 to vector<16x128xf32>
    %618 = arith.cmpf oge, %588, %617 : vector<16x128xf32>
    %cst_243 = arith.constant 0.000000e+00 : f32
    %619 = vector.broadcast %cst_243 : f32 to vector<16x128xf32>
    %620 = arith.subf %619, %616 : vector<16x128xf32>
    %621 = arith.select %618, %616, %620 : vector<16x128xi1>, vector<16x128xf32>
    %cst_244 = arith.constant 1.000000e+00 : f32
    %622 = vector.broadcast %cst_244 : f32 to vector<16x128xf32>
    %623 = arith.addf %622, %621 : vector<16x128xf32>
    %624 = arith.mulf %586, %623 : vector<16x128xf32>
    %cst_245 = arith.constant dense<0.000000e+00> : vector<16x32xf32>
    %625 = tpu.matmul %624, %521, %cst_245 {dimension_numbers = #tpu.dot_dimension_numbers<[1], [0], [0], [1], [0, 0, 1, 1], [], []>} : vector<16x128xf32>, vector<128x32xf32>, vector<16x32xf32> -> vector<16x32xf32>
    %626 = vector.broadcast %514 : vector<1x32xf32> to vector<16x32xf32>
    %627 = arith.addf %625, %626 : vector<16x32xf32>
    %628 = vector.broadcast %515 : vector<1x32xf32> to vector<16x32xf32>
    %629 = arith.mulf %627, %628 : vector<16x32xf32>
    %630 = arith.addf %506, %629 : vector<16x32xf32>
    %c0_246 = arith.constant 0 : index
    %c0_247 = arith.constant 0 : index
    %c0_248 = arith.constant 0 : index
    %631 = vector.load %arg21[%c0_246, %c0_247, %c0_248] : memref<1x16x32xf32, #tpu.memory_space<vmem>>, vector<1x16x32xf32>
    %632 = vector.shape_cast %631 : vector<1x16x32xf32> to vector<16x32xf32>
    %633 = vector.shape_cast %630 : vector<16x32xf32> to vector<1x16x32xf32>
    tpu.vector_store %arg21[%c0_246, %c0_247, %c0_248], %633 {strides = array<i32>} : memref<1x16x32xf32, #tpu.memory_space<vmem>>, vector<1x16x32xf32>,
    return
  }
  func.func @transform_0(%arg0: i32) -> (i32, i32, i32) {
    %c0_i32 = arith.constant 0 : i32
    %c0_i32_0 = arith.constant 0 : i32
    %c0_i32_1 = arith.constant 0 : i32
    return %arg0, %c0_i32, %c0_i32_0 : i32, i32, i32
  }
  func.func @transform_1(%arg0: i32) -> (i32, i32, i32) {
    %c0_i32 = arith.constant 0 : i32
    %c0_i32_0 = arith.constant 0 : i32
    %c0_i32_1 = arith.constant 0 : i32
    %c0_i32_2 = arith.constant 0 : i32
    return %c0_i32, %c0_i32_0, %c0_i32_1 : i32, i32, i32
  }
  func.func @transform_2(%arg0: i32) -> (i32, i32, i32) {
    %c0_i32 = arith.constant 0 : i32
    %c0_i32_0 = arith.constant 0 : i32
    %c0_i32_1 = arith.constant 0 : i32
    %c0_i32_2 = arith.constant 0 : i32
    return %c0_i32, %c0_i32_0, %c0_i32_1 : i32, i32, i32
  }
  func.func @transform_3(%arg0: i32) -> (i32, i32, i32) {
    %c0_i32 = arith.constant 0 : i32
    %c0_i32_0 = arith.constant 0 : i32
    %c0_i32_1 = arith.constant 0 : i32
    %c0_i32_2 = arith.constant 0 : i32
    return %c0_i32, %c0_i32_0, %c0_i32_1 : i32, i32, i32
  }
  func.func @transform_4(%arg0: i32) -> (i32, i32, i32) {
    %c0_i32 = arith.constant 0 : i32
    %c0_i32_0 = arith.constant 0 : i32
    %c0_i32_1 = arith.constant 0 : i32
    %c0_i32_2 = arith.constant 0 : i32
    return %c0_i32, %c0_i32_0, %c0_i32_1 : i32, i32, i32
  }
  func.func @transform_5(%arg0: i32) -> (i32, i32, i32) {
    %c0_i32 = arith.constant 0 : i32
    %c0_i32_0 = arith.constant 0 : i32
    %c0_i32_1 = arith.constant 0 : i32
    %c0_i32_2 = arith.constant 0 : i32
    return %c0_i32, %c0_i32_0, %c0_i32_1 : i32, i32, i32
  }
  func.func @transform_6(%arg0: i32) -> (i32, i32, i32) {
    %c0_i32 = arith.constant 0 : i32
    %c0_i32_0 = arith.constant 0 : i32
    %c0_i32_1 = arith.constant 0 : i32
    %c0_i32_2 = arith.constant 0 : i32
    return %c0_i32, %c0_i32_0, %c0_i32_1 : i32, i32, i32
  }
  func.func @transform_7(%arg0: i32) -> (i32, i32, i32) {
    %c0_i32 = arith.constant 0 : i32
    %c0_i32_0 = arith.constant 0 : i32
    %c0_i32_1 = arith.constant 0 : i32
    %c0_i32_2 = arith.constant 0 : i32
    return %c0_i32, %c0_i32_0, %c0_i32_1 : i32, i32, i32
  }
  func.func @transform_8(%arg0: i32) -> (i32, i32, i32) {
    %c0_i32 = arith.constant 0 : i32
    %c0_i32_0 = arith.constant 0 : i32
    %c0_i32_1 = arith.constant 0 : i32
    %c0_i32_2 = arith.constant 0 : i32
    return %c0_i32, %c0_i32_0, %c0_i32_1 : i32, i32, i32
  }
  func.func @transform_9(%arg0: i32) -> (i32, i32, i32) {
    %c0_i32 = arith.constant 0 : i32
    %c0_i32_0 = arith.constant 0 : i32
    %c0_i32_1 = arith.constant 0 : i32
    %c0_i32_2 = arith.constant 0 : i32
    return %c0_i32, %c0_i32_0, %c0_i32_1 : i32, i32, i32
  }
  func.func @transform_10(%arg0: i32) -> (i32, i32) {
    %c0_i32 = arith.constant 0 : i32
    %c0_i32_0 = arith.constant 0 : i32
    %c0_i32_1 = arith.constant 0 : i32
    return %c0_i32, %c0_i32_0 : i32, i32
  }
  func.func @transform_11(%arg0: i32) -> (i32, i32) {
    %c0_i32 = arith.constant 0 : i32
    %c0_i32_0 = arith.constant 0 : i32
    %c0_i32_1 = arith.constant 0 : i32
    return %c0_i32, %c0_i32_0 : i32, i32
  }
  func.func @transform_12(%arg0: i32) -> (i32, i32) {
    %c0_i32 = arith.constant 0 : i32
    %c0_i32_0 = arith.constant 0 : i32
    %c0_i32_1 = arith.constant 0 : i32
    return %c0_i32, %c0_i32_0 : i32, i32
  }
  func.func @transform_13(%arg0: i32) -> (i32, i32) {
    %c0_i32 = arith.constant 0 : i32
    %c0_i32_0 = arith.constant 0 : i32
    %c0_i32_1 = arith.constant 0 : i32
    return %c0_i32, %c0_i32_0 : i32, i32
  }
  func.func @transform_14(%arg0: i32) -> (i32, i32) {
    %c0_i32 = arith.constant 0 : i32
    %c0_i32_0 = arith.constant 0 : i32
    %c0_i32_1 = arith.constant 0 : i32
    return %c0_i32, %c0_i32_0 : i32, i32
  }
  func.func @transform_15(%arg0: i32) -> (i32, i32, i32) {
    %c0_i32 = arith.constant 0 : i32
    %c0_i32_0 = arith.constant 0 : i32
    %c0_i32_1 = arith.constant 0 : i32
    %c0_i32_2 = arith.constant 0 : i32
    return %c0_i32, %c0_i32_0, %c0_i32_1 : i32, i32, i32
  }
  func.func @transform_16(%arg0: i32) -> (i32, i32, i32) {
    %c0_i32 = arith.constant 0 : i32
    %c0_i32_0 = arith.constant 0 : i32
    %c0_i32_1 = arith.constant 0 : i32
    %c0_i32_2 = arith.constant 0 : i32
    return %c0_i32, %c0_i32_0, %c0_i32_1 : i32, i32, i32
  }
  func.func @transform_17(%arg0: i32) -> (i32, i32, i32) {
    %c0_i32 = arith.constant 0 : i32
    %c0_i32_0 = arith.constant 0 : i32
    %c0_i32_1 = arith.constant 0 : i32
    %c0_i32_2 = arith.constant 0 : i32
    return %c0_i32, %c0_i32_0, %c0_i32_1 : i32, i32, i32
  }
  func.func @transform_18(%arg0: i32) -> (i32, i32, i32) {
    %c0_i32 = arith.constant 0 : i32
    %c0_i32_0 = arith.constant 0 : i32
    %c0_i32_1 = arith.constant 0 : i32
    %c0_i32_2 = arith.constant 0 : i32
    return %c0_i32, %c0_i32_0, %c0_i32_1 : i32, i32, i32
  }
  func.func @transform_19(%arg0: i32) -> (i32, i32, i32) {
    %c0_i32 = arith.constant 0 : i32
    %c0_i32_0 = arith.constant 0 : i32
    %c0_i32_1 = arith.constant 0 : i32
    %c0_i32_2 = arith.constant 0 : i32
    return %c0_i32, %c0_i32_0, %c0_i32_1 : i32, i32, i32
  }
  func.func @transform_20(%arg0: i32) -> (i32, i32, i32) {
    %c0_i32 = arith.constant 0 : i32
    %c0_i32_0 = arith.constant 0 : i32
    %c0_i32_1 = arith.constant 0 : i32
    return %arg0, %c0_i32, %c0_i32_0 : i32, i32, i32
  }
  func.func @transform_21(%arg0: i32) -> (i32, i32, i32) {
    %c0_i32 = arith.constant 0 : i32
    %c0_i32_0 = arith.constant 0 : i32
    %c0_i32_1 = arith.constant 0 : i32
    return %arg0, %c0_i32, %c0_i32_0 : i32, i32, i32
  }
  func.func @transform_22(%arg0: i32) -> (i32, i32, i32) {
    %c0_i32 = arith.constant 0 : i32
    %c0_i32_0 = arith.constant 0 : i32
    %c0_i32_1 = arith.constant 0 : i32
    return %arg0, %c0_i32, %c0_i32_0 : i32, i32, i32
  }
}

</mosaic_0001>

<bundles_post_ra>
// kernel: downsample_grfsq_forward.1
= control target key start
LH: loop header
LB: loop body
LE: loop exit
PB: predicated region body
PF: predicated region fallthrough
CT: control target
= control target key end

     0   :  { %s5399_s0 = inlined_call_operand.vmem [shape: f32[2,16,32], index: 0, kind: input, shape index: {}]   ;;  %s5400_s1 = inlined_call_operand.vmem [shape: f32[2,32,64], index: 1, kind: input, shape index: {}]   ;;  %s5401_s2 = inlined_call_operand.vmem [shape: f32[2,1,32], index: 2, kind: input, shape index: {}]   ;;  %s5402_s3 = inlined_call_operand.vmem [shape: f32[2,32,64], index: 3, kind: input, shape index: {}]   ;;  %s5403_s4 = inlined_call_operand.vmem [shape: f32[2,1,32], index: 4, kind: input, shape index: {}]   ;;  %s5404_s5 = inlined_call_operand.vmem [shape: f32[4,7,32], index: 5, kind: input, shape index: {}]   ;;  %s5405_s6 = inlined_call_operand.vmem [shape: f32[4,5,32], index: 6, kind: input, shape index: {}]   ;;  %s5406_s7 = inlined_call_operand.vmem [shape: f32[4,32,128], index: 7, kind: input, shape index: {}]   ;;  %s5407_s8 = inlined_call_operand.vmem [shape: f32[4,1,128], index: 8, kind: input, shape index: {}]   ;;  %s5408_s9 = inlined_call_operand.vmem [shape: f32[4,128,32], index: 9, kind: input, shape index: {}]   ;;  %s5409_s10 = inlined_call_operand.vmem [shape: f32[32,8], index: 10, kind: input, shape index: {}]   ;;  %s5410_s11 = inlined_call_operand.vmem [shape: f32[1,8], index: 11, kind: input, shape index: {}]   ;;  %s5411_s12 = inlined_call_operand.vmem [shape: f32[8,32], index: 12, kind: input, shape index: {}]   ;;  %s5412_s13 = inlined_call_operand.vmem [shape: f32[1,32], index: 13, kind: input, shape index: {}]   ;;  %s5413_s14 = inlined_call_operand.vmem [shape: f32[6,8], index: 14, kind: input, shape index: {}]   ;;  %s5414_s15 = inlined_call_operand.vmem [shape: f32[2,8,4], index: 15, kind: input, shape index: {}]   ;;  %s5415_s16 = inlined_call_operand.vmem [shape: f32[2,8,16], index: 16, kind: input, shape index: {}]   ;;  %s5416_s17 = inlined_call_operand.vmem [shape: f32[2,4,8], index: 17, kind: input, shape index: {}]   ;;  %s5417_s18 = inlined_call_operand.vmem [shape: f32[2,8,4], index: 18, kind: input, shape index: {}]   ;;  %s5418_s19 = inlined_call_operand.vmem [shape: f32[2,16,8], index: 19, kind: input, shape index: {}]   ;;  %s5419_s20 = inlined_call_operand.hbm [shape: f32[2,16,32], index: 20, kind: output, shape index: {0}]   ;;  %s5420_s21 = inlined_call_operand.vmem [shape: s32[2,4,4], index: 21, kind: output, shape index: {1}]   ;;  %s5421_s22 = inlined_call_operand.hbm [shape: f32[2,4,32], index: 22, kind: output, shape index: {2}]  }
   0x1   :  { %5438 = sst [smem:[#allocation14_spill]] %s5399_s0 }
   0x2   :  { %5439 = sst [smem:[#allocation15_spill]] %s5400_s1 }
   0x3   :  { %5440 = sst [smem:[#allocation16_spill]] %s5401_s2 }
   0x4   :  { %5441 = sst [smem:[#allocation17_spill]] %s5402_s3 }
   0x5   :  { %5442 = sst [smem:[#allocation18_spill]] %s5403_s4 }
   0x6   :  { %5443 = sst [smem:[#allocation19_spill]] %s5404_s5 }
   0x7   :  { %5444 = sst [smem:[#allocation20_spill]] %s5405_s6 }
   0x8   :  { %5445 = sst [smem:[#allocation21_spill]] %s5406_s7 }
   0x9   :  { %5446 = sst [smem:[#allocation22_spill]] %s5407_s8 }
   0xa   :  { %5447 = sst [smem:[#allocation23_spill]] %s5409_s10 }
   0xb   :  { %5448 = sst [smem:[#allocation24_spill]] %s5410_s11 }
   0xc   :  { %5449 = sst [smem:[#allocation25_spill]] %s5415_s16 }
   0xd   :  { %5450 = sst [smem:[#allocation26_spill]] %s5416_s17 }
   0xe   :  { %28 = vsyncpa [#allocation3], 0 }
   0xf   :  { %30 = vsyncpa [#allocation3 + $0x1], 0 }
  0x10   :  { %31 = vsyncpa [#allocation5], 0 }
  0x11   :  { %33 = vsyncpa [#allocation5 + $0x1], 0  ;;  %s4544_s3 = smov 0   ;;  %s4546_s28 = smov 0  }
  0x12   :  { %s4548_s29 = smov 0   ;;  %s4550_s30 = smov 0  }
  0x13 LB: > { %5451 = sst [smem:[#allocation8_spill]] %s4408_s3  ;;  %s4565_s4 = sadd.s32 4294967295, %s4420_s30   ;;  %s4420_s30 = sphi %s4550_s30, %s5476_s30   ;;  %s4416_s29 = sphi %s4548_s29, %s5478_s29   ;;  %s4412_s28 = sphi %s4546_s28, %s5480_s28   ;;  %s4408_s3 = sphi %s4544_s3, %s5479_s3  }
  0x14   : > { %5452 = sst [smem:[#allocation9_spill]] %s4416_s29  ;;  %s3637_s0 = sadd.s32 4294967294, %s4420_s30  }
  0x15   : > { %5453 = sst [smem:[#allocation10_spill]] %s4420_s30  ;;  %s4569_s23 = sadd.s32 1, %s4420_s30  }
  0x16   : > { %5454 = sst [smem:[#allocation11_spill]] %s4569_s23  ;;  %s471_s1 = sadd.s32 1, %s4416_s29 }
  0x17   : > { %s468_s5 = ssub.s32 %s4420_s30, %s4569_s23  ;;  %p481_p0 = scmp.ne.s32.totalorder %s4416_s29, %s4412_s28 }
  0x18   : > { %p469_p1 = scmp.eq.s32.totalorder %s468_s5, 0  ;;  %p482_p2 = scmp.eq.s32.totalorder %s4565_s4, 1 }
  0x19   : > { %p487_p3 = scmp.ne.s32.totalorder %s4412_s28, %s4408_s3  ;;  %p488_p4 = scmp.eq.s32.totalorder %s3637_s0, 1 }
  0x1a   : > { %s4580_s24 = scalar_select %p469_p1, %s4416_s29, %s471_s1  }
  0x1b   : > { %p4582_p5 = por %p482_p2, %p481_p0  ;;  %p4586_p6 = por %p488_p4, %p487_p3 }
  0x1c   : > { %5455 = sst [smem:[#allocation12_spill]] %s4580_s24  ;;  %p3640_p7 = scmp.ge.s32.totalorder %s4420_s30, 1 }
  0x1d   : > { %s5457_s25 = scalar_select %p4586_p6, 1, 0 }
  0x1e   : > { %p623_p8 = scmp.lt.s32.totalorder %s4420_s30, 3 }
  0x1f   : > { %5458 = sst [smem:[#allocation13_spill]] %s5457_s25 }
  0x20   : > { %p624_p9 = pnand %p3640_p7, %p623_p8 }
  0x21   : > { %s5459_s27 = sld [smem:[#allocation15_spill]] (!%p624_p9)  ;;  %p694_p10 = scmp.lt.s32.totalorder (!%p624_p9), %s4565_s4, 1 }
  0x22   : > { %627 = sbr.rel (%p624_p9) target bundleno = 5678 (0x162e), region = 100  ;;  %s5460_s25 = sld [smem:[#allocation14_spill]] (!%p624_p9) }
  0x23   : > { %s5461_s16 = sld [smem:[#allocation25_spill]] (!%p624_p9)  ;;  %s4954_s5 = sand.u32 (!%p624_p9), 1, %s4412_s28  }
  0x24   : > { %s5462_s0 = sld [smem:[#allocation16_spill]] (!%p624_p9)  ;;  %s3777_s1 = sshll.u32 (!%p624_p9), %s4565_s4, 6 }
  0x25   : > { %s5463_s24 = sld [smem:[#allocation19_spill]] (!%p624_p9) }
  0x26   : > { %s5464_s26 = sld [smem:[#allocation20_spill]] (!%p624_p9) }
  0x27   : > { %v708_v0 = vld [vmem:[%s5459_s27 + $0x18] sm:$0xff]  ;;  %v707_v1 = vld [vmem:[%s5459_s27 + $0x10] sm:$0xff]  ;;  %v706_v2 = vld [vmem:[%s5459_s27 + $0x8] sm:$0xff]  ;;  %s4603_s29 = scalar_select %p694_p10, %s4565_s4, 1  ;;  %vm709_vm0 = vcmask 261120   ;;  %v4422_v6 = vmov 0.0   ;;  %v986_v15 = vlaneseq }
  0x28   : > { %3924 = vmatprep.subr.mxu0 %v708_v0  ;;  %v705_v3 = vld [vmem:[%s5459_s27] sm:$0xff]  ;;  %3942 = vmatprep.subr.mxu1 %v4422_v6  ;;  %vm4423_vm1 = vmmov 0   ;;  %vm802_vm2 = vcmask 130048   ;;  %vm983_vm3 = vcmask 1042432   ;;  %vm999_vm4 = vcmask 1046528   ;;  %s5465_s7 = sld [smem:[#allocation21_spill]] }
  0x29   : > { %3925 = vmatpush3.msra.mxu0 %v708_v0  ;;  %s3780_s23 = sshll.u32 %s4603_s29, 4  ;;  %3946 = vmatprep.mubr.msk.f32.mxu1 %vm4423_vm1, %v4422_v6  ;;  %v791_v8 = vld [vmem:[%s5461_s16] sm:$0xff]  ;;  %v3648_v11 = vld [vmem:[%s5461_s16 + $0x8] sm:$0xff]  ;;  %v987_v16 = vshrl.u32 %v986_v15, 7  ;;  %vm1013_vm5 = vcmask 1045504   ;;  %vm1027_vm6 = vcmask 1044480  }
  0x2a   : > { %3926 = vmatprep.subr.mxu0 %v707_v1  ;;  %s698_s3 = scalar_lea.vmem %s5460_s25, %s3780_s23  ;;  %v3651_v18 = vld [vmem:[%s5462_s0] ss:$0 sm:$0xff]  ;;  %vm1041_vm7 = vcmask 1043456   ;;  %vm1068_vm8 = vcmask 1041408   ;;  %s5466_s8 = sld [smem:[#allocation22_spill]]  ;;  %vm1374_vm10 = vcmask 64512  }
  0x2b   : > { %3927 = vmatpush3.msra.mxu0 %v707_v1  ;;  %v703_v4 = vld [vmem:[%s698_s3] sm:$0xff]  ;;  %v704_v5 = vld [vmem:[%s698_s3 + $0x8] sm:$0xff]  ;;  %s5433_s3 = smov 96   ;;  %v4639_v19 = vsub.s32 1, %v987_v16  ;;  %v4641_v20 = vsub.s32 2, %v987_v16  ;;  %v4643_v21 = vsub.s32 3, %v987_v16 }
  0x2c   : > { %3928 = vmatprep.subr.mxu0 %v706_v2  ;;  %3932 = vmatprep.mubr.msk.f32.mxu0 %vm709_vm0, %v703_v4  ;;  %v957_v23 = vld [vmem:[%s5463_s24] sm:$0x7f]  ;;  %v4648_v24 = vsub.s32 4, %v987_v16  ;;  %v4650_v26 = vsub.s32 0, %v987_v16  ;;  %v4654_v28 = vsub.s32 5, %v987_v16  ;;  %v4661_v34 = vsub.s32 6, %v987_v16 }
  0x2d   : > { %3929 = vmatpush3.msra.mxu0 %v706_v2  ;;  %v994_v29 = vrot.slane %v957_v23, %v4639_v19  ;;  %v1008_v30 = vrot.slane %v957_v23, %v4641_v20  ;;  %v1022_v31 = vrot.slane %v957_v23, %v4643_v21  ;;  %s5468_s17 = sld [smem:[#allocation26_spill]]  ;;  %vm1635_vm11 = vcmask 257024   ;;  %s3642_s16 = sshll.u32 %s4954_s5, 2 }
  0x2e   : > { %3930 = vmatprep.subr.mxu0 %v705_v3  ;;  %v1036_v33 = vrot.slane %v957_v23, %v4648_v24  ;;  %v989_v35 = vrot.slane %v957_v23, %v4650_v26  ;;  %v1050_v38 = vrot.slane %v957_v23, %v4654_v28  ;;  %v1063_v46 = vrot.slane %v957_v23, %v4661_v34  ;;  %s5469_s10 = sld [smem:[#allocation23_spill]]  ;;  %s4961_s30 = scalar_lea.vmem [#allocation4], %s3642_s16 }
  0x2f   : > { %3931 = vmatpush3.msra.mxu0 %v705_v3  ;;  %s5470_s11 = sld [smem:[#allocation24_spill]]  ;;  %s3645_s25 = sshll.u32 %s4603_s29, 2  ;;  %vm2134_vm15 = vcmask 27648  }
  0x30   : > { %3933 = vmatmul.mubr.msk.f32.vlgmr.msra.gmra.mxu0 %vm709_vm0, %v704_v5  ;;  %3935 = vmatprep.subr.mxu0 %v4422_v6  ;;  %v4674_v5 = vld [vmem:[%s5464_s26] sm:$0x1f]  ;;  %s702_s2 = scalar_lea.vmem %s5420_s21, %s3645_s25  ;;  %s4425_s16 = smov [#allocation4]  }
  0x31   : > { %3939 = vmatprep.mubr.msk.f32.mxu0 %vm4423_vm1, %v4422_v6 }
  0xf0   : > { %v3934_v7 = vpop.f32.mrf.mxu0 }
  0xf1   : > { %798 = vrot.lane.b32.xlu0 %v3934_v7, %s5433_s3  ;;  %3943 = vmatpush3.msra.mxu1 %v3934_v7 }
  0xf2   : > { %v782_v9 = vpop.f32.mrf.mxu0  ;;  %3944 = vmatprep.subr.mxu1 %v4422_v6 }
  0xf3   : > { %3945 = vmatpush3.msra.mxu1 %v782_v9 }
  0xf4   : > { %3947 = vmatmul.mubr.msk.f32.vlgmr.msra.gmra.mxu1 %vm802_vm2, %v791_v8  ;;  %3960 = vmatprep.subr.mxu1 %v4422_v6 }
  0xf5   : > { %796 = vrot.lane.b32.xlu0 %v782_v9, %s5433_s3  ;;  %3992 = vmatprep.mubr.msk.f32.mxu1 %vm4423_vm1, %v4422_v6  ;;  %s5467_s3 = smov 96  }
 0x163   : > { %v799_v10 = vpop.permute.xlu0 %798 }
 0x164   : > { %3936 = vmatpush3.msra.mxu0 %v799_v10 }
 0x165   : > { %3937 = vmatprep.subr.mxu0 %v4422_v6 }
 0x167   : > { %v797_v12 = vpop.permute.xlu0 %796 }
 0x168   : > { %3938 = vmatpush3.msra.mxu0 %v797_v12 }
 0x169   : > { %3940 = vmatmul.mubr.msk.f32.vlgmr.msra.gmra.mxu0 %vm802_vm2, %v3648_v11  ;;  %3949 = vmatprep.subr.mxu0 %v4422_v6  ;;  %vm2300_vm2 = vcmask 31744  }
 0x16a   : > { %3957 = vmatprep.mubr.msk.f32.mxu0 %vm4423_vm1, %v4422_v6 }
 0x1b4   : > { %v945_v13 = vpop.f32.mrf.mxu1 }
 0x1b6   : > { %v3948_v14 = vpop.f32.mrf.mxu1 }
 0x229   : > { %v872_v17 = vpop.f32.mrf.mxu0 }
 0x22a   : > { %v946_v22 = vadd.f32 %v945_v13, %v872_v17  ;;  %v1077_v13 = vrot.slane %v4674_v5, %v4650_v26 }
 0x22b   : > { %v3941_v25 = vpop.f32.mrf.mxu0 }
 0x22c   : > { %v4652_v27 = vadd.f32 %v3651_v18, %v946_v22 }
 0x22e   : > { %v981_v32 = vrot.slane %v4652_v27, 5 }
 0x230   : > { %v984_v36 = vsel %vm983_vm3, 0.0, %v981_v32  ;;  %v985_v37 = vsel %vm983_vm3, %v981_v32, 0.0  ;;  %v960_v32 = vld [vmem:[%s5465_s7 + $0x8] sm:$0xff] }
 0x231   : > { %v995_v39 = vmul.f32 %v994_v29, %v984_v36  ;;  %v996_v40 = vmul.f32 %v994_v29, %v985_v37  ;;  %v1010_v41 = vmul.f32 %v1008_v30, %v985_v37  ;;  %v1024_v42 = vmul.f32 %v1022_v31, %v985_v37 }
 0x232   : > { %v1009_v43 = vmul.f32 %v1008_v30, %v984_v36  ;;  %v1023_v44 = vmul.f32 %v1022_v31, %v984_v36  ;;  %v1037_v45 = vmul.f32 %v1036_v33, %v984_v36  ;;  %v990_v50 = vmul.f32 %v989_v35, %v984_v36  ;;  %v962_v30 = vld [vmem:[%s5465_s7 + $0x18] sm:$0xff]  ;;  %v961_v31 = vld [vmem:[%s5465_s7 + $0x10] sm:$0xff] }
 0x233   : > { %v1001_v47 = vrot.slane %v996_v40, 1  ;;  %v1015_v48 = vrot.slane %v1010_v41, 2  ;;  %v1000_v49 = vrot.slane %v995_v39, 1  ;;  %v1029_v52 = vrot.slane %v1024_v42, 3  ;;  %3950 = vmatpush3.msra.mxu0 %v962_v30 }
 0x234   : > { %v1014_v51 = vrot.slane %v1009_v43, 2  ;;  %v1038_v53 = vmul.f32 %v1036_v33, %v985_v37  ;;  %v1028_v55 = vrot.slane %v1023_v44, 3  ;;  %v1051_v56 = vmul.f32 %v1050_v38, %v984_v36  ;;  %3951 = vmatprep.subr.mxu0 %v4422_v6  ;;  %v959_v33 = vld [vmem:[%s5465_s7] sm:$0xff]  ;;  %v979_v44 = vld [vmem:[%s5408_s9 + $0x78] sm:$0xff] }
 0x235   : > { %v1002_v54 = vsel %vm999_vm4, %v1000_v49, %v1001_v47  ;;  %v1052_v57 = vmul.f32 %v1050_v38, %v985_v37  ;;  %v1042_v59 = vrot.slane %v1037_v45, 4  ;;  %v1064_v62 = vmul.f32 %v1063_v46, %v984_v36  ;;  %3952 = vmatpush3.msra.mxu0 %v961_v31  ;;  %3961 = vmatpush3.msra.mxu1 %v979_v44  ;;  %v978_v45 = vld [vmem:[%s5408_s9 + $0x70] sm:$0xff]  ;;  %v976_v47 = vld [vmem:[%s5408_s9 + $0x60] sm:$0xff] }
 0x236   : > { %v1004_v58 = vadd.f32 %v1002_v54, %v990_v50  ;;  %v1016_v60 = vsel %vm1013_vm5, %v1014_v51, %v1015_v48  ;;  %v1043_v61 = vrot.slane %v1038_v53, 4  ;;  %v1065_v63 = vmul.f32 %v1063_v46, %v985_v37  ;;  %3953 = vmatprep.subr.mxu0 %v4422_v6  ;;  %3962 = vmatprep.subr.mxu1 %v4422_v6  ;;  %v977_v46 = vld [vmem:[%s5408_s9 + $0x68] sm:$0xff]  ;;  %v975_v48 = vld [vmem:[%s5408_s9 + $0x58] sm:$0xff]  ;;  %v974_v49 = vld [vmem:[%s5408_s9 + $0x50] sm:$0xff] }
 0x237   : > { %v1030_v1 = vsel %vm1027_vm6, %v1028_v55, %v1029_v52  ;;  %v1055_v2 = vrot.slane %v1051_v56, 5  ;;  %v1056_v3 = vrot.slane %v1052_v57, 5  ;;  %v1069_v8 = vrot.slane %v1064_v62, 6  ;;  %3954 = vmatpush3.msra.mxu0 %v960_v32  ;;  %3963 = vmatpush3.msra.mxu1 %v978_v45  ;;  %v973_v50 = vld [vmem:[%s5408_s9 + $0x48] sm:$0xff]  ;;  %v972_v51 = vld [vmem:[%s5408_s9 + $0x40] sm:$0xff]  ;;  %v971_v52 = vld [vmem:[%s5408_s9 + $0x38] sm:$0xff] }
 0x238   : > { %v1018_v0 = vadd.f32 %v1016_v60, %v1004_v58  ;;  %v1044_v7 = vsel %vm1041_vm7, %v1042_v59, %v1043_v61  ;;  %v1070_v9 = vrot.slane %v1065_v63, 6  ;;  %3955 = vmatprep.subr.mxu0 %v4422_v6  ;;  %v1096_v38 = vrot.slane %v4674_v5, %v4639_v19  ;;  %3964 = vmatprep.subr.mxu1 %v4422_v6  ;;  %v970_v53 = vld [vmem:[%s5408_s9 + $0x30] sm:$0xff]  ;;  %v969_v54 = vld [vmem:[%s5408_s9 + $0x28] sm:$0xff]  ;;  %v968_v55 = vld [vmem:[%s5408_s9 + $0x20] sm:$0xff] }
 0x239   : > { %v1057_v11 = vsel %vm983_vm3, %v1055_v2, %v1056_v3  ;;  %3956 = vmatpush3.msra.mxu0 %v959_v33  ;;  %v1101_v41 = vrot.slane %v4674_v5, %v4641_v20  ;;  %3965 = vmatpush3.msra.mxu1 %v977_v46  ;;  %v967_v56 = vld [vmem:[%s5408_s9 + $0x18] sm:$0xff]  ;;  %v966_v57 = vld [vmem:[%s5408_s9 + $0x10] sm:$0xff]  ;;  %v965_v58 = vld [vmem:[%s5408_s9 + $0x8] sm:$0xff] }
 0x23a   : > { %v1032_v4 = vadd.f32 %v1030_v1, %v1018_v0  ;;  %v1071_v14 = vsel %vm1068_vm8, %v1069_v8, %v1070_v9  ;;  %3995 = vmatprep.subr.mxu0 %v4422_v6  ;;  %3966 = vmatprep.subr.mxu1 %v4422_v6  ;;  %v964_v59 = vld [vmem:[%s5408_s9] sm:$0xff] }
 0x23b   : > { %3967 = vmatpush3.msra.mxu1 %v976_v47  ;;  %v3652_v60 = vld [vmem:[%s5466_s8] ss:$0 sm:$0xff] }
 0x23c   : > { %v1046_v10 = vadd.f32 %v1044_v7, %v1032_v4  ;;  %3968 = vmatprep.subr.mxu1 %v4422_v6 }
 0x23d   : > { %3969 = vmatpush3.msra.mxu1 %v975_v48  ;;  %v3659_v48 = vld [vmem:[%s5468_s17 + $0x4] sm:$0xf] }
 0x23e   : > { %v1059_v12 = vadd.f32 %v1057_v11, %v1046_v10  ;;  %3970 = vmatprep.subr.mxu1 %v4422_v6 }
 0x23f   : > { %3971 = vmatpush3.msra.mxu1 %v974_v49 }
 0x240   : > { %v1073_v15 = vadd.f32 %v1071_v14, %v1059_v12  ;;  %3972 = vmatprep.subr.mxu1 %v4422_v6 }
 0x241   : > { %3973 = vmatpush3.msra.mxu1 %v973_v50 }
 0x242   : > { %v1078_v16 = vadd.f32 %v1077_v13, %v1073_v15  ;;  %3974 = vmatprep.subr.mxu1 %v4422_v6 }
 0x243   : > { %3975 = vmatpush3.msra.mxu1 %v972_v51 }
 0x244   : > { %v1079_v17 = vsel %vm709_vm0, %v1078_v16, 0.0  ;;  %3976 = vmatprep.subr.mxu1 %v4422_v6 }
 0x245   : > { %1080 = vadd.xlane.f32.xlu1 %v1079_v17  ;;  %3977 = vmatpush3.msra.mxu1 %v971_v52  ;;  %v3663_v52 = vld [vmem:[%s5462_s0 + $0x1] ss:$0 sm:$0xff]  ;;  %s3520_s0 = scalar_lea.hbm %s5421_s22, %s3777_s1 }
 0x246   : > { %3978 = vmatprep.subr.mxu1 %v4422_v6 }
 0x247   : > { %3979 = vmatpush3.msra.mxu1 %v970_v53 }
 0x248   : > { %3980 = vmatprep.subr.mxu1 %v4422_v6 }
 0x249   : > { %3981 = vmatpush3.msra.mxu1 %v969_v54 }
 0x24a   : > { %3982 = vmatprep.subr.mxu1 %v4422_v6 }
 0x24b   : > { %3983 = vmatpush3.msra.mxu1 %v968_v55  ;;  %v3664_v55 = vld [vmem:[%s5463_s24 + $0x8] sm:$0x7f] }
 0x24c   : > { %3984 = vmatprep.subr.mxu1 %v4422_v6 }
 0x24d   : > { %3985 = vmatpush3.msra.mxu1 %v967_v56 }
 0x24e   : > { %3986 = vmatprep.subr.mxu1 %v4422_v6 }
 0x24f   : > { %3987 = vmatpush3.msra.mxu1 %v966_v57 }
 0x250   : > { %3988 = vmatprep.subr.mxu1 %v4422_v6 }
 0x251   : > { %3989 = vmatpush3.msra.mxu1 %v965_v58  ;;  %v1571_v58 = vrot.slane %v3664_v55, %v4639_v19 }
 0x252   : > { %3990 = vmatprep.subr.mxu1 %v4422_v6 }
 0x253   : > { %3991 = vmatpush3.msra.mxu1 %v964_v59  ;;  %v1580_v59 = vrot.slane %v3664_v55, %v4641_v20 }
 0x254   : > { %4073 = vmatprep.subr.mxu1 %v4422_v6 }
 0x2ce   : > { %v1081_v18 = vpop.xlane.xlu1 %1080 }
 0x2cf   : > { %v1083_v22 = vmul.f32 0.03125, %v1081_v18 }
 0x2d1   : > { %v1084_v23 = vsub.f32 %v1078_v16, %v1083_v22 }
 0x2d3   : > { %v1085_v25 = vmul.f32 %v1084_v23, %v1084_v23 }
 0x2d5   : > { %v1086_v29 = vsel %vm709_vm0, %v1085_v25, 0.0 }
 0x2d6   : > { %1087 = vadd.xlane.f32.xlu1 %v1086_v29 }
 0x35f   : > { %v1088_v35 = vpop.xlane.xlu1 %1087 }
 0x360   : > { %v1089_v36 = vmul.f32 0.03125, %v1088_v35  ;;  %v3657_v35 = vld [vmem:[%s5459_s27 + $0x38] sm:$0xff] }
 0x362   : > { %v1090_v37 = vadd.f32 1e-06, %v1089_v36  ;;  %v3656_v36 = vld [vmem:[%s5459_s27 + $0x30] sm:$0xff] }
 0x364   : > { %4290 = vrsqrt.f32 %v1090_v37  ;;  %v3655_v37 = vld [vmem:[%s5459_s27 + $0x28] sm:$0xff] }
 0x371   : > { %v4291_v39 = vpop.eup %4290 }
 0x372   : > { %v1092_v40 = vmul.f32 %v4291_v39, %v1084_v23  ;;  %v1212_v39 = vrot.slane %v4674_v5, %v4643_v21 }
 0x374   : > { %v1097_v42 = vmul.f32 %v1096_v38, %v1092_v40  ;;  %v3654_v38 = vld [vmem:[%s5459_s27 + $0x20] sm:$0xff]  ;;  %v1286_v40 = vrot.slane %v4674_v5, %v4648_v24 }
 0x376   : > { %v1102_v43 = vadd.f32 %v1101_v41, %v1097_v42 }
 0x378   : > { %3958 = vmatmul.mubr.msk.f32.vlgmr.msra.gmra.mxu0 %vm709_vm0, %v1102_v43 }
 0x379   : > { %4003 = vmatprep.mubr.msk.f32.mxu0 %vm4423_vm1, %v4422_v6  ;;  %3996 = vmatpush3.msra.mxu0 %v3657_v35 }
 0x37a   : > { %3997 = vmatprep.subr.mxu0 %v4422_v6 }
 0x37b   : > { %3998 = vmatpush3.msra.mxu0 %v3656_v36 }
 0x37c   : > { %3999 = vmatprep.subr.mxu0 %v4422_v6 }
 0x37d   : > { %4000 = vmatpush3.msra.mxu0 %v3655_v37 }
 0x37e   : > { %4001 = vmatprep.subr.mxu0 %v4422_v6 }
 0x37f   : > { %4002 = vmatpush3.msra.mxu0 %v3654_v38 }
 0x380   : > { %4006 = vmatprep.subr.mxu0 %v4422_v6 }
 0x438   : > { %v1178_v61 = vpop.f32.mrf.mxu0 }
 0x439   : > { %v1179_v62 = vadd.f32 %v3652_v60, %v1178_v61  ;;  %v1566_v61 = vrot.slane %v3664_v55, %v4650_v26 }
 0x43a   : > { %v3959_v63 = vpop.f32.mrf.mxu0 }
 0x43b   : > { %v1183_v0 = vmul.f32 0.70710677, %v1179_v62  ;;  %v1182_v31 = vmul.f32 0.5, %v1179_v62  ;;  %v1589_v62 = vrot.slane %v3664_v55, %v4643_v21 }
 0x43d   : > { %v1184_v1 = vand.u32 2147483647, %v1183_v0  ;;  %vm1204_vm9 = vcmp.ge.f32.partialorder %v1183_v0, 0.0  ;;  %v1607_v0 = vrot.slane %v3664_v55, %v4654_v28 }
 0x43f   : > { %v1185_v2 = vmul.f32 0.3275911, %v1184_v1  ;;  %v1198_v4 = vsub.f32 0.0, %v1184_v1 }
 0x441   : > { %v1186_v3 = vadd.f32 1.0, %v1185_v2  ;;  %v1199_v7 = vmul.f32 %v1198_v4, %v1184_v1  ;;  %v1620_v4 = vrot.slane %v3664_v55, %v4661_v34 }
 0x443   : > { %4292 = vrcp.f32 %v1186_v3  ;;  %v1200_v10 = vmul.f32 1.442695, %v1199_v7  ;;  %v1598_v3 = vrot.slane %v3664_v55, %v4648_v24 }
 0x445   : > { %4294 = vpow2.f32 %v1200_v10 }
 0x450   : > { %v4293_v8 = vpop.eup %4292 }
 0x451   : > { %v1189_v9 = vmul.f32 1.0614054, %v4293_v8 }
 0x452   : > { %v4295_v22 = vpop.eup %4294 }
 0x453   : > { %v1190_v11 = vadd.f32 -1.4531521, %v1189_v9 }
 0x455   : > { %v1191_v12 = vmul.f32 %v4293_v8, %v1190_v11  ;;  %v1609_v11 = vmul.f32 0.0, %v1607_v0 }
 0x457   : > { %v1192_v13 = vadd.f32 1.4214138, %v1191_v12 }
 0x459   : > { %v1193_v14 = vmul.f32 %v4293_v8, %v1192_v13 }
 0x45b   : > { %v1194_v15 = vadd.f32 -0.28449672, %v1193_v14 }
 0x45d   : > { %v1195_v16 = vmul.f32 %v4293_v8, %v1194_v15 }
 0x45f   : > { %v1196_v17 = vadd.f32 0.2548296, %v1195_v16  ;;  %v1622_v16 = vmul.f32 0.0, %v1620_v4 }
 0x461   : > { %v1197_v18 = vmul.f32 %v4293_v8, %v1196_v17 }
 0x463   : > { %v1202_v23 = vmul.f32 %v4295_v22, %v1197_v18 }
 0x465   : > { %v1203_v25 = vsub.f32 1.0, %v1202_v23  ;;  %v1613_v23 = vrot.slane %v1609_v11, 5  ;;  %v3672_v11 = vld [vmem:[%s5408_s9 + $0x88] sm:$0xff] }
 0x467   : > { %v1205_v29 = vsub.f32 0.0, %v1203_v25 }
 0x469   : > { %v1206_v30 = vsel %vm1204_vm9, %v1203_v25, %v1205_v29 }
 0x46a   : > { %v1207_v32 = vadd.f32 1.0, %v1206_v30  ;;  %v4835_v30 = vld [vmem:[%s5464_s26 + $0x8] sm:$0x1f] }
 0x46b   : > { %v1633_v37 = vrot.slane %v4835_v30, %v4650_v26  ;;  %v1657_v55 = vrot.slane %v4835_v30, %v4641_v20 }
 0x46c   : > { %v1208_v33 = vmul.f32 %v1207_v32, %v1182_v31  ;;  %v1626_v32 = vrot.slane %v1622_v16, 6 }
 0x46e   : > { %3993 = vmatmul.mubr.f32.vlgmr.msra.gmra.mxu1 %v1208_v33 }
 0x46f   : > { %4075 = vmatprep.mubr.msk.f32.mxu1 %vm4423_vm1, %v4422_v6 }
 0x52e   : > { %v1279_v41 = vpop.f32.mrf.mxu1 }
 0x52f   : > { %v1280_v42 = vadd.f32 %v1279_v41, %v1212_v39 }
 0x530   : > { %v3994_v43 = vpop.f32.mrf.mxu1 }
 0x531   : > { %v1287_v44 = vmul.f32 %v1286_v40, %v1280_v42 }
 0x533   : > { %v1288_v45 = vadd.f32 %v1287_v44, %v4652_v27  ;;  %v1367_v27 = vld [vmem:[%s5468_s17] sm:$0xf]  ;;  %s4334_s17 = sshll.u32 %s4425_s16, 4  ;;  %s4335_s17 = int_to_ptr.vmem [resolvable:$false] %s4334_s17 }
 0x535   : > { %4004 = vmatmul.mubr.msk.f32.vlgmr.msra.gmra.mxu0 %vm709_vm0, %v1288_v45 }
 0x536   : > { %4008 = vmatprep.mubr.msk.f32.mxu0 %vm4423_vm1, %v4422_v6 }
 0x5f5   : > { %v1363_v46 = vpop.f32.mrf.mxu0 }
 0x5f6   : > { %1371 = vrot.lane.b32.xlu0 %v1363_v46, %s5467_s3 }
 0x5f7   : > { %v4005_v47 = vpop.f32.mrf.mxu0 }
 0x5f8   : > { %v3669_v47 = vld [vmem:[%s5465_s7 + $0x38] sm:$0xff] }
 0x668   : > { %v1372_v5 = vpop.permute.xlu0 %1371 }
 0x669   : > { %4007 = vmatpush3.msra.mxu0 %v1372_v5  ;;  %v3667_v5 = vld [vmem:[%s5465_s7 + $0x28] sm:$0xff] }
 0x66a   : > { %4009 = vmatmul.mubr.msk.f32.vlgmr.msra.gmra.mxu0 %vm1374_vm10, %v3659_v48  ;;  %4011 = vmatprep.subr.mxu0 %v4422_v6  ;;  %v3668_v48 = vld [vmem:[%s5465_s7 + $0x30] sm:$0xff] }
 0x66b   : > { %4012 = vmatpush3.msra.mxu0 %v1363_v46  ;;  %4013 = vmatprep.mubr.msk.f32.mxu0 %vm4423_vm1, %v4422_v6 }
 0x66c   : > { %4016 = vmatprep.subr.mxu0 %v4422_v6 }
 0x66e   : > { %4014 = vmatmul.mubr.msk.f32.vlgmr.msra.gmra.mxu0 %vm1374_vm10, %v1367_v27  ;;  %v3666_v27 = vld [vmem:[%s5465_s7 + $0x20] sm:$0xff] }
 0x66f   : > { %4024 = vmatprep.mubr.msk.f32.mxu0 %vm4423_vm1, %v4422_v6  ;;  %4017 = vmatpush3.msra.mxu0 %v3669_v47 }
 0x670   : > { %4018 = vmatprep.subr.mxu0 %v4422_v6 }
 0x671   : > { %4019 = vmatpush3.msra.mxu0 %v3668_v48 }
 0x672   : > { %4020 = vmatprep.subr.mxu0 %v4422_v6 }
 0x673   : > { %4021 = vmatpush3.msra.mxu0 %v3667_v5 }
 0x674   : > { %4022 = vmatprep.subr.mxu0 %v4422_v6 }
 0x675   : > { %4023 = vmatpush3.msra.mxu0 %v3666_v27 }
 0x676   : > { %4027 = vmatprep.subr.mxu0 %v4422_v6 }
 0x72a   : > { %v1444_v49 = vpop.f32.mrf.mxu0 }
 0x72c   : > { %v4010_v50 = vpop.f32.mrf.mxu0 }
 0x72e   : > { %v1517_v51 = vpop.f32.mrf.mxu0 }
 0x72f   : > { %v1518_v53 = vadd.f32 %v1517_v51, %v1444_v49 }
 0x730   : > { %v4015_v54 = vpop.f32.mrf.mxu0 }
 0x731   : > { %v4820_v56 = vadd.f32 %v3663_v52, %v1518_v53  ;;  %v1652_v52 = vrot.slane %v4835_v30, %v4639_v19 }
 0x733   : > { %v1559_v57 = vrot.slane %v4820_v56, 5 }
 0x735   : > { %v1561_v60 = vsel %vm983_vm3, 0.0, %v1559_v57 }
 0x736   : > { %v1562_v63 = vsel %vm999_vm4, %v1561_v60, 0.0  ;;  %v3685_v60 = vld [vmem:[%s5408_s9 + $0xf0] sm:$0xff] }
 0x737   : > { %v1572_v1 = vmul.f32 %v1571_v58, %v1562_v63  ;;  %v1581_v2 = vmul.f32 %v1580_v59, %v1562_v63  ;;  %v1567_v7 = vmul.f32 %v1566_v61, %v1562_v63  ;;  %v1590_v9 = vmul.f32 %v1589_v62, %v1562_v63  ;;  %v3686_v59 = vld [vmem:[%s5408_s9 + $0xf8] sm:$0xff]  ;;  %v3684_v61 = vld [vmem:[%s5408_s9 + $0xe8] sm:$0xff]  ;;  %v3683_v62 = vld [vmem:[%s5408_s9 + $0xe0] sm:$0xff] }
 0x738   : > { %v1608_v10 = vmul.f32 %v1607_v0, %v1562_v63  ;;  %v1599_v14 = vmul.f32 %v1598_v3, %v1562_v63  ;;  %v1621_v15 = vmul.f32 %v1620_v4, %v1562_v63  ;;  %v3682_v63 = vld [vmem:[%s5408_s9 + $0xd8] sm:$0xff]  ;;  %v3681_v0 = vld [vmem:[%s5408_s9 + $0xd0] sm:$0xff] }
 0x739   : > { %v1574_v8 = vrot.slane %v1572_v1, 1  ;;  %v1583_v13 = vrot.slane %v1581_v2, 2  ;;  %v1592_v18 = vrot.slane %v1590_v9, 3  ;;  %v3680_v1 = vld [vmem:[%s5408_s9 + $0xc8] sm:$0xff]  ;;  %v3679_v2 = vld [vmem:[%s5408_s9 + $0xc0] sm:$0xff]  ;;  %v3678_v3 = vld [vmem:[%s5408_s9 + $0xb8] sm:$0xff] }
 0x73a   : > { %v1612_v22 = vrot.slane %v1608_v10, 5  ;;  %v1601_v29 = vrot.slane %v1599_v14, 4  ;;  %v1625_v31 = vrot.slane %v1621_v15, 6  ;;  %v3677_v4 = vld [vmem:[%s5408_s9 + $0xb0] sm:$0xff]  ;;  %v3674_v9 = vld [vmem:[%s5408_s9 + $0x98] sm:$0xff] }
 0x73b   : > { %v1576_v12 = vadd.f32 %v1574_v8, %v1567_v7  ;;  %v3676_v7 = vld [vmem:[%s5408_s9 + $0xa8] sm:$0xff]  ;;  %v3675_v8 = vld [vmem:[%s5408_s9 + $0xa0] sm:$0xff]  ;;  %v3673_v10 = vld [vmem:[%s5408_s9 + $0x90] sm:$0xff] }
 0x73c   : > { %v1614_v35 = vsel %vm983_vm3, %v1612_v22, %v1613_v23  ;;  %v1627_v38 = vsel %vm1068_vm8, %v1625_v31, %v1626_v32 }
 0x73d   : > { %v1585_v17 = vadd.f32 %v1583_v13, %v1576_v12  ;;  %v3671_v12 = vld [vmem:[%s5408_s9 + $0x80] sm:$0xff] }
 0x73e   : > { %v3687_v13 = vld [vmem:[%s5466_s8 + $0x1] ss:$0 sm:$0xff] }
 0x73f   : > { %v1594_v25 = vadd.f32 %v1592_v18, %v1585_v17 }
 0x741   : > { %v1603_v33 = vadd.f32 %v1601_v29, %v1594_v25 }
 0x743   : > { %v1616_v36 = vadd.f32 %v1614_v35, %v1603_v33 }
 0x745   : > { %v1629_v39 = vadd.f32 %v1627_v38, %v1616_v36 }
 0x747   : > { %v1634_v40 = vadd.f32 %v1633_v37, %v1629_v39 }
 0x749   : > { %v1636_v41 = vsel %vm1635_vm11, %v1634_v40, 0.0 }
 0x74a   : > { %1637 = vadd.xlane.f32.xlu1 %v1636_v41 }
 0x7d3   : > { %v1638_v42 = vpop.xlane.xlu1 %1637 }
 0x7d4   : > { %v1639_v43 = vmul.f32 0.03125, %v1638_v42 }
 0x7d6   : > { %v1640_v44 = vsub.f32 %v1634_v40, %v1639_v43 }
 0x7d8   : > { %v1641_v45 = vmul.f32 %v1640_v44, %v1640_v44 }
 0x7da   : > { %v1642_v46 = vsel %vm1635_vm11, %v1641_v45, 0.0 }
 0x7db   : > { %1643 = vadd.xlane.f32.xlu0 %v1642_v46 }
 0x864   : > { %v1644_v49 = vpop.xlane.xlu0 %1643 }
 0x865   : > { %v1645_v50 = vmul.f32 0.03125, %v1644_v49  ;;  %v1853_v49 = vld [vmem:[%s5469_s10 + $0x18] sm:$0xff] }
 0x867   : > { %v1646_v51 = vadd.f32 1e-06, %v1645_v50  ;;  %v1852_v50 = vld [vmem:[%s5469_s10 + $0x10] sm:$0xff] }
 0x869   : > { %4296 = vrsqrt.f32 %v1646_v51  ;;  %v1851_v51 = vld [vmem:[%s5469_s10 + $0x8] sm:$0xff] }
 0x876   : > { %v4297_v53 = vpop.eup %4296 }
 0x877   : > { %v1648_v54 = vmul.f32 %v4297_v53, %v1640_v44  ;;  %v1768_v53 = vrot.slane %v4835_v30, %v4643_v21 }
 0x879   : > { %v1653_v57 = vmul.f32 %v1652_v52, %v1648_v54  ;;  %v1850_v52 = vld [vmem:[%s5469_s10] sm:$0xff]  ;;  %v1842_v54 = vrot.slane %v4835_v30, %v4648_v24  ;;  %v3697_v30 = vld [vmem:[%s5414_s15 + $0x8] sm:$0xff]  ;;  %s5471_s10 = sld [smem:[#allocation17_spill]] }
 0x87a   : > { %4074 = vmatpush3.msra.mxu1 %v3697_v30 }
 0x87b   : > { %v1658_v58 = vadd.f32 %v1657_v55, %v1653_v57  ;;  %4078 = vmatprep.subr.mxu1 %v4422_v6 }
 0x87d   : > { %4025 = vmatmul.mubr.msk.f32.vlgmr.msra.gmra.mxu0 %vm709_vm0, %v1658_v58 }
 0x87e   : > { %4059 = vmatprep.mubr.msk.f32.mxu0 %vm4423_vm1, %v4422_v6  ;;  %4028 = vmatpush3.msra.mxu0 %v3686_v59 }
 0x87f   : > { %4029 = vmatprep.subr.mxu0 %v4422_v6 }
 0x880   : > { %4030 = vmatpush3.msra.mxu0 %v3685_v60 }
 0x881   : > { %4031 = vmatprep.subr.mxu0 %v4422_v6 }
 0x882   : > { %4032 = vmatpush3.msra.mxu0 %v3684_v61  ;;  %v3689_v61 = vld [vmem:[%s5470_s11] ss:$0 sm:$0xff]  ;;  %s3522_s11 = sshll.u32 %s4961_s30, 4  ;;  %s3523_s11 = int_to_ptr.vmem [resolvable:$true] %s3522_s11 }
 0x883   : > { %4033 = vmatprep.subr.mxu0 %v4422_v6  ;;  %s4330_s25 = scalar_lea.vmem %s3523_s11, 64  ;;  %p4337_p0 = scmp.lt.s32.totalorder %s3523_s11, %s4335_s17 }
 0x884   : > { %4034 = vmatpush3.msra.mxu0 %v3683_v62  ;;  %p4331_p11 = scmp.ne.s32.totalorder %s3523_s11, %s4330_s25 }
 0x885   : > { %4035 = vmatprep.subr.mxu0 %v4422_v6 }
 0x886   : > { %4036 = vmatpush3.msra.mxu0 %v3682_v63  ;;  %p4332_p12 = pnand %p4331_p11, %p4582_p5 }
 0x887   : > { %4037 = vmatprep.subr.mxu0 %v4422_v6 }
 0x888   : > { %4038 = vmatpush3.msra.mxu0 %v3681_v0  ;;  %p4333_p13 = pneg %p4332_p12 }
 0x889   : > { %4039 = vmatprep.subr.mxu0 %v4422_v6 }
 0x88a   : > { %4040 = vmatpush3.msra.mxu0 %v3680_v1  ;;  %v3692_v1 = vld [vmem:[%s5413_s14 + $0x2] ss:$0 sm:$0xff] }
 0x88b   : > { %4041 = vmatprep.subr.mxu0 %v4422_v6 }
 0x88c   : > { %4042 = vmatpush3.msra.mxu0 %v3679_v2 }
 0x88d   : > { %4043 = vmatprep.subr.mxu0 %v4422_v6 }
 0x88e   : > { %4044 = vmatpush3.msra.mxu0 %v3678_v3 }
 0x88f   : > { %4045 = vmatprep.subr.mxu0 %v4422_v6 }
 0x890   : > { %4046 = vmatpush3.msra.mxu0 %v3677_v4 }
 0x891   : > { %4047 = vmatprep.subr.mxu0 %v4422_v6 }
 0x892   : > { %4048 = vmatpush3.msra.mxu0 %v3676_v7  ;;  %v3695_v7 = vld [vmem:[%s5413_s14 + $0x3] ss:$0 sm:$0xff] }
 0x893   : > { %4049 = vmatprep.subr.mxu0 %v4422_v6 }
 0x894   : > { %4050 = vmatpush3.msra.mxu0 %v3675_v8  ;;  %v3693_v8 = vld [vmem:[%s5413_s14] ss:$0 sm:$0xff] }
 0x895   : > { %4051 = vmatprep.subr.mxu0 %v4422_v6 }
 0x896   : > { %4052 = vmatpush3.msra.mxu0 %v3674_v9 }
 0x897   : > { %4053 = vmatprep.subr.mxu0 %v4422_v6 }
 0x898   : > { %4054 = vmatpush3.msra.mxu0 %v3673_v10  ;;  %v3694_v10 = vld [vmem:[%s5413_s14 + $0x1] ss:$0 sm:$0xff] }
 0x899   : > { %4055 = vmatprep.subr.mxu0 %v4422_v6 }
 0x89a   : > { %4056 = vmatpush3.msra.mxu0 %v3672_v11 }
 0x89b   : > { %4057 = vmatprep.subr.mxu0 %v4422_v6 }
 0x89c   : > { %4058 = vmatpush3.msra.mxu0 %v3671_v12  ;;  %v3696_v12 = vld [vmem:[%s5413_s14 + $0x5] ss:$0 sm:$0xff] }
 0x89d   : > { %4062 = vmatprep.subr.mxu0 %v4422_v6 }
 0x93d   : > { %v1734_v14 = vpop.f32.mrf.mxu0 }
 0x93e   : > { %v1735_v15 = vadd.f32 %v3687_v13, %v1734_v14 }
 0x93f   : > { %v4026_v16 = vpop.f32.mrf.mxu0 }
 0x940   : > { %v1739_v17 = vmul.f32 0.70710677, %v1735_v15  ;;  %v1738_v48 = vmul.f32 0.5, %v1735_v15 }
 0x942   : > { %v1740_v18 = vand.u32 2147483647, %v1739_v17  ;;  %vm1760_vm12 = vcmp.ge.f32.partialorder %v1739_v17, 0.0 }
 0x944   : > { %v1741_v22 = vmul.f32 0.3275911, %v1740_v18  ;;  %v1754_v25 = vsub.f32 0.0, %v1740_v18 }
 0x946   : > { %v1742_v23 = vadd.f32 1.0, %v1741_v22  ;;  %v1755_v29 = vmul.f32 %v1754_v25, %v1740_v18 }
 0x948   : > { %4298 = vrcp.f32 %v1742_v23  ;;  %v1756_v33 = vmul.f32 1.442695, %v1755_v29 }
 0x94a   : > { %4300 = vpow2.f32 %v1756_v33 }
 0x955   : > { %v4299_v31 = vpop.eup %4298 }
 0x956   : > { %v1745_v32 = vmul.f32 1.0614054, %v4299_v31 }
 0x957   : > { %v4301_v43 = vpop.eup %4300 }
 0x958   : > { %v1746_v35 = vadd.f32 -1.4531521, %v1745_v32 }
 0x95a   : > { %v1747_v36 = vmul.f32 %v4299_v31, %v1746_v35 }
 0x95c   : > { %v1748_v37 = vadd.f32 1.4214138, %v1747_v36 }
 0x95e   : > { %v1749_v38 = vmul.f32 %v4299_v31, %v1748_v37 }
 0x960   : > { %v1750_v39 = vadd.f32 -0.28449672, %v1749_v38 }
 0x962   : > { %v1751_v40 = vmul.f32 %v4299_v31, %v1750_v39 }
 0x964   : > { %v1752_v41 = vadd.f32 0.2548296, %v1751_v40 }
 0x966   : > { %v1753_v42 = vmul.f32 %v4299_v31, %v1752_v41 }
 0x968   : > { %v1758_v44 = vmul.f32 %v4301_v43, %v1753_v42 }
 0x96a   : > { %v1759_v45 = vsub.f32 1.0, %v1758_v44 }
 0x96c   : > { %v1761_v46 = vsub.f32 0.0, %v1759_v45 }
 0x96e   : > { %v1762_v47 = vsel %vm1760_vm12, %v1759_v45, %v1761_v46 }
 0x96f   : > { %v1763_v5 = vadd.f32 1.0, %v1762_v47 }
 0x971   : > { %v1764_v27 = vmul.f32 %v1763_v5, %v1738_v48  ;;  %v1965_v5 = vld [vmem:[%s5414_s15] sm:$0xff] }
 0x973   : > { %4060 = vmatmul.mubr.f32.vlgmr.msra.gmra.mxu0 %v1764_v27 }
 0x974   : > { %4070 = vmatprep.mubr.msk.f32.mxu0 %vm4423_vm1, %v4422_v6  ;;  %4063 = vmatpush3.msra.mxu0 %v1853_v49 }
 0x975   : > { %4064 = vmatprep.subr.mxu0 %v4422_v6 }
 0x976   : > { %4065 = vmatpush3.msra.mxu0 %v1852_v50  ;;  %v2136_v50 = vld [vmem:[%s5411_s12] sm:$0xff] }
 0x977   : > { %4066 = vmatprep.subr.mxu0 %v4422_v6 }
 0x978   : > { %4067 = vmatpush3.msra.mxu0 %v1851_v51 }
 0x979   : > { %4068 = vmatprep.subr.mxu0 %v4422_v6 }
 0x97a   : > { %4069 = vmatpush3.msra.mxu0 %v1850_v52  ;;  %v2220_v52 = vld [vmem:[%s5471_s10 + $0x18] sm:$0xff] }
 0x97b   : > { %4104 = vmatprep.subr.mxu0 %v4422_v6 }
 0xa33   : > { %v1835_v55 = vpop.f32.mrf.mxu0 }
 0xa34   : > { %v1836_v57 = vadd.f32 %v1835_v55, %v1768_v53  ;;  %v2219_v53 = vld [vmem:[%s5471_s10 + $0x10] sm:$0xff]  ;;  %v2217_v55 = vld [vmem:[%s5471_s10] sm:$0xff] }
 0xa35   : > { %v4061_v58 = vpop.f32.mrf.mxu0 }
 0xa36   : > { %v1843_v59 = vmul.f32 %v1842_v54, %v1836_v57  ;;  %v2218_v54 = vld [vmem:[%s5471_s10 + $0x8] sm:$0xff] }
 0xa38   : > { %v1844_v60 = vadd.f32 %v1843_v59, %v4820_v56  ;;  %v3691_v56 = vld [vmem:[%s5413_s14 + $0x4] ss:$0 sm:$0xff] }
 0xa39   : > { %4302 = vrcp.f32 %v3691_v56 }
 0xa3a   : > { %4071 = vmatmul.mubr.msk.f32.vlgmr.msra.gmra.mxu0 %vm709_vm0, %v1844_v60  ;;  %1845 = vst.msk [vmem:[%s4961_s30] sm:$0xf] %vm1635_vm11, %v1844_v60 }
 0xa3b   : > { %4106 = vmatprep.mubr.msk.f32.mxu0 %vm4423_vm1, %v4422_v6 }
 0xa46   : > { %v4303_v62 = vpop.eup %4302 }
 0xafa   : > { %v1930_v63 = vpop.f32.mrf.mxu0 }
 0xafb   : > { %v1931_v0 = vadd.f32 %v3689_v61, %v1930_v63 }
 0xafc   : > { %v4072_v2 = vpop.f32.mrf.mxu0 }
 0xafd   : > { %v1940_v3 = vmul.f32 %v4303_v62, %v1931_v0 }
 0xaff   : > { %v1945_v4 = vadd.f32 %v3692_v1, %v1940_v3 }
 0xb01   : > { %4304 = vtanh.f32 %v1945_v4  ;;  %v3703_v4 = vld [vmem:[%s5417_s18 + $0x8] sm:$0xff] }
 0xb02   : > { %4306 = vrcp.f32 %v3695_v7 }
 0xb03   : > { %4308 = vrcp.f32 %v3696_v12 }
 0xb0e   : > { %v4305_v9 = vpop.eup %4304 }
 0xb0f   : > { %v1951_v11 = vmul.f32 %v4305_v9, %v3693_v8  ;;  %v4307_v22 = vpop.eup %4306 }
 0xb10   : > { %v4309_v32 = vpop.eup %4308 }
 0xb11   : > { %v1956_v13 = vsub.f32 %v1951_v11, %v3694_v10 }
 0xb13   : > { %v4224_v14 = vcvt.f32.s32 %v1956_v13  ;;  %v4222_v16 = vand.u32 2147483647, %v1956_v13  ;;  %v4227_v18 = vand.u32 2147483648, %v1956_v13 }
 0xb15   : > { %v4225_v15 = vcvt.s32.f32 %v4224_v14  ;;  %vm4223_vm13 = vcmp.lt.f32.partialorder %v4222_v16, 8388608.0 }
 0xb17   : > { %v4226_v17 = vand.u32 2147483647, %v4225_v15 }
 0xb19   : > { %v4228_v23 = vor.u32 %v4227_v18, %v4226_v17 }
 0xb1b   : > { %v4229_v25 = vsel %vm4223_vm13, %v4228_v23, %v1956_v13  ;;  %v3709_v13 = vld [vmem:[%s5463_s24 + $0x10] sm:$0x7f] }
 0xb1c   : > { %v1963_v29 = vmul.f32 %v4307_v22, %v4229_v25  ;;  %v1964_v27 = vadd.f32 %v4229_v25, %v3695_v7  ;;  %v2500_v16 = vrot.slane %v3709_v13, %v4639_v19  ;;  %v2513_v17 = vrot.slane %v3709_v13, %v4641_v20 }
 0xb1d   : > { %v2526_v18 = vrot.slane %v3709_v13, %v4643_v21  ;;  %v2539_v23 = vrot.slane %v3709_v13, %v4648_v24 }
 0xb1e   : > { %v1966_v31 = vmul.f32 %v3691_v56, %v1963_v29  ;;  %v3700_v56 = vld [vmem:[%s5412_s13] ss:$0 sm:$0xff] }
 0xb20   : > { %v1967_v33 = vsub.f32 %v1931_v0, %v1966_v31 }
 0xb22   : > { %v1975_v35 = vmul.f32 %v4309_v32, %v1967_v33  ;;  %v2552_v32 = vrot.slane %v3709_v13, %v4654_v28 }
 0xb24   : > { %v1976_v36 = vadd.f32 %v3692_v1, %v1975_v35  ;;  %v2294_v1 = vld [vmem:[%s5417_s18] sm:$0xff] }
 0xb26   : > { %4310 = vtanh.f32 %v1976_v36 }
 0xb33   : > { %v4311_v37 = vpop.eup %4310 }
 0xb34   : > { %v1978_v38 = vmul.f32 %v4311_v37, %v3693_v8 }
 0xb36   : > { %v1979_v39 = vsub.f32 %v1978_v38, %v3694_v10 }
 0xb38   : > { %v4232_v40 = vcvt.f32.s32 %v1979_v39  ;;  %v4230_v42 = vand.u32 2147483647, %v1979_v39  ;;  %v4235_v44 = vand.u32 2147483648, %v1979_v39 }
 0xb3a   : > { %v4233_v41 = vcvt.s32.f32 %v4232_v40  ;;  %vm4231_vm14 = vcmp.lt.f32.partialorder %v4230_v42, 8388608.0 }
 0xb3c   : > { %v4234_v43 = vand.u32 2147483647, %v4233_v41 }
 0xb3e   : > { %v4236_v45 = vor.u32 %v4235_v44, %v4234_v43  ;;  %v2565_v44 = vrot.slane %v3709_v13, %v4661_v34 }
 0xb40   : > { %v4237_v46 = vsel %vm4231_vm14, %v4236_v45, %v1979_v39 }
 0xb41   : > { %v1981_v47 = vmul.f32 %v4307_v22, %v4237_v46  ;;  %v1982_v48 = vadd.f32 %v4237_v46, %v3695_v7 }
 0xb43   : > { %4076 = vmatmul.mubr.msk.f32.vlgmr.msra.gmra.mxu1 %vm1374_vm10, %v1982_v48  ;;  %v2131_v49 = vmul.f32 %v3696_v12, %v1981_v47 }
 0xb44   : > { %4079 = vmatpush3.msra.mxu1 %v1965_v5  ;;  %4080 = vmatprep.mubr.msk.f32.mxu1 %vm4423_vm1, %v4422_v6 }
 0xb45   : > { %4083 = vmatprep.subr.mxu1 %v4422_v6  ;;  %v2132_v51 = vadd.f32 %v2131_v49, %v1966_v31  ;;  %v2495_v31 = vrot.slane %v3709_v13, %v4650_v26 }
 0xb47   : > { %4081 = vmatmul.mubr.msk.f32.vlgmr.msra.gmra.mxu1 %vm1374_vm10, %v1964_v27 }
 0xb48   : > { %4084 = vmatpush3.msra.mxu1 %v2136_v50  ;;  %4085 = vmatprep.mubr.msk.f32.mxu1 %vm4423_vm1, %v4422_v6 }
 0xb49   : > { %4088 = vmatprep.subr.mxu1 %v4422_v6 }
 0xb4b   : > { %4086 = vmatmul.mubr.msk.f32.vlgmr.msra.gmra.mxu1 %vm1374_vm10, %v2132_v51 }
 0xb4c   : > { %4096 = vmatprep.mubr.msk.f32.mxu1 %vm4423_vm1, %v4422_v6  ;;  %4089 = vmatpush3.msra.mxu1 %v2220_v52 }
 0xb4d   : > { %4090 = vmatprep.subr.mxu1 %v4422_v6 }
 0xb4e   : > { %4091 = vmatpush3.msra.mxu1 %v2219_v53 }
 0xb4f   : > { %4092 = vmatprep.subr.mxu1 %v4422_v6 }
 0xb50   : > { %4093 = vmatpush3.msra.mxu1 %v2218_v54 }
 0xb51   : > { %4094 = vmatprep.subr.mxu1 %v4422_v6 }
 0xb52   : > { %4095 = vmatpush3.msra.mxu1 %v2217_v55 }
 0xb53   : > { %4099 = vmatprep.subr.mxu1 %v4422_v6 }
 0xc03   : > { %v2054_v57 = vpop.f32.mrf.mxu1 }
 0xc05   : > { %v4077_v58 = vpop.f32.mrf.mxu1 }
 0xc07   : > { %v2127_v59 = vpop.f32.mrf.mxu1 }
 0xc08   : > { %v2128_v60 = vadd.f32 %v2127_v59, %v2054_v57 }
 0xc09   : > { %v4082_v30 = vpop.f32.mrf.mxu1 }
 0xc0a   : > { %v4240_v61 = vcvt.f32.s32 %v2128_v60 }
 0xc0b   : > { %v2213_v62 = vpop.f32.mrf.mxu1 }
 0xc0c   : > { %2135 = vst.msk [vmem:[%s702_s2] sm:$0xf] %vm2134_vm15, %v4240_v61  ;;  %v2214_v63 = vadd.f32 %v3700_v56, %v2213_v62  ;;  %s5472_s2 = sld [smem:[#allocation18_spill]]  ;;  %v5074_v61 = vld [vmem:[%s5464_s26 + $0x10] sm:$0x1f] }
 0xc0d   : > { %v4087_v0 = vpop.f32.mrf.mxu1 }
 0xc0e   : > { %4097 = vmatmul.mubr.msk.f32.vlgmr.msra.gmra.mxu1 %vm709_vm0, %v2214_v63 }
 0xc0f   : > { %4101 = vmatprep.mubr.msk.f32.mxu1 %vm4423_vm1, %v4422_v6 }
 0xc12   : > { %v3708_v11 = vld [vmem:[%s5472_s2] ss:$0 sm:$0xff] }
 0xcce   : > { %v2290_v2 = vpop.f32.mrf.mxu1 }
 0xccf   : > { %2298 = vrot.lane.b32.xlu1 %v2290_v2, %s5467_s3  ;;  %4105 = vmatpush3.msk.msra.mxu0 %vm1041_vm7, %v2290_v2 }
 0xcd0   : > { %v4098_v3 = vpop.f32.mrf.mxu1  ;;  %4107 = vmatmul.mubr.msk.f32.vlgmr.msra.gmra.mxu0 %vm2300_vm2, %v2294_v1  ;;  %4120 = vmatprep.subr.mxu0 %v4422_v6 }
 0xcd1   : > { %4152 = vmatprep.mubr.msk.f32.mxu0 %vm4423_vm1, %v4422_v6 }
 0xd41   : > { %v2299_v7 = vpop.permute.xlu1 %2298 }
 0xd42   : > { %4100 = vmatpush3.msk.msra.mxu1 %vm1041_vm7, %v2299_v7 }
 0xd43   : > { %4102 = vmatmul.mubr.msk.f32.vlgmr.msra.gmra.mxu1 %vm2300_vm2, %v3703_v4  ;;  %4109 = vmatprep.subr.mxu1 %v4422_v6  ;;  %v2578_v4 = vrot.slane %v5074_v61, %v4650_v26 }
 0xd44   : > { %4117 = vmatprep.mubr.msk.f32.mxu1 %vm4423_vm1, %v4422_v6 }
 0xd90   : > { %v2447_v8 = vpop.f32.mrf.mxu0 }
 0xd92   : > { %v4108_v9 = vpop.f32.mrf.mxu0 }
 0xe03   : > { %v2372_v10 = vpop.f32.mrf.mxu1 }
 0xe04   : > { %v2448_v12 = vadd.f32 %v2447_v8, %v2372_v10 }
 0xe05   : > { %v4103_v14 = vpop.f32.mrf.mxu1 }
 0xe06   : > { %v5056_v15 = vadd.f32 %v3708_v11, %v2448_v12 }
 0xe08   : > { %v2488_v22 = vrot.slane %v5056_v15, 5 }
 0xe0a   : > { %v2490_v25 = vsel %vm983_vm3, 0.0, %v2488_v22  ;;  %v2491_v29 = vsel %vm983_vm3, %v2488_v22, 0.0  ;;  %v3712_v22 = vld [vmem:[%s5465_s7 + $0x48] sm:$0xff] }
 0xe0b   : > { %v2501_v33 = vmul.f32 %v2500_v16, %v2490_v25  ;;  %v2502_v35 = vmul.f32 %v2500_v16, %v2491_v29  ;;  %v2515_v36 = vmul.f32 %v2513_v17, %v2491_v29  ;;  %v2528_v37 = vmul.f32 %v2526_v18, %v2491_v29 }
 0xe0c   : > { %v2514_v38 = vmul.f32 %v2513_v17, %v2490_v25  ;;  %v2527_v39 = vmul.f32 %v2526_v18, %v2490_v25  ;;  %v2540_v40 = vmul.f32 %v2539_v23, %v2490_v25  ;;  %v2496_v45 = vmul.f32 %v2495_v31, %v2490_v25  ;;  %v3714_v17 = vld [vmem:[%s5465_s7 + $0x58] sm:$0xff]  ;;  %v3713_v18 = vld [vmem:[%s5465_s7 + $0x50] sm:$0xff] }
 0xe0d   : > { %v2505_v41 = vrot.slane %v2501_v33, 1  ;;  %v2506_v42 = vrot.slane %v2502_v35, 1  ;;  %v2519_v43 = vrot.slane %v2515_v36, 2  ;;  %v2532_v47 = vrot.slane %v2528_v37, 3  ;;  %4110 = vmatpush3.msra.mxu1 %v3714_v17 }
 0xe0e   : > { %v2518_v46 = vrot.slane %v2514_v38, 2  ;;  %v2541_v48 = vmul.f32 %v2539_v23, %v2491_v29  ;;  %v2531_v27 = vrot.slane %v2527_v39, 3  ;;  %v2553_v49 = vmul.f32 %v2552_v32, %v2490_v25  ;;  %4111 = vmatprep.subr.mxu1 %v4422_v6  ;;  %v3711_v23 = vld [vmem:[%s5465_s7 + $0x40] sm:$0xff]  ;;  %v3731_v39 = vld [vmem:[%s5408_s9 + $0x178] sm:$0xff] }
 0xe0f   : > { %v2507_v5 = vsel %vm999_vm4, %v2505_v41, %v2506_v42  ;;  %v2554_v50 = vmul.f32 %v2552_v32, %v2491_v29  ;;  %v2544_v52 = vrot.slane %v2540_v40, 4  ;;  %v2566_v55 = vmul.f32 %v2565_v44, %v2490_v25  ;;  %4112 = vmatpush3.msra.mxu1 %v3713_v18  ;;  %4121 = vmatpush3.msra.mxu0 %v3731_v39  ;;  %v3730_v40 = vld [vmem:[%s5408_s9 + $0x170] sm:$0xff]  ;;  %v3729_v41 = vld [vmem:[%s5408_s9 + $0x168] sm:$0xff]  ;;  %v3728_v42 = vld [vmem:[%s5408_s9 + $0x160] sm:$0xff] }
 0xe10   : > { %v2509_v51 = vadd.f32 %v2507_v5, %v2496_v45  ;;  %v2520_v53 = vsel %vm1013_vm5, %v2518_v46, %v2519_v43  ;;  %v2545_v54 = vrot.slane %v2541_v48, 4  ;;  %v2567_v57 = vmul.f32 %v2565_v44, %v2491_v29  ;;  %4113 = vmatprep.subr.mxu1 %v4422_v6  ;;  %4122 = vmatprep.subr.mxu0 %v4422_v6  ;;  %v3727_v43 = vld [vmem:[%s5408_s9 + $0x158] sm:$0xff]  ;;  %v3726_v44 = vld [vmem:[%s5408_s9 + $0x150] sm:$0xff]  ;;  %v3725_v45 = vld [vmem:[%s5408_s9 + $0x148] sm:$0xff] }
 0xe11   : > { %v2533_v59 = vsel %vm1027_vm6, %v2531_v27, %v2532_v47  ;;  %v2557_v60 = vrot.slane %v2553_v49, 5  ;;  %v2558_v30 = vrot.slane %v2554_v50, 5  ;;  %v2570_v63 = vrot.slane %v2566_v55, 6  ;;  %4114 = vmatpush3.msra.mxu1 %v3712_v22  ;;  %4123 = vmatpush3.msra.mxu0 %v3730_v40  ;;  %v3724_v46 = vld [vmem:[%s5408_s9 + $0x140] sm:$0xff]  ;;  %v3723_v47 = vld [vmem:[%s5408_s9 + $0x138] sm:$0xff]  ;;  %v3722_v48 = vld [vmem:[%s5408_s9 + $0x130] sm:$0xff] }
 0xe12   : > { %v2522_v58 = vadd.f32 %v2520_v53, %v2509_v51  ;;  %v2546_v62 = vsel %vm1041_vm7, %v2544_v52, %v2545_v54  ;;  %v2571_v0 = vrot.slane %v2567_v57, 6  ;;  %4115 = vmatprep.subr.mxu1 %v4422_v6  ;;  %v2596_v32 = vrot.slane %v5074_v61, %v4639_v19  ;;  %4124 = vmatprep.subr.mxu0 %v4422_v6  ;;  %v3721_v5 = vld [vmem:[%s5408_s9 + $0x128] sm:$0xff]  ;;  %v3720_v27 = vld [vmem:[%s5408_s9 + $0x120] sm:$0xff]  ;;  %v3719_v49 = vld [vmem:[%s5408_s9 + $0x118] sm:$0xff] }
 0xe13   : > { %v2559_v2 = vsel %vm983_vm3, %v2557_v60, %v2558_v30  ;;  %4116 = vmatpush3.msra.mxu1 %v3711_v23  ;;  %v2601_v36 = vrot.slane %v5074_v61, %v4641_v20  ;;  %4125 = vmatpush3.msra.mxu0 %v3729_v41  ;;  %v3718_v50 = vld [vmem:[%s5408_s9 + $0x110] sm:$0xff]  ;;  %v3717_v51 = vld [vmem:[%s5408_s9 + $0x108] sm:$0xff]  ;;  %v3716_v52 = vld [vmem:[%s5408_s9 + $0x100] sm:$0xff] }
 0xe14   : > { %v2535_v56 = vadd.f32 %v2533_v59, %v2522_v58  ;;  %v2572_v7 = vsel %vm1068_vm8, %v2570_v63, %v2571_v0  ;;  %4155 = vmatprep.subr.mxu1 %v4422_v6  ;;  %4126 = vmatprep.subr.mxu0 %v4422_v6  ;;  %v3732_v53 = vld [vmem:[%s5466_s8 + $0x2] ss:$0 sm:$0xff]  ;;  %v3739_v41 = vld [vmem:[%s5418_s19 + $0x10] sm:$0xff] }
 0xe15   : > { %4127 = vmatpush3.msra.mxu0 %v3728_v42 }
 0xe16   : > { %v2548_v1 = vadd.f32 %v2546_v62, %v2535_v56  ;;  %4128 = vmatprep.subr.mxu0 %v4422_v6 }
 0xe17   : > { %4129 = vmatpush3.msra.mxu0 %v3727_v43 }
 0xe18   : > { %v2561_v3 = vadd.f32 %v2559_v2, %v2548_v1  ;;  %4130 = vmatprep.subr.mxu0 %v4422_v6 }
 0xe19   : > { %4131 = vmatpush3.msra.mxu0 %v3726_v44  ;;  %v2868_v44 = vld [vmem:[%s5418_s19 + $0x8] sm:$0xff] }
 0xe1a   : > { %v2574_v8 = vadd.f32 %v2572_v7, %v2561_v3  ;;  %4132 = vmatprep.subr.mxu0 %v4422_v6 }
 0xe1b   : > { %4133 = vmatpush3.msra.mxu0 %v3725_v45 }
 0xe1c   : > { %v2579_v9 = vadd.f32 %v2578_v4, %v2574_v8  ;;  %4134 = vmatprep.subr.mxu0 %v4422_v6 }
 0xe1d   : > { %4135 = vmatpush3.msra.mxu0 %v3724_v46 }
 0xe1e   : > { %v2580_v10 = vsel %vm709_vm0, %v2579_v9, 0.0  ;;  %4136 = vmatprep.subr.mxu0 %v4422_v6 }
 0xe1f   : > { %2581 = vadd.xlane.f32.xlu1 %v2580_v10  ;;  %4137 = vmatpush3.msra.mxu0 %v3723_v47 }
 0xe20   : > { %4138 = vmatprep.subr.mxu0 %v4422_v6 }
 0xe21   : > { %4139 = vmatpush3.msra.mxu0 %v3722_v48  ;;  %v3746_v48 = vld [vmem:[%s5472_s2 + $0x1] ss:$0 sm:$0xff]  ;;  %s4336_s2 = scalar_lea.vmem %s4335_s17, 128 }
 0xe22   : > { %4140 = vmatprep.subr.mxu0 %v4422_v6  ;;  %p4338_p1 = scmp.lt.s32.totalorder %s4336_s2, %s4330_s25 }
 0xe23   : > { %4141 = vmatpush3.msra.mxu0 %v3721_v5 }
 0xe24   : > { %4142 = vmatprep.subr.mxu0 %v4422_v6  ;;  %p4339_p2 = por %p4338_p1, %p4337_p0 }
 0xe25   : > { %4143 = vmatpush3.msra.mxu0 %v3720_v27 }
 0xe26   : > { %4144 = vmatprep.subr.mxu0 %v4422_v6  ;;  %p4340_p3 = pnand %p4339_p2, %p4333_p13 }
 0xe27   : > { %4145 = vmatpush3.msra.mxu0 %v3719_v49 }
 0xe28   : > { %4146 = vmatprep.subr.mxu0 %v4422_v6 }
 0xe29   : > { %4147 = vmatpush3.msra.mxu0 %v3718_v50  ;;  %v3747_v50 = vld [vmem:[%s5463_s24 + $0x18] sm:$0x7f] }
 0xe2a   : > { %4148 = vmatprep.subr.mxu0 %v4422_v6 }
 0xe2b   : > { %4149 = vmatpush3.msra.mxu0 %v3717_v51 }
 0xe2c   : > { %4150 = vmatprep.subr.mxu0 %v4422_v6 }
 0xe2d   : > { %4151 = vmatpush3.msra.mxu0 %v3716_v52 }
 0xea8   : > { %v2582_v11 = vpop.xlane.xlu1 %2581 }
 0xea9   : > { %v2583_v12 = vmul.f32 0.03125, %v2582_v11 }
 0xeab   : > { %v2584_v13 = vsub.f32 %v2579_v9, %v2583_v12 }
 0xead   : > { %v2585_v14 = vmul.f32 %v2584_v13, %v2584_v13 }
 0xeaf   : > { %v2586_v16 = vsel %vm709_vm0, %v2585_v14, 0.0 }
 0xeb0   : > { %2587 = vadd.xlane.f32.xlu0 %v2586_v16 }
 0xf39   : > { %v2588_v25 = vpop.xlane.xlu0 %2587 }
 0xf3a   : > { %v2589_v29 = vmul.f32 0.03125, %v2588_v25  ;;  %v3737_v25 = vld [vmem:[%s5471_s10 + $0x38] sm:$0xff] }
 0xf3c   : > { %v2590_v31 = vadd.f32 1e-06, %v2589_v29  ;;  %v3736_v29 = vld [vmem:[%s5471_s10 + $0x30] sm:$0xff] }
 0xf3e   : > { %4312 = vrsqrt.f32 %v2590_v31  ;;  %v3735_v31 = vld [vmem:[%s5471_s10 + $0x28] sm:$0xff] }
 0xf4b   : > { %v4313_v33 = vpop.eup %4312 }
 0xf4c   : > { %v2592_v35 = vmul.f32 %v4313_v33, %v2584_v13  ;;  %v2712_v33 = vrot.slane %v5074_v61, %v4643_v21 }
 0xf4e   : > { %v2597_v37 = vmul.f32 %v2596_v32, %v2592_v35  ;;  %v3734_v32 = vld [vmem:[%s5471_s10 + $0x20] sm:$0xff]  ;;  %v2786_v35 = vrot.slane %v5074_v61, %v4648_v24  ;;  %v3740_v61 = vld [vmem:[%s5418_s19 + $0x18] sm:$0xff] }
 0xf50   : > { %v2602_v38 = vadd.f32 %v2601_v36, %v2597_v37 }
 0xf52   : > { %4118 = vmatmul.mubr.msk.f32.vlgmr.msra.gmra.mxu1 %vm709_vm0, %v2602_v38 }
 0xf53   : > { %4163 = vmatprep.mubr.msk.f32.mxu1 %vm4423_vm1, %v4422_v6  ;;  %4156 = vmatpush3.msra.mxu1 %v3737_v25 }
 0xf54   : > { %4157 = vmatprep.subr.mxu1 %v4422_v6 }
 0xf55   : > { %4158 = vmatpush3.msra.mxu1 %v3736_v29 }
 0xf56   : > { %4159 = vmatprep.subr.mxu1 %v4422_v6 }
 0xf57   : > { %4160 = vmatpush3.msra.mxu1 %v3735_v31 }
 0xf58   : > { %4161 = vmatprep.subr.mxu1 %v4422_v6 }
 0xf59   : > { %4162 = vmatpush3.msra.mxu1 %v3734_v32 }
0x1012   : > { %v2678_v54 = vpop.f32.mrf.mxu1 }
0x1013   : > { %v2679_v55 = vadd.f32 %v3732_v53, %v2678_v54  ;;  %v3095_v54 = vrot.slane %v3747_v50, %v4639_v19 }
0x1014   : > { %v4119_v57 = vpop.f32.mrf.mxu1 }
0x1015   : > { %v2683_v58 = vmul.f32 0.70710677, %v2679_v55  ;;  %v2682_v18 = vmul.f32 0.5, %v2679_v55 }
0x1017   : > { %v2684_v59 = vand.u32 2147483647, %v2683_v58  ;;  %vm2704_vm1 = vcmp.ge.f32.partialorder %v2683_v58, 0.0  ;;  %v3114_v58 = vrot.slane %v3747_v50, %v4641_v20 }
0x1019   : > { %v2685_v60 = vmul.f32 0.3275911, %v2684_v59  ;;  %v2698_v56 = vsub.f32 0.0, %v2684_v59 }
0x101b   : > { %v2686_v30 = vadd.f32 1.0, %v2685_v60  ;;  %v2699_v62 = vmul.f32 %v2698_v56, %v2684_v59  ;;  %v3133_v59 = vrot.slane %v3747_v50, %v4643_v21  ;;  %v3089_v56 = vrot.slane %v3747_v50, %v4650_v26 }
0x101d   : > { %4314 = vrcp.f32 %v2686_v30  ;;  %v2700_v1 = vmul.f32 1.442695, %v2699_v62 }
0x101f   : > { %4316 = vpow2.f32 %v2700_v1  ;;  %v3171_v1 = vrot.slane %v3747_v50, %v4654_v28 }
0x102a   : > { %v4315_v63 = vpop.eup %4314 }
0x102b   : > { %v2689_v0 = vmul.f32 1.0614054, %v4315_v63 }
0x102c   : > { %v4317_v12 = vpop.eup %4316 }
0x102d   : > { %v2690_v2 = vadd.f32 -1.4531521, %v2689_v0  ;;  %v3152_v0 = vrot.slane %v3747_v50, %v4648_v24 }
0x102f   : > { %v2691_v3 = vmul.f32 %v4315_v63, %v2690_v2 }
0x1031   : > { %v2692_v4 = vadd.f32 1.4214138, %v2691_v3 }
0x1033   : > { %v2693_v7 = vmul.f32 %v4315_v63, %v2692_v4 }
0x1035   : > { %v2694_v8 = vadd.f32 -0.28449672, %v2693_v7 }
0x1037   : > { %v2695_v9 = vmul.f32 %v4315_v63, %v2694_v8 }
0x1039   : > { %v2696_v10 = vadd.f32 0.2548296, %v2695_v9 }
0x103b   : > { %v2697_v11 = vmul.f32 %v4315_v63, %v2696_v10 }
0x103d   : > { %v2702_v13 = vmul.f32 %v4317_v12, %v2697_v11 }
0x103f   : > { %v2703_v14 = vsub.f32 1.0, %v2702_v13 }
0x1041   : > { %v2705_v16 = vsub.f32 0.0, %v2703_v14 }
0x1043   : > { %v2706_v17 = vsel %vm2704_vm1, %v2703_v14, %v2705_v16  ;;  %v3190_v16 = vrot.slane %v3747_v50, %v4661_v34 }
0x1044   : > { %v2707_v22 = vadd.f32 1.0, %v2706_v17 }
0x1046   : > { %v2708_v23 = vmul.f32 %v2707_v22, %v2682_v18 }
0x1048   : > { %4153 = vmatmul.mubr.f32.vlgmr.msra.gmra.mxu0 %v2708_v23 }
0x1108   : > { %v2779_v36 = vpop.f32.mrf.mxu0 }
0x1109   : > { %v2780_v37 = vadd.f32 %v2779_v36, %v2712_v33 }
0x110a   : > { %v4154_v38 = vpop.f32.mrf.mxu0 }
0x110b   : > { %v2787_v39 = vmul.f32 %v2786_v35, %v2780_v37 }
0x110d   : > { %v2788_v40 = vadd.f32 %v2787_v39, %v5056_v15  ;;  %v2867_v15 = vld [vmem:[%s5418_s19] sm:$0xff] }
0x110f   : > { %4164 = vmatmul.mubr.msk.f32.vlgmr.msra.gmra.mxu1 %vm709_vm0, %v2788_v40 }
0x1110   : > { %4168 = vmatprep.mubr.msk.f32.mxu1 %vm1374_vm10, %v3739_v41 }
0x11cf   : > { %v2863_v6 = vpop.f32.mrf.mxu1 }
0x11d0   : > { %2873 = vrot.lane.b32.xlu0 %v2863_v6, %s5467_s3  ;;  %s3490_s3 = scalar_lea.sflag [#allocation5], %s4954_s5 }
0x11d1   : > { %v4165_v42 = vpop.f32.mrf.mxu1 }
0x1242   : > { %v2874_v43 = vpop.permute.xlu0 %2873 }
0x1243   : > { %4166 = vmatprep.subr.mxu1 %v2874_v43 }
0x1244   : > { %4167 = vmatpush3.msra.mxu1 %v2874_v43 }
0x1245   : > { %4169 = vmatmul.mubr.msk.f32.vlgmr.msra.gmra.mxu1 %vm1374_vm10, %v3740_v61  ;;  %4171 = vmatprep.subr.mxu1 %v2863_v6 }
0x1246   : > { %4172 = vmatpush3.msra.mxu1 %v2863_v6  ;;  %4173 = vmatprep.mubr.msk.f32.mxu1 %vm1374_vm10, %v2867_v15 }
0x1249   : > { %4174 = vmatmul.mubr.msk.f32.vlgmr.msra.gmra.mxu1 %vm1374_vm10, %v2868_v44 }
0x1305   : > { %v4170_v45 = vpop.f32.mrf.mxu1 }
0x1307   : > { %v2948_v46 = vpop.f32.mrf.mxu1 }
0x1309   : > { %v4175_v47 = vpop.f32.mrf.mxu1 }
0x130a   : > { %v3035_v5 = vadd.f32 %v4175_v47, %v4170_v45 }
0x130b   : > { %v3029_v27 = vpop.f32.mrf.mxu1 }
0x130c   : > { %v5213_v49 = vadd.f32 %v3746_v48, %v3035_v5  ;;  %v3030_v51 = vadd.f32 %v3029_v27, %v2948_v46  ;;  %v5240_v5 = vld [vmem:[%s5464_s26 + $0x18] sm:$0x1f] }
0x130e   : > { %v3079_v52 = vrot.slane %v5213_v49, 5  ;;  %v5219_v53 = vadd.f32 %v3746_v48, %v3030_v51 }
0x1310   : > { %v3085_v55 = vsel %vm983_vm3, %v3079_v52, 0.0  ;;  %v3078_v57 = vrot.slane %v5219_v53, 5 }
0x1311   : > { %v3098_v62 = vmul.f32 %v3095_v54, %v3085_v55  ;;  %v3117_v17 = vmul.f32 %v3114_v58, %v3085_v55  ;;  %v3136_v18 = vmul.f32 %v3133_v59, %v3085_v55  ;;  %v3155_v42 = vmul.f32 %v3152_v0, %v3085_v55 }
0x1312   : > { %v3080_v60 = vsel %vm983_vm3, %v3078_v57, %v3079_v52  ;;  %v3084_v30 = vsel %vm983_vm3, 0.0, %v3078_v57  ;;  %v3174_v48 = vmul.f32 %v3171_v1, %v3085_v55 }
0x1313   : > { %v3096_v63 = vmul.f32 %v3095_v54, %v3084_v30  ;;  %v3097_v2 = vmul.f32 %v3095_v54, %v3080_v60  ;;  %v3115_v3 = vmul.f32 %v3114_v58, %v3084_v30  ;;  %v3116_v4 = vmul.f32 %v3114_v58, %v3080_v60 }
0x1314   : > { %v3134_v7 = vmul.f32 %v3133_v59, %v3084_v30  ;;  %v3135_v9 = vmul.f32 %v3133_v59, %v3080_v60  ;;  %v3153_v10 = vmul.f32 %v3152_v0, %v3084_v30  ;;  %v3154_v11 = vmul.f32 %v3152_v0, %v3080_v60 }
0x1315   : > { %v3102_v8 = vrot.slane %v3096_v63, 1  ;;  %v3103_v12 = vrot.slane %v3097_v2, 1  ;;  %v3121_v13 = vrot.slane %v3115_v3, 2  ;;  %v3122_v14 = vrot.slane %v3116_v4, 2 }
0x1316   : > { %v3090_v22 = vmul.f32 %v3089_v56, %v3084_v30  ;;  %v3140_v23 = vrot.slane %v3134_v7, 3  ;;  %v3141_v28 = vrot.slane %v3135_v9, 3  ;;  %v3172_v29 = vmul.f32 %v3171_v1, %v3084_v30 }
0x1317   : > { %v3104_v25 = vsel %vm999_vm4, %v3102_v8, %v3103_v12  ;;  %v3173_v31 = vmul.f32 %v3171_v1, %v3080_v60  ;;  %v3105_v32 = vrot.slane %v3098_v62, 1  ;;  %v3159_v35 = vrot.slane %v3153_v10, 4 }
0x1318   : > { %v3109_v33 = vadd.f32 %v3104_v25, %v3090_v22  ;;  %v3160_v36 = vrot.slane %v3154_v11, 4  ;;  %v3123_v37 = vsel %vm1013_vm5, %v3121_v13, %v3122_v14  ;;  %v3191_v38 = vmul.f32 %v3190_v16, %v3084_v30 }
0x1319   : > { %v3192_v39 = vmul.f32 %v3190_v16, %v3080_v60  ;;  %v3091_v40 = vmul.f32 %v3089_v56, %v3080_v60  ;;  %v3124_v41 = vrot.slane %v3117_v17, 2  ;;  %v3106_v6 = vsel %vm999_vm4, %v3103_v12, %v3105_v32  ;;  %v3751_v32 = vld [vmem:[%s5465_s7 + $0x70] sm:$0xff] }
0x131a   : > { %v3128_v34 = vadd.f32 %v3123_v37, %v3109_v33  ;;  %v3142_v43 = vsel %vm1027_vm6, %v3140_v23, %v3141_v28  ;;  %v3178_v61 = vrot.slane %v3172_v29, 5  ;;  %v3179_v15 = vrot.slane %v3173_v31, 5  ;;  %v3752_v31 = vld [vmem:[%s5465_s7 + $0x78] sm:$0xff]  ;;  %v3750_v33 = vld [vmem:[%s5465_s7 + $0x68] sm:$0xff] }
0x131b   : > { %v3110_v44 = vadd.f32 %v3106_v6, %v3091_v40  ;;  %v3125_v46 = vsel %vm1013_vm5, %v3122_v14, %v3124_v41  ;;  %v3143_v47 = vrot.slane %v3136_v18, 3  ;;  %v3161_v27 = vsel %vm1041_vm7, %v3159_v35, %v3160_v36  ;;  %4176 = vmatprep.subr.mxu1 %v3752_v31  ;;  %v3749_v35 = vld [vmem:[%s5465_s7 + $0x60] sm:$0xff] }
0x131c   : > { %v3147_v45 = vadd.f32 %v3142_v43, %v3128_v34  ;;  %v3197_v50 = vrot.slane %v3191_v38, 6  ;;  %v3198_v51 = vrot.slane %v3192_v39, 6  ;;  %v3162_v58 = vrot.slane %v3155_v42, 4  ;;  %4177 = vmatpush3.msra.mxu1 %v3752_v31 }
0x131d   : > { %v3129_v52 = vadd.f32 %v3125_v46, %v3110_v44  ;;  %v3144_v57 = vsel %vm1027_vm6, %v3141_v28, %v3143_v47  ;;  %v3193_v59 = vmul.f32 %v3190_v16, %v3085_v55  ;;  %v3180_v60 = vsel %vm983_vm3, %v3178_v61, %v3179_v15  ;;  %4178 = vmatprep.subr.mxu1 %v3751_v32 }
0x131e   : > { %v3166_v54 = vadd.f32 %v3161_v27, %v3147_v45  ;;  %v3209_v62 = vrot.slane %v5240_v5, %v4650_v26  ;;  %v3163_v63 = vsel %vm1041_vm7, %v3160_v36, %v3162_v58  ;;  %v3181_v0 = vrot.slane %v3174_v48, 5  ;;  %4179 = vmatpush3.msra.mxu1 %v3751_v32  ;;  %v3769_v48 = vld [vmem:[%s5408_s9 + $0x1f8] sm:$0xff]  ;;  %v3766_v27 = vld [vmem:[%s5408_s9 + $0x1e0] sm:$0xff]  ;;  %v3760_v58 = vld [vmem:[%s5408_s9 + $0x1b0] sm:$0xff] }
0x131f   : > { %v3148_v30 = vadd.f32 %v3144_v57, %v3129_v52  ;;  %v3199_v1 = vsel %vm1068_vm8, %v3197_v50, %v3198_v51  ;;  %v3200_v7 = vrot.slane %v3193_v59, 6  ;;  %4180 = vmatprep.subr.mxu1 %v3750_v33  ;;  %v3241_v34 = vrot.slane %v5240_v5, %v4639_v19  ;;  %v3768_v19 = vld [vmem:[%s5408_s9 + $0x1f0] sm:$0xff]  ;;  %v3765_v50 = vld [vmem:[%s5408_s9 + $0x1d8] sm:$0xff]  ;;  %v3763_v52 = vld [vmem:[%s5408_s9 + $0x1c8] sm:$0xff] }
0x1320   : > { %v3185_v56 = vadd.f32 %v3180_v60, %v3166_v54  ;;  %v3182_v4 = vsel %vm983_vm3, %v3179_v15, %v3181_v0  ;;  %4181 = vmatpush3.msra.mxu1 %v3750_v33  ;;  %v3247_v43 = vrot.slane %v5240_v5, %v4641_v20  ;;  %v3767_v20 = vld [vmem:[%s5408_s9 + $0x1e8] sm:$0xff]  ;;  %v3762_v54 = vld [vmem:[%s5408_s9 + $0x1c0] sm:$0xff]  ;;  %v3761_v57 = vld [vmem:[%s5408_s9 + $0x1b8] sm:$0xff] }
0x1321   : > { %v3167_v2 = vadd.f32 %v3163_v63, %v3148_v30  ;;  %v3201_v55 = vsel %vm1068_vm8, %v3198_v51, %v3200_v7  ;;  %4182 = vmatprep.subr.mxu1 %v3749_v35  ;;  %v3764_v51 = vld [vmem:[%s5408_s9 + $0x1d0] sm:$0xff]  ;;  %v3759_v59 = vld [vmem:[%s5408_s9 + $0x1a8] sm:$0xff]  ;;  %v3758_v60 = vld [vmem:[%s5408_s9 + $0x1a0] sm:$0xff] }
0x1322   : > { %v3204_v3 = vadd.f32 %v3199_v1, %v3185_v56  ;;  %4183 = vmatpush3.msra.mxu1 %v3749_v35  ;;  %v3757_v30 = vld [vmem:[%s5408_s9 + $0x198] sm:$0xff]  ;;  %v3756_v56 = vld [vmem:[%s5408_s9 + $0x190] sm:$0xff]  ;;  %v3754_v63 = vld [vmem:[%s5408_s9 + $0x180] sm:$0xff] }
0x1323   : > { %v3186_v8 = vadd.f32 %v3182_v4, %v3167_v2  ;;  %4187 = vmatprep.subr.mxu1 %v3769_v48  ;;  %v3770_v0 = vld [vmem:[%s5466_s8 + $0x3] ss:$0 sm:$0xff] }
0x1324   : > { %v3210_v9 = vadd.f32 %v3209_v62, %v3204_v3 }
0x1325   : > { %v3205_v10 = vadd.f32 %v3201_v55, %v3186_v8 }
0x1326   : > { %v3212_v11 = vsel %vm709_vm0, %v3210_v9, 0.0 }
0x1327   : > { %3213 = vadd.xlane.f32.xlu1 %v3212_v11  ;;  %v3211_v12 = vadd.f32 %v3209_v62, %v3205_v10  ;;  %v3755_v62 = vld [vmem:[%s5408_s9 + $0x188] sm:$0xff] }
0x1329   : > { %v3215_v26 = vsel %vm709_vm0, %v3211_v12, 0.0 }
0x132a   : > { %3216 = vadd.xlane.f32.xlu0 %v3215_v26 }
0x13b0   : > { %v3214_v13 = vpop.xlane.xlu1 %3213 }
0x13b1   : > { %v3218_v14 = vmul.f32 0.03125, %v3214_v13 }
0x13b3   : > { %v3220_v16 = vsub.f32 %v3210_v9, %v3218_v14  ;;  %v3217_v17 = vpop.xlane.xlu0 %3216 }
0x13b4   : > { %v3219_v18 = vmul.f32 0.03125, %v3217_v17 }
0x13b5   : > { %v3222_v22 = vmul.f32 %v3220_v16, %v3220_v16 }
0x13b6   : > { %v3221_v23 = vsub.f32 %v3211_v12, %v3219_v18 }
0x13b7   : > { %v3224_v25 = vsel %vm709_vm0, %v3222_v22, 0.0 }
0x13b8   : > { %3225 = vadd.xlane.f32.xlu1 %v3224_v25  ;;  %v3223_v28 = vmul.f32 %v3221_v23, %v3221_v23 }
0x13ba   : > { %v3227_v29 = vsel %vm709_vm0, %v3223_v28, 0.0 }
0x13bc   : > { %3228 = vadd.xlane.f32.xlu1 %v3227_v29 }
0x1441   : > { %v3226_v36 = vpop.xlane.xlu1 %3225 }
0x1442   : > { %v3230_v37 = vmul.f32 0.03125, %v3226_v36 }
0x1444   : > { %v3232_v38 = vadd.f32 1e-06, %v3230_v37 }
0x1445   : > { %v3229_v39 = vpop.xlane.xlu1 %3228 }
0x1446   : > { %4318 = vrsqrt.f32 %v3232_v38  ;;  %v3231_v40 = vmul.f32 0.03125, %v3229_v39 }
0x1448   : > { %v3233_v41 = vadd.f32 1e-06, %v3231_v40 }
0x144a   : > { %4320 = vrsqrt.f32 %v3233_v41 }
0x1453   : > { %v4319_v6 = vpop.eup %4318 }
0x1454   : > { %v3236_v42 = vmul.f32 %v4319_v6, %v3220_v16 }
0x1456   : > { %v3242_v61 = vmul.f32 %v3241_v34, %v3236_v42 }
0x1457   : > { %v4321_v15 = vpop.eup %4320 }
0x1458   : > { %v3237_v44 = vmul.f32 %v4321_v15, %v3221_v23  ;;  %v3248_v45 = vadd.f32 %v3247_v43, %v3242_v61 }
0x145a   : > { %v3243_v46 = vmul.f32 %v3241_v34, %v3237_v44  ;;  %4184 = vmatprep.mubr.msk.f32.mxu1 %vm709_vm0, %v3248_v45 }
0x145c   : > { %v3249_v47 = vadd.f32 %v3247_v43, %v3243_v46 }
0x145e   : > { %4185 = vmatmul.mubr.msk.f32.vlgmr.msra.gmra.mxu1 %vm709_vm0, %v3249_v47 }
0x145f   : > { %4188 = vmatpush3.msra.mxu1 %v3769_v48 }
0x1460   : > { %4189 = vmatprep.subr.mxu1 %v3768_v19 }
0x1461   : > { %4190 = vmatpush3.msra.mxu1 %v3768_v19 }
0x1462   : > { %4191 = vmatprep.subr.mxu1 %v3767_v20 }
0x1463   : > { %4192 = vmatpush3.msra.mxu1 %v3767_v20 }
0x1464   : > { %4193 = vmatprep.subr.mxu1 %v3766_v27 }
0x1465   : > { %4194 = vmatpush3.msra.mxu1 %v3766_v27 }
0x1466   : > { %4195 = vmatprep.subr.mxu1 %v3765_v50 }
0x1467   : > { %4196 = vmatpush3.msra.mxu1 %v3765_v50 }
0x1468   : > { %4197 = vmatprep.subr.mxu1 %v3764_v51 }
0x1469   : > { %4198 = vmatpush3.msra.mxu1 %v3764_v51 }
0x146a   : > { %4199 = vmatprep.subr.mxu1 %v3763_v52 }
0x146b   : > { %4200 = vmatpush3.msra.mxu1 %v3763_v52 }
0x146c   : > { %4201 = vmatprep.subr.mxu1 %v3762_v54 }
0x146d   : > { %4202 = vmatpush3.msra.mxu1 %v3762_v54 }
0x146e   : > { %4203 = vmatprep.subr.mxu1 %v3761_v57 }
0x146f   : > { %4204 = vmatpush3.msra.mxu1 %v3761_v57 }
0x1470   : > { %4205 = vmatprep.subr.mxu1 %v3760_v58 }
0x1471   : > { %4206 = vmatpush3.msra.mxu1 %v3760_v58 }
0x1472   : > { %4207 = vmatprep.subr.mxu1 %v3759_v59 }
0x1473   : > { %4208 = vmatpush3.msra.mxu1 %v3759_v59 }
0x1474   : > { %4209 = vmatprep.subr.mxu1 %v3758_v60 }
0x1475   : > { %4210 = vmatpush3.msra.mxu1 %v3758_v60 }
0x1476   : > { %4211 = vmatprep.subr.mxu1 %v3757_v30 }
0x1477   : > { %4212 = vmatpush3.msra.mxu1 %v3757_v30 }
0x1478   : > { %4213 = vmatprep.subr.mxu1 %v3756_v56 }
0x1479   : > { %4214 = vmatpush3.msra.mxu1 %v3756_v56 }
0x147a   : > { %4215 = vmatprep.subr.mxu1 %v3755_v62 }
0x147b   : > { %4216 = vmatpush3.msra.mxu1 %v3755_v62 }
0x147c   : > { %4217 = vmatprep.subr.mxu1 %v3754_v63 }
0x147d   : > { %4218 = vmatpush3.msra.mxu1 %v3754_v63 }
0x151e   : > { %v4186_v1 = vpop.f32.mrf.mxu1 }
0x151f   : > { %v3334_v2 = vadd.f32 %v4186_v1, %v3770_v0 }
0x1520   : > { %v3328_v3 = vpop.f32.mrf.mxu1 }
0x1521   : > { %v3340_v4 = vmul.f32 0.70710677, %v3334_v2  ;;  %v3329_v7 = vadd.f32 %v3770_v0, %v3328_v3  ;;  %v3338_v58 = vmul.f32 0.5, %v3334_v2 }
0x1523   : > { %v3342_v8 = vand.u32 2147483647, %v3340_v4  ;;  %v3339_v9 = vmul.f32 0.70710677, %v3329_v7  ;;  %vm3382_vm3 = vcmp.ge.f32.partialorder %v3340_v4, 0.0  ;;  %v3337_v54 = vmul.f32 0.5, %v3329_v7 }
0x1525   : > { %v3344_v55 = vmul.f32 0.3275911, %v3342_v8  ;;  %v3341_v10 = vand.u32 2147483647, %v3339_v9  ;;  %v3370_v13 = vsub.f32 0.0, %v3342_v8  ;;  %vm3381_vm4 = vcmp.ge.f32.partialorder %v3339_v9, 0.0 }
0x1527   : > { %v3346_v11 = vadd.f32 1.0, %v3344_v55  ;;  %v3343_v12 = vmul.f32 0.3275911, %v3341_v10  ;;  %v3369_v14 = vsub.f32 0.0, %v3341_v10  ;;  %v3372_v16 = vmul.f32 %v3370_v13, %v3342_v8 }
0x1529   : > { %4322 = vrcp.f32 %v3346_v11  ;;  %v3345_v26 = vadd.f32 1.0, %v3343_v12  ;;  %v3371_v18 = vmul.f32 %v3369_v14, %v3341_v10  ;;  %v3375_v23 = vmul.f32 1.442695, %v3372_v16 }
0x152b   : > { %4324 = vrcp.f32 %v3345_v26  ;;  %v3373_v29 = vmul.f32 1.442695, %v3371_v18 }
0x152c   : > { %4326 = vpow2.f32 %v3375_v23 }
0x152d   : > { %4328 = vpow2.f32 %v3373_v29 }
0x1536   : > { %v4323_v17 = vpop.eup %4322 }
0x1537   : > { %v3352_v22 = vmul.f32 1.0614054, %v4323_v17 }
0x1538   : > { %v4325_v25 = vpop.eup %4324 }
0x1539   : > { %v3354_v28 = vadd.f32 -1.4531521, %v3352_v22  ;;  %v3351_v31 = vmul.f32 1.0614054, %v4325_v25  ;;  %v4327_v61 = vpop.eup %4326 }
0x153a   : > { %v4329_v46 = vpop.eup %4328 }
0x153b   : > { %v3356_v32 = vmul.f32 %v4323_v17, %v3354_v28  ;;  %v3353_v33 = vadd.f32 -1.4531521, %v3351_v31 }
0x153d   : > { %v3358_v35 = vadd.f32 1.4214138, %v3356_v32  ;;  %v3355_v36 = vmul.f32 %v4325_v25, %v3353_v33 }
0x153f   : > { %v3360_v37 = vmul.f32 %v4323_v17, %v3358_v35  ;;  %v3357_v38 = vadd.f32 1.4214138, %v3355_v36 }
0x1541   : > { %v3362_v39 = vadd.f32 -0.28449672, %v3360_v37  ;;  %v3359_v40 = vmul.f32 %v4325_v25, %v3357_v38 }
0x1543   : > { %v3364_v41 = vmul.f32 %v4323_v17, %v3362_v39  ;;  %v3361_v34 = vadd.f32 -0.28449672, %v3359_v40 }
0x1545   : > { %v3366_v6 = vadd.f32 0.2548296, %v3364_v41  ;;  %v3363_v42 = vmul.f32 %v4325_v25, %v3361_v34 }
0x1547   : > { %v3368_v43 = vmul.f32 %v4323_v17, %v3366_v6  ;;  %v3365_v15 = vadd.f32 0.2548296, %v3363_v42 }
0x1549   : > { %v3378_v44 = vmul.f32 %v4327_v61, %v3368_v43  ;;  %v3367_v45 = vmul.f32 %v4325_v25, %v3365_v15 }
0x154b   : > { %v3380_v47 = vsub.f32 1.0, %v3378_v44  ;;  %v3377_v48 = vmul.f32 %v4329_v46, %v3367_v45 }
0x154d   : > { %v3384_v19 = vsub.f32 0.0, %v3380_v47  ;;  %v3379_v20 = vsub.f32 1.0, %v3377_v48 }
0x154f   : > { %v3386_v27 = vsel %vm3382_vm3, %v3380_v47, %v3384_v19  ;;  %v3383_v50 = vsub.f32 0.0, %v3379_v20 }
0x1550   : > { %v3388_v51 = vadd.f32 1.0, %v3386_v27 }
0x1551   : > { %v3385_v52 = vsel %vm3381_vm4, %v3379_v20, %v3383_v50 }
0x1552   : > { %v3387_v57 = vadd.f32 1.0, %v3385_v52  ;;  %v3390_v60 = vmul.f32 %v3388_v51, %v3338_v58 }
0x1554   : > { %v3389_v59 = vmul.f32 %v3387_v57, %v3337_v54 }
0x1556   : > { %4219 = vmatprep.mubr.f32.mxu1 %v3389_v59 }
0x1557   : > { %4220 = vmatmul.mubr.f32.vlgmr.msra.gmra.mxu1 %v3390_v60 }
0x1558   : > { %4343 = shalt.err (!%p4340_p3)
}
0x1559   : > { %s4344_s30 = scalar_lea.hbm %s3520_s0, 64  ;;  %s4348_s23 = scalar_lea.hbm %s5421_s22, 128 }
0x155a   : > { %p4345_p4 = scmp.ne.s32.totalorder %s3520_s0, %s4344_s30  ;;  %p4349_p9 = scmp.lt.s32.totalorder %s3520_s0, %s5421_s22 }
0x155b   : > { %p4350_p10 = scmp.lt.s32.totalorder %s4348_s23, %s4344_s30 }
0x155c   : > { %p4346_p7 = pnand %p4345_p4, %p4582_p5 }
0x155d   : > { %p4351_p11 = por %p4350_p10, %p4349_p9 }
0x155e   : > { %p4347_p8 = pneg %p4346_p7 }
0x1560   : > { %p4352_p12 = pnand %p4351_p11, %p4347_p8 }
0x1562   : > { %4355 = shalt.err (!%p4352_p12)
}
0x1563   : > { %4242 = dma.vmem_to_hbm [thread:$0]  (%p4582_p5), %s3523_s11, 64, %s3520_s0, %s3490_s3   ;;  %v3394_v30 = vrot.slane %v5240_v5, %v4643_v21  ;;  %v3473_v56 = vrot.slane %v5240_v5, %v4648_v24 }
0x1564   : > { %s3641_s2 = sshll.u32 %s4954_s5, 4  ;;  %s3781_s7 = sshll.u32 %s4565_s4, 8 }
0x1565   : > { %s680_s8 = scalar_lea.vmem [#allocation2], %s3641_s2  ;;  %s5352_s3 = scalar_lea.hbm %s5419_s20, %s3781_s7 }
0x1566   : > { %s3503_s25 = sshll.u32 %s680_s8, 4  ;;  %s3481_s4 = scalar_lea.sflag [#allocation3], %s4954_s5  ;;  %s5354_s25 = int_to_ptr.vmem [resolvable:$true] %s3503_s25 }
0x1567   : > { %s4356_s16 = scalar_lea.vmem %s5354_s25, 256  ;;  %s4426_s17 = smov [#allocation2]  }
0x1568   : > { %p4357_p13 = scmp.ne.s32.totalorder %s5354_s25, %s4356_s16  ;;  %s4360_s30 = sshll.u32 %s4426_s17, 4  ;;  %s4361_s30 = int_to_ptr.vmem [resolvable:$false] %s4360_s30 }
0x1569   : > { %s4362_s1 = scalar_lea.vmem %s4361_s30, 512  ;;  %p4363_p2 = scmp.lt.s32.totalorder %s5354_s25, %s4361_s30 }
0x156a   : > { %p4358_p0 = pnand %p4357_p13, %p4582_p5  ;;  %p4364_p3 = scmp.lt.s32.totalorder %s4362_s1, %s4356_s16 }
0x156c   : > { %p4359_p1 = pneg %p4358_p0  ;;  %p4365_p4 = por %p4364_p3, %p4363_p2 }
0x156e   : > { %p4366_p7 = pnand %p4365_p4, %p4359_p1 }
0x1617   : > { %v4221_v62 = vpop.f32.mrf.mxu1 }
0x1618   : > { %v3467_v63 = vadd.f32 %v4221_v62, %v3394_v30 }
0x1619   : > { %v3461_v0 = vpop.f32.mrf.mxu1 }
0x161a   : > { %v3475_v1 = vmul.f32 %v3473_v56, %v3467_v63  ;;  %v3462_v2 = vadd.f32 %v3461_v0, %v3394_v30 }
0x161c   : > { %v3477_v3 = vadd.f32 %v3475_v1, %v5213_v49  ;;  %v3474_v4 = vmul.f32 %v3473_v56, %v3462_v2 }
0x161e   : > { %3479 = vst.msk [vmem:[%s680_s8 + $0x8] sm:$0xff] %vm709_vm0, %v3477_v3  ;;  %v3476_v21 = vadd.f32 %v3474_v4, %v5219_v53 }
0x1620   : > { %3478 = vst.msk [vmem:[%s680_s8] sm:$0xff] %vm709_vm0, %v3476_v21 }
0x1621   : > { %4369 = shalt.err (!%p4366_p7)
}
0x1622   : > { %s4370_s29 = scalar_lea.hbm %s5352_s3, 256  ;;  %s4374_s7 = scalar_lea.hbm %s5419_s20, 512 }
0x1623   : > { %p4371_p8 = scmp.ne.s32.totalorder %s5352_s3, %s4370_s29  ;;  %p4375_p11 = scmp.lt.s32.totalorder %s5352_s3, %s5419_s20 }
0x1624   : > { %p4376_p12 = scmp.lt.s32.totalorder %s4374_s7, %s4370_s29 }
0x1625   : > { %p4372_p9 = pnand %p4371_p8, %p4582_p5 }
0x1626   : > { %p4377_p13 = por %p4376_p12, %p4375_p11 }
0x1627   : > { %p4373_p10 = pneg %p4372_p9 }
0x1629   : > { %p4378_p0 = pnand %p4377_p13, %p4373_p10 }
0x162b   : > { %4381 = shalt.err (!%p4378_p0)
}
0x162c   : > { %s4427_s0 = smov 128   ;;  %s4428_s16 = smov 8  }
0x162d   : > { %4241 = dma.vmem_to_hbm [thread:$0]  (%p4582_p5), %s5354_s25, 256, %s5352_s3, %s3481_s4, %s4427_s0, %s4427_s0, %s4428_s16  }
0x162e PF: > { %s5473_s17 = sld [smem:[#allocation10_spill]] }
0x162f   : > { %s5474_s30 = sld [smem:[#allocation8_spill]] }
0x1634   : > { %p4252_p1 = scmp.ge.s32.totalorder %s5473_s17, 2 }
0x1635   : > { %s3534_s23 = sand.u32 1, %s5474_s30  }
0x1636   : > { %p4246_p2 = pnand %p4252_p1, %p4586_p6  ;;  %s3535_s29 = scalar_lea.sflag [#allocation3], %s3534_s23 }
0x1638   : > { %p4247_p3 = pneg %p4246_p2 }
0x163a   : > { %4399 = dma.done.wait (%p4247_p3), %s3535_s29, 256  }
0x163b   : > { %4401 = vsyncadd (%p4247_p3), %s3535_s29, 4294967040  ;;  %s3551_s2 = scalar_lea.sflag [#allocation5], %s3534_s23 }
0x163c   : > { %4403 = dma.done.wait (%p4247_p3), %s3551_s2, 64  }
0x163d   : > { %4405 = vsyncadd (%p4247_p3), %s3551_s2, 4294967232  ;;  %s5476_s30 = sld [smem:[#allocation11_spill]]  ;;  %s5479_s3 = smov %s4412_s28 }
0x163e   : > { %s5477_s6 = sld [smem:[#allocation9_spill]] }
0x163f   : > { %s5478_s29 = sld [smem:[#allocation12_spill]] }
0x1643   : > { %p36_p5 = scmp.ge.s32.totalorder %s5476_s30, 4  }
0x1644   : > { %s5480_s28 = smov %s5477_s6 }
0x1645   :  { %38 = sbr.rel (!%p36_p5) target bundleno = 19 (0x13), region = 188 }
0x164a   :  { %3556 = vsyncpa [#allocation3], 1 }
0x164b   :  { %3558 = vsyncpa [#allocation3 + $0x1], 1 }
0x164c   :  { %3559 = vsyncpa [#allocation5], 1 }
0x164d   :  { %3561 = vsyncpa [#allocation5 + $0x1], 1 }

</bundles_post_ra>
